<compile_context>
chip_gen: v5e
topology: v5e:2x2
jax: 0.10.0
libtpu: 0.0.40
codegen_flags: <defaults>
</compile_context>

<pallas_src>
import jax
import jax.numpy as jnp
from jax import lax
from jax.experimental import pallas as pl
from jax.experimental.pallas import tpu as pltpu


def _round_up(n, m):
    return (n + m - 1) // m * m


def _pick_tw(W):
    """Largest W-block in {64,32,16,8} that divides W and gives >=2 blocks."""
    for t in (64, 32, 16, 8):
        if W % t == 0 and W // t >= 2:
            return t
    return W


def _make_cc_kernel(H, W, C, Cqp, Tw):
    """Build the criss-cross attention kernel for static shapes."""
    bf = jnp.bfloat16

    def kernel(x_ref, wqkv_ref, bqkv_ref, gamma_ref, o_ref, q_scr, k_scr, v_scr):
        # x_ref:    (H, W, C)      bf16, row (NHWC) layout, full image (resident)
        # wqkv_ref: (C, 2*Cqp+C)   bf16  [Wq^T|pad|Wk^T|pad|Wv^T]
        # bqkv_ref: (1, 2*Cqp+C)   f32
        # gamma_ref:(1, 1)         f32 in SMEM
        # o_ref:    (H, Tw, C)     bf16, output W-block
        # q/k/v_scr: persistent VMEM scratch, bf16 row layout (per image)
        j = pl.program_id(1)

        # ---- fused Q/K/V 1x1 conv, once per image (j == 0) ------------------
        @pl.when(j == 0)
        def _():
            x = x_ref[...]                                           # (H, W, C)
            qkv = jnp.dot(x.reshape(H * W, C), wqkv_ref[...],
                          preferred_element_type=jnp.float32)
            qkv = (qkv + bqkv_ref[...]).astype(bf)                   # bf16 once
            # 128-lane aligned segment starts -> free views, no copies.
            q_scr[...] = qkv[:, :Cqp].reshape(H, W, Cqp)
            k_scr[...] = qkv[:, Cqp:2 * Cqp].reshape(H, W, Cqp)
            v_scr[...] = qkv[:, 2 * Cqp:].reshape(H, W, C)

        # ---- criss-cross attention for W-block j ----------------------------
        w0 = pl.multiple_of(j * Tw, Tw)
        x_blk = x_ref[:, pl.ds(w0, Tw), :]                           # (H, Tw, C)
        q_blk = q_scr[:, pl.ds(w0, Tw), :]                           # (H, Tw, Cqp)
        k_blk = k_scr[:, pl.ds(w0, Tw), :]                           # (H, Tw, Cqp)
        v_blk = v_scr[:, pl.ds(w0, Tw), :]                           # (H, Tw, C)
        k_row = k_scr[...]                                           # (H, W, Cqp)
        v_row = v_scr[...]                                           # (H, W, C)

        # Column-layout copies of the block only (minor dim unchanged, bf16).
        q_col = pltpu.einshape("hwc->whc", q_blk)                    # (Tw, H, Cqp)
        k_col = pltpu.einshape("hwc->whc", k_blk)                    # (Tw, H, Cqp)
        v_col = pltpu.einshape("hwc->whc", v_blk)                    # (Tw, H, C)

        # H-direction energy: e_h[w, h, h'] = <q[h, w, :], k[h', w, :]>
        e_h = lax.dot_general(q_col, k_col, (((2,), (2,)), ((0,), (0,))),
                              preferred_element_type=jnp.float32)    # (Tw, H, H)
        ii = lax.broadcasted_iota(jnp.int32, (H, H), 0)
        jj = lax.broadcasted_iota(jnp.int32, (H, H), 1)
        e_h = jnp.where((ii == jj)[None, :, :], -jnp.inf, e_h)       # PyTorch INF()

        # W-direction energy: e_w[h, w, w'] = <q[h, w, :], k[h, w', :]>
        e_w = lax.dot_general(q_blk, k_row, (((2,), (2,)), ((0,), (0,))),
                              preferred_element_type=jnp.float32)    # (H, Tw, W)

        # Joint softmax over the concatenated (H + W) axis, without a concat.
        m_row = jnp.maximum(jnp.max(e_h, axis=-1).T, jnp.max(e_w, axis=-1))  # (H, Tw)
        m_col = m_row.T                                                      # (Tw, H)
        p_h = jnp.exp(e_h - m_col[:, :, None])                               # (Tw, H, H)
        p_w = jnp.exp(e_w - m_row[:, :, None])                               # (H, Tw, W)
        denom = jnp.sum(p_h, axis=-1).T + jnp.sum(p_w, axis=-1)              # (H, Tw)
        inv_row = pl.reciprocal(denom, approx=True)                          # EUP slot
        inv_col = inv_row.T
        att_h = (p_h * inv_col[:, :, None]).astype(bf)                       # (Tw, H, H)
        att_w = (p_w * inv_row[:, :, None]).astype(bf)                       # (H, Tw, W)

        # out_H (col layout): out_h[w, h, c] = sum_h' att_h[w, h, h'] * v[h', w, c]
        out_h_col = lax.dot_general(att_h, v_col, (((2,), (1,)), ((0,), (0,))),
                                    preferred_element_type=jnp.float32)      # (Tw, H, C)
        # out_W (row layout): out_w[h, w, c] = sum_w' att_w[h, w, w'] * v[h, w', c]
        out_w_row = lax.dot_general(att_w, v_row, (((2,), (1,)), ((0,), (0,))),
                                    preferred_element_type=jnp.float32)      # (H, Tw, C)

        # bf16 before the relayout -> half the vld/vst traffic.
        out_h_row = pltpu.einshape("whc->hwc", out_h_col.astype(bf))         # (H, Tw, C)

        gamma = gamma_ref[0, 0]
        o = gamma * (out_h_row.astype(jnp.float32) + out_w_row) + x_blk.astype(jnp.float32)
        o_ref[...] = o.astype(o_ref.dtype)                                   # bf16 store

    return kernel


def cc_module_forward_nhwc(x_nhwc, wq, bq, wk, bk, wv, bv, gamma):
    """Preferred entry point: x in (B, H, W, C); returns (B, H, W, C) bf16.

    An NHWC-resident model pays zero wrapper-side relayout cost.
    """
    B, H, W, C = x_nhwc.shape
    Cq = wq.shape[0]
    Cqp = _round_up(max(Cq, 1), 128)          # lane-aligned Q/K segments
    Ctp = 2 * Cqp + C
    Tw = _pick_tw(W)
    nW = W // Tw

    # Fused, lane-aligned weight/bias: [Wq^T | 0 | Wk^T | 0 | Wv^T].
    wq_p = jnp.zeros((C, Cqp), jnp.float32).at[:, :Cq].set(wq.T.astype(jnp.float32))
    wk_p = jnp.zeros((C, Cqp), jnp.float32).at[:, :Cq].set(wk.T.astype(jnp.float32))
    wqkv = jnp.concatenate([wq_p, wk_p, wv.T.astype(jnp.float32)], axis=1).astype(jnp.bfloat16)
    bq_p = jnp.zeros((Cqp,), jnp.float32).at[:Cq].set(bq.astype(jnp.float32))
    bk_p = jnp.zeros((Cqp,), jnp.float32).at[:Cq].set(bk.astype(jnp.float32))
    bqkv = jnp.concatenate([bq_p, bk_p, bv.astype(jnp.float32)]).reshape(1, Ctp)

    # Generation-aware scoped-VMEM limit (~96 MiB on v5e/v6e, ~48 MiB on v7x).
    try:
        vmem_cap = pltpu.get_tpu_info().vmem_capacity_bytes
    except Exception:
        vmem_cap = 64 * 1024 * 1024
    vmem_limit = int(vmem_cap) * 3 // 4

    kernel = _make_cc_kernel(H, W, C, Cqp, Tw)

    out = pl.pallas_call(
        kernel,
        out_shape=jax.ShapeDtypeStruct((B, H, W, C), jnp.bfloat16),
        grid=(B, nW),
        in_specs=[
            pl.BlockSpec((None, H, W, C), lambda b, j: (b, 0, 0, 0)),   # x (row layout, resident per image)
            pl.BlockSpec((C, Ctp), lambda b, j: (0, 0)),                # fused [Wq^T|Wk^T|Wv^T]
            pl.BlockSpec((1, Ctp), lambda b, j: (0, 0)),                # fused bias
            pl.BlockSpec(memory_space=pltpu.MemorySpace.SMEM),          # gamma (1,1)
        ],
        out_specs=pl.BlockSpec((None, H, Tw, C), lambda b, j: (b, 0, j, 0)),
        scratch_shapes=[
            pltpu.VMEM((H, W, Cqp), jnp.bfloat16),   # q (row layout, per image)
            pltpu.VMEM((H, W, Cqp), jnp.bfloat16),   # k
            pltpu.VMEM((H, W, C), jnp.bfloat16),     # v
        ],
        compiler_params=pltpu.CompilerParams(
            dimension_semantics=("parallel", "arbitrary"),
            vmem_limit_bytes=vmem_limit,
        ),
    )(x_nhwc.astype(jnp.bfloat16), wqkv, bqkv, gamma.reshape(1, 1).astype(jnp.float32))
    return out


def cc_module_forward(x_nchw, wq, bq, wk, bk, wv, bv, gamma):
    """NCHW interface matching the PyTorch module. Returns (B, C, H, W) in x's dtype.

    The two transposes below are kept only for PyTorch layout parity; NHWC models
    should call cc_module_forward_nhwc directly and skip both HBM round trips.
    """
    x_row = jnp.transpose(x_nchw.astype(jnp.bfloat16), (0, 2, 3, 1))   # bf16 relayout
    out_row = cc_module_forward_nhwc(x_row, wq, bq, wk, bk, wv, bv, gamma)
    return jnp.transpose(out_row, (0, 3, 1, 2)).astype(x_nchw.dtype)


def cc_module_reference(x, wq, bq, wk, bk, wv, bv, gamma):
    """Pure-JAX f32 transcription of the PyTorch forward (for verification)."""
    B, C, H, W = x.shape
    prec = lax.Precision.HIGHEST

    def conv1x1(inp, w, b):
        return jnp.einsum('bchw,oc->bohw', inp, w, precision=prec) + b[None, :, None, None]

    q = conv1x1(x, wq, bq)
    k = conv1x1(x, wk, bk)
    v = conv1x1(x, wv, bv)
    energy_H = jnp.einsum('bchw,bckw->bhwk', q, k, precision=prec)
    diag = jnp.eye(H, dtype=bool)[None, :, None, :]
    energy_H = jnp.where(diag, -jnp.inf, energy_H)
    energy_W = jnp.einsum('bchw,bchv->bhwv', q, k, precision=prec)
    concate = jax.nn.softmax(jnp.concatenate([energy_H, energy_W], axis=-1), axis=-1)
    att_H = concate[..., :H]
    att_W = concate[..., H:]
    out_H = jnp.einsum('bhwk,bckw->bchw', att_H, v, precision=prec)
    out_W = jnp.einsum('bhwv,bchv->bchw', att_W, v, precision=prec)
    return gamma[0] * (out_H + out_W) + x


if __name__ == "__main__":
    B, C, H, W = 2, 8, 16, 16
    Cq = C // 4

    key = jax.random.PRNGKey(0)
    ks = jax.random.split(key, 7)
    x = jax.random.normal(ks[0], (B, C, H, W), dtype=jnp.float32)
    wq = 0.3 * jax.random.normal(ks[1], (Cq, C), dtype=jnp.float32)
    bq = 0.1 * jax.random.normal(ks[2], (Cq,), dtype=jnp.float32)
    wk = 0.3 * jax.random.normal(ks[3], (Cq, C), dtype=jnp.float32)
    bk = 0.1 * jax.random.normal(ks[4], (Cq,), dtype=jnp.float32)
    wv = 0.3 * jax.random.normal(ks[5], (C, C), dtype=jnp.float32)
    bv = 0.1 * jax.random.normal(ks[6], (C,), dtype=jnp.float32)
    # Module __init__ sets gamma = zeros(1); use a nonzero value so the attention
    # path actually contributes to the checked output.
    gamma = jnp.array([0.5], dtype=jnp.float32)

    # Quantize x / weights to bf16 once so kernel (bf16-operand MXU path) and the
    # f32 reference consume identical values; remaining diff is accumulation +
    # the bf16 output store only.
    bf_round = lambda a: a.astype(jnp.bfloat16).astype(jnp.float32)
    x, wq, wk, wv = bf_round(x), bf_round(wq), bf_round(wk), bf_round(wv)

    out = jax.jit(cc_module_forward)(x, wq, bq, wk, bk, wv, bv, gamma)
    out = jax.block_until_ready(out)

    ref = cc_module_reference(x, wq, bq, wk, bk, wv, bv, gamma)
    assert out.shape == x.shape, (out.shape, x.shape)
    max_err = float(jnp.max(jnp.abs(out - ref)))
    assert jnp.allclose(out, ref, atol=4e-2, rtol=4e-2), f"max abs err = {max_err}"
    print("KERNEL_OK")
</pallas_src>

<mosaic_0001>
module attributes {stable_mosaic.version = 11 : i64} {
  func.func @kernel(%arg0: i32, %arg1: i32, %arg2: memref<1x16x16x8xbf16, #tpu.memory_space<vmem>>, %arg3: memref<8x264xbf16, #tpu.memory_space<vmem>>, %arg4: memref<1x264xf32, #tpu.memory_space<vmem>>, %arg5: memref<1x1xf32, #tpu.memory_space<smem>>, %arg6: memref<1x16x8x8xbf16, #tpu.memory_space<vmem>>, %arg7: memref<16x16x128xbf16, #tpu.memory_space<vmem>>, %arg8: memref<16x16x128xbf16, #tpu.memory_space<vmem>>, %arg9: memref<16x16x8xbf16, #tpu.memory_space<vmem>>) attributes {dimension_semantics = [#tpu.dimension_semantics<parallel>, #tpu.dimension_semantics<arbitrary>], iteration_bounds = array<i64: 2, 2>, scalar_prefetch = 0 : i64, scratch_operands = 3 : i64, tpu.core_type = #tpu.core_type<tc>, window_params = [{transform_indices = @transform_0, window_bounds = array<i64: 1, 16, 16, 8>}, {pipeline_mode = #tpu.pipeline_mode<synchronous>, transform_indices = @transform_1, window_bounds = array<i64: 8, 264>}, {pipeline_mode = #tpu.pipeline_mode<synchronous>, transform_indices = @transform_2, window_bounds = array<i64: 1, 264>}, {transform_indices = @transform_3, window_bounds = array<i64: 1, 1>}, {transform_indices = @transform_4, window_bounds = array<i64: 1, 16, 8, 8>}]} {
    %c0_i32 = arith.constant 0 : i32
    %0 = arith.cmpi eq, %arg1, %c0_i32 : i32
    %1 = arith.extui %0 : i1 to i32
    %c0_i32_0 = arith.constant 0 : i32
    %2 = arith.cmpi ne, %1, %c0_i32_0 : i32
    scf.if %2 {
      %c0_29 = arith.constant 0 : index
      %c0_30 = arith.constant 0 : index
      %c0_31 = arith.constant 0 : index
      %c0_32 = arith.constant 0 : index
      %71 = vector.load %arg2[%c0_29, %c0_30, %c0_31, %c0_32] : memref<1x16x16x8xbf16, #tpu.memory_space<vmem>>, vector<1x16x16x8xbf16>
      %72 = vector.shape_cast %71 : vector<1x16x16x8xbf16> to vector<16x16x8xbf16>
      %73 = vector.shape_cast %72 : vector<16x16x8xbf16> to vector<256x8xbf16>
      %c0_33 = arith.constant 0 : index
      %c0_34 = arith.constant 0 : index
      %74 = vector.load %arg3[%c0_33, %c0_34] : memref<8x264xbf16, #tpu.memory_space<vmem>>, vector<8x264xbf16>
      %cst_35 = arith.constant dense<0.000000e+00> : vector<256x264xf32>
      %75 = tpu.matmul %73, %74, %cst_35 {dimension_numbers = #tpu.dot_dimension_numbers<[1], [0], [0], [1], [0, 0, 1, 1], [], []>} : vector<256x8xbf16>, vector<8x264xbf16>, vector<256x264xf32> -> vector<256x264xf32>
      %c0_36 = arith.constant 0 : index
      %c0_37 = arith.constant 0 : index
      %76 = vector.load %arg4[%c0_36, %c0_37] : memref<1x264xf32, #tpu.memory_space<vmem>>, vector<1x264xf32>
      %77 = vector.broadcast %76 : vector<1x264xf32> to vector<256x264xf32>
      %78 = arith.addf %75, %77 : vector<256x264xf32>
      %79 = arith.truncf %78 : vector<256x264xf32> to vector<256x264xbf16>
      %80 = vector.extract_strided_slice %79 {offsets = [0, 0], sizes = [256, 128], strides = [1, 1]} : vector<256x264xbf16> to vector<256x128xbf16>
      %81 = vector.shape_cast %80 : vector<256x128xbf16> to vector<16x16x128xbf16>
      %c0_38 = arith.constant 0 : index
      %c0_39 = arith.constant 0 : index
      %c0_40 = arith.constant 0 : index
      %82 = vector.load %arg7[%c0_38, %c0_39, %c0_40] : memref<16x16x128xbf16, #tpu.memory_space<vmem>>, vector<16x16x128xbf16>
      tpu.vector_store %arg7[%c0_38, %c0_39, %c0_40], %81 {strides = array<i32>} : memref<16x16x128xbf16, #tpu.memory_space<vmem>>, vector<16x16x128xbf16>,
      %83 = vector.extract_strided_slice %79 {offsets = [0, 128], sizes = [256, 128], strides = [1, 1]} : vector<256x264xbf16> to vector<256x128xbf16>
      %84 = vector.shape_cast %83 : vector<256x128xbf16> to vector<16x16x128xbf16>
      %c0_41 = arith.constant 0 : index
      %c0_42 = arith.constant 0 : index
      %c0_43 = arith.constant 0 : index
      %85 = vector.load %arg8[%c0_41, %c0_42, %c0_43] : memref<16x16x128xbf16, #tpu.memory_space<vmem>>, vector<16x16x128xbf16>
      tpu.vector_store %arg8[%c0_41, %c0_42, %c0_43], %84 {strides = array<i32>} : memref<16x16x128xbf16, #tpu.memory_space<vmem>>, vector<16x16x128xbf16>,
      %86 = vector.extract_strided_slice %79 {offsets = [0, 256], sizes = [256, 8], strides = [1, 1]} : vector<256x264xbf16> to vector<256x8xbf16>
      %87 = vector.shape_cast %86 : vector<256x8xbf16> to vector<16x16x8xbf16>
      %c0_44 = arith.constant 0 : index
      %c0_45 = arith.constant 0 : index
      %c0_46 = arith.constant 0 : index
      %88 = vector.load %arg9[%c0_44, %c0_45, %c0_46] : memref<16x16x8xbf16, #tpu.memory_space<vmem>>, vector<16x16x8xbf16>
      tpu.vector_store %arg9[%c0_44, %c0_45, %c0_46], %87 {strides = array<i32>} : memref<16x16x8xbf16, #tpu.memory_space<vmem>>, vector<16x16x8xbf16>,
    } else {
    }
    %c8_i32 = arith.constant 8 : i32
    %3 = arith.muli %arg1, %c8_i32 : i32
    %4 = tpu.assume_multiple %3, 8 : i32
    %c0 = arith.constant 0 : index
    %c0_1 = arith.constant 0 : index
    %5 = arith.index_cast %4 : i32 to index
    %c0_2 = arith.constant 0 : index
    %6 = vector.load %arg2[%c0, %c0_1, %5, %c0_2] : memref<1x16x16x8xbf16, #tpu.memory_space<vmem>>, vector<1x16x8x8xbf16>
    %7 = vector.shape_cast %6 : vector<1x16x8x8xbf16> to vector<16x8x8xbf16>
    %c0_3 = arith.constant 0 : index
    %8 = arith.index_cast %4 : i32 to index
    %c0_4 = arith.constant 0 : index
    %9 = vector.load %arg7[%c0_3, %8, %c0_4] : memref<16x16x128xbf16, #tpu.memory_space<vmem>>, vector<16x8x128xbf16>
    %c0_5 = arith.constant 0 : index
    %10 = arith.index_cast %4 : i32 to index
    %c0_6 = arith.constant 0 : index
    %11 = vector.load %arg8[%c0_5, %10, %c0_6] : memref<16x16x128xbf16, #tpu.memory_space<vmem>>, vector<16x8x128xbf16>
    %c0_7 = arith.constant 0 : index
    %12 = arith.index_cast %4 : i32 to index
    %c0_8 = arith.constant 0 : index
    %13 = vector.load %arg9[%c0_7, %12, %c0_8] : memref<16x16x8xbf16, #tpu.memory_space<vmem>>, vector<16x8x8xbf16>
    %c0_9 = arith.constant 0 : index
    %c0_10 = arith.constant 0 : index
    %c0_11 = arith.constant 0 : index
    %14 = vector.load %arg8[%c0_9, %c0_10, %c0_11] : memref<16x16x128xbf16, #tpu.memory_space<vmem>>, vector<16x16x128xbf16>
    %c0_12 = arith.constant 0 : index
    %c0_13 = arith.constant 0 : index
    %c0_14 = arith.constant 0 : index
    %15 = vector.load %arg9[%c0_12, %c0_13, %c0_14] : memref<16x16x8xbf16, #tpu.memory_space<vmem>>, vector<16x16x8xbf16>
    %16 = tpu.transpose %9, [1, 0, 2] : vector<16x8x128xbf16> -> vector<8x16x128xbf16>
    %17 = tpu.transpose %11, [1, 0, 2] : vector<16x8x128xbf16> -> vector<8x16x128xbf16>
    %18 = tpu.transpose %13, [1, 0, 2] : vector<16x8x8xbf16> -> vector<8x16x8xbf16>
    %cst = arith.constant dense<0.000000e+00> : vector<8x16x16xf32>
    %19 = tpu.matmul %16, %17, %cst {dimension_numbers = #tpu.dot_dimension_numbers<[2], [2], [1], [1], [0, 0, 0, 1, 1, 1], [0], [0]>} : vector<8x16x128xbf16>, vector<8x16x128xbf16>, vector<8x16x16xf32> -> vector<8x16x16xf32>
    %20 = tpu.iota {dimensions = array<i32: 0>} : vector<16x16xi32>
    %21 = tpu.iota {dimensions = array<i32: 1>} : vector<16x16xi32>
    %22 = arith.cmpi eq, %20, %21 : vector<16x16xi32>
    %23 = vector.shape_cast %22 : vector<16x16xi1> to vector<1x16x16xi1>
    %cst_15 = arith.constant 0xFF800000 : f32
    %24 = vector.shape_cast %23 : vector<1x16x16xi1> to vector<1x16x16xi1>
    %25 = vector.broadcast %24 : vector<1x16x16xi1> to vector<8x16x16xi1>
    %26 = vector.broadcast %cst_15 : f32 to vector<8x16x16xf32>
    %27 = arith.select %25, %26, %19 : vector<8x16x16xi1>, vector<8x16x16xf32>
    %cst_16 = arith.constant dense<0.000000e+00> : vector<16x8x16xf32>
    %28 = tpu.matmul %9, %14, %cst_16 {dimension_numbers = #tpu.dot_dimension_numbers<[2], [2], [1], [1], [0, 0, 0, 1, 1, 1], [0], [0]>} : vector<16x8x128xbf16>, vector<16x16x128xbf16>, vector<16x8x16xf32> -> vector<16x8x16xf32>
    %cst_17 = arith.constant dense<0xFF800000> : vector<8x16xf32>
    %29 = vector.multi_reduction <maximumf>, %27, %cst_17 [2] : vector<8x16x16xf32> to vector<8x16xf32>
    %30 = tpu.transpose %29, [1, 0] : vector<8x16xf32> -> vector<16x8xf32>
    %cst_18 = arith.constant dense<0xFF800000> : vector<16x8xf32>
    %31 = vector.multi_reduction <maximumf>, %28, %cst_18 [2] : vector<16x8x16xf32> to vector<16x8xf32>
    %32 = arith.maximumf %30, %31 : vector<16x8xf32>
    %33 = tpu.transpose %32, [1, 0] : vector<16x8xf32> -> vector<8x16xf32>
    %34 = vector.shape_cast %33 : vector<8x16xf32> to vector<8x16x1xf32>
    %35 = vector.broadcast %34 : vector<8x16x1xf32> to vector<8x16x16xf32>
    %36 = arith.subf %27, %35 : vector<8x16x16xf32>
    %37 = math.exp %36 : vector<8x16x16xf32>
    %38 = vector.shape_cast %32 : vector<16x8xf32> to vector<16x8x1xf32>
    %39 = vector.broadcast %38 : vector<16x8x1xf32> to vector<16x8x16xf32>
    %40 = arith.subf %28, %39 : vector<16x8x16xf32>
    %41 = math.exp %40 : vector<16x8x16xf32>
    %cst_19 = arith.constant dense<0.000000e+00> : vector<8x16xf32>
    %42 = vector.multi_reduction <add>, %37, %cst_19 [2] : vector<8x16x16xf32> to vector<8x16xf32>
    %43 = tpu.transpose %42, [1, 0] : vector<8x16xf32> -> vector<16x8xf32>
    %cst_20 = arith.constant dense<0.000000e+00> : vector<16x8xf32>
    %44 = vector.multi_reduction <add>, %41, %cst_20 [2] : vector<16x8x16xf32> to vector<16x8xf32>
    %45 = arith.addf %43, %44 : vector<16x8xf32>
    %46 = tpu.reciprocal %45 {approx = true} : vector<16x8xf32> -> vector<16x8xf32>
    %47 = tpu.transpose %46, [1, 0] : vector<16x8xf32> -> vector<8x16xf32>
    %48 = vector.shape_cast %47 : vector<8x16xf32> to vector<8x16x1xf32>
    %49 = vector.broadcast %48 : vector<8x16x1xf32> to vector<8x16x16xf32>
    %50 = arith.mulf %37, %49 : vector<8x16x16xf32>
    %51 = arith.truncf %50 : vector<8x16x16xf32> to vector<8x16x16xbf16>
    %52 = vector.shape_cast %46 : vector<16x8xf32> to vector<16x8x1xf32>
    %53 = vector.broadcast %52 : vector<16x8x1xf32> to vector<16x8x16xf32>
    %54 = arith.mulf %41, %53 : vector<16x8x16xf32>
    %55 = arith.truncf %54 : vector<16x8x16xf32> to vector<16x8x16xbf16>
    %cst_21 = arith.constant dense<0.000000e+00> : vector<8x16x8xf32>
    %56 = tpu.matmul %51, %18, %cst_21 {dimension_numbers = #tpu.dot_dimension_numbers<[2], [1], [1], [2], [0, 0, 0, 1, 1, 2], [0], [0]>} : vector<8x16x16xbf16>, vector<8x16x8xbf16>, vector<8x16x8xf32> -> vector<8x16x8xf32>
    %cst_22 = arith.constant dense<0.000000e+00> : vector<16x8x8xf32>
    %57 = tpu.matmul %55, %15, %cst_22 {dimension_numbers = #tpu.dot_dimension_numbers<[2], [1], [1], [2], [0, 0, 0, 1, 1, 2], [0], [0]>} : vector<16x8x16xbf16>, vector<16x16x8xbf16>, vector<16x8x8xf32> -> vector<16x8x8xf32>
    %58 = arith.truncf %56 : vector<8x16x8xf32> to vector<8x16x8xbf16>
    %59 = tpu.transpose %58, [1, 0, 2] : vector<8x16x8xbf16> -> vector<16x8x8xbf16>
    %c0_23 = arith.constant 0 : index
    %c0_24 = arith.constant 0 : index
    %60 = memref.load %arg5[%c0_23, %c0_24] : memref<1x1xf32, #tpu.memory_space<smem>>
    %61 = arith.extf %59 : vector<16x8x8xbf16> to vector<16x8x8xf32>
    %62 = arith.addf %61, %57 : vector<16x8x8xf32>
    %63 = vector.broadcast %60 : f32 to vector<16x8x8xf32>
    %64 = arith.mulf %63, %62 : vector<16x8x8xf32>
    %65 = arith.extf %7 : vector<16x8x8xbf16> to vector<16x8x8xf32>
    %66 = arith.addf %64, %65 : vector<16x8x8xf32>
    %67 = arith.truncf %66 : vector<16x8x8xf32> to vector<16x8x8xbf16>
    %c0_25 = arith.constant 0 : index
    %c0_26 = arith.constant 0 : index
    %c0_27 = arith.constant 0 : index
    %c0_28 = arith.constant 0 : index
    %68 = vector.load %arg6[%c0_25, %c0_26, %c0_27, %c0_28] : memref<1x16x8x8xbf16, #tpu.memory_space<vmem>>, vector<1x16x8x8xbf16>
    %69 = vector.shape_cast %68 : vector<1x16x8x8xbf16> to vector<16x8x8xbf16>
    %70 = vector.shape_cast %67 : vector<16x8x8xbf16> to vector<1x16x8x8xbf16>
    tpu.vector_store %arg6[%c0_25, %c0_26, %c0_27, %c0_28], %70 {strides = array<i32>} : memref<1x16x8x8xbf16, #tpu.memory_space<vmem>>, vector<1x16x8x8xbf16>,
    return
  }
  func.func @transform_0(%arg0: i32, %arg1: i32) -> (i32, i32, i32, i32) {
    %c0_i32 = arith.constant 0 : i32
    %c0_i32_0 = arith.constant 0 : i32
    %c0_i32_1 = arith.constant 0 : i32
    %c0_i32_2 = arith.constant 0 : i32
    return %arg0, %c0_i32, %c0_i32_0, %c0_i32_1 : i32, i32, i32, i32
  }
  func.func @transform_1(%arg0: i32, %arg1: i32) -> (i32, i32) {
    %c0_i32 = arith.constant 0 : i32
    %c0_i32_0 = arith.constant 0 : i32
    %c0_i32_1 = arith.constant 0 : i32
    return %c0_i32, %c0_i32_0 : i32, i32
  }
  func.func @transform_2(%arg0: i32, %arg1: i32) -> (i32, i32) {
    %c0_i32 = arith.constant 0 : i32
    %c0_i32_0 = arith.constant 0 : i32
    %c0_i32_1 = arith.constant 0 : i32
    return %c0_i32, %c0_i32_0 : i32, i32
  }
  func.func @transform_3(%arg0: i32, %arg1: i32) -> (i32, i32) {
    %c0_i32 = arith.constant 0 : i32
    %c0_i32_0 = arith.constant 0 : i32
    %c0_i32_1 = arith.constant 0 : i32
    return %c0_i32, %c0_i32_0 : i32, i32
  }
  func.func @transform_4(%arg0: i32, %arg1: i32) -> (i32, i32, i32, i32) {
    %c0_i32 = arith.constant 0 : i32
    %c0_i32_0 = arith.constant 0 : i32
    %c0_i32_1 = arith.constant 0 : i32
    return %arg0, %c0_i32, %arg1, %c0_i32_0 : i32, i32, i32, i32
  }
}

</mosaic_0001>

<bundles_post_ra>
// kernel: cc_module_forward.1
= control target key start
LH: loop header
LB: loop body
LE: loop exit
PB: predicated region body
PF: predicated region fallthrough
CT: control target
= control target key end

     0   :  { %s6424_s0 = inlined_call_operand.vmem [shape: bf16[2,16,16,8], index: 0, kind: input, shape index: {}]   ;;  %s6425_s1 = inlined_call_operand.vmem [shape: bf16[8,264], index: 1, kind: input, shape index: {}]   ;;  %s6426_s2 = inlined_call_operand.vmem [shape: f32[1,264], index: 2, kind: input, shape index: {}]   ;;  %s6427_s3 = inlined_call_operand.<no memory space> [shape: f32[1,1], index: 3, kind: input, shape index: {}]   ;;  %s6428_s4 = inlined_call_operand.vmem [shape: bf16[2,16,16,8], index: 4, kind: output, shape index: {}]  }
   0x1   :  { %9 = sst [smem:[#allocation5]] %s6427_s3 }
   0x2   :  { %s4893_s17 = smov 0   ;;  %s4895_s18 = smov 0  }
   0x3   :  { %s4897_s19 = smov 0   ;;  %s4899_s20 = smov 0  }
   0x4   :  { %s4901_s21 = smov 0   ;;  %s4903_s22 = smov 0  }
   0x5   :  { %s4905_s23 = smov 0  }
   0x6 LB: > { %s24_s3 = sadd.s32 1, %s4853_s21  ;;  %s27_s24 = sadd.s32 1, %s4857_s22  ;;  %s4861_s23 = sphi %s4905_s23, %s15_s23   ;;  %s4857_s22 = sphi %s4903_s22, %s6465_s22   ;;  %s4853_s21 = sphi %s4901_s21, %s6464_s21   ;;  %s4849_s20 = sphi %s4899_s20, %s6463_s20   ;;  %s4845_s19 = sphi %s4897_s19, %s6462_s19   ;;  %s4841_s18 = sphi %s4895_s18, %s6461_s18   ;;  %s4837_s17 = sphi %s4893_s17, %s6460_s17  }
   0x7   : > { %p25_p0 = scmp.ge.s32.totalorder %s24_s3, 2  ;;  %s4223_s25 = sadd.s32 4294967295, %s4861_s23  }
   0x8   : > { %p135_p1 = scmp.ne.s32.totalorder %s4841_s18, %s4837_s17  ;;  %p136_p2 = scmp.eq.s32.totalorder %s4223_s25, 3 }
   0x9   : > { %s6467_s3 = smov (%p25_p0, %s24_s3), 0  ;;  %s6469_s24 = smov (!%p25_p0, %s27_s24), %s4857_s22 }
   0xa   : > { %s121_s26 = ssub.s32 %s4853_s21, %s6467_s3  ;;  %p29_p3 = scmp.ge.s32.totalorder %s6469_s24, 2 }
   0xb   : > { %p4227_p4 = scmp.ge.s32.totalorder %s4861_s23, 1  ;;  %p4939_p5 = por %p136_p2, %p135_p1 }
   0xc   : > { %p177_p6 = scmp.lt.s32.totalorder %s4861_s23, 5  ;;  %s6471_s24 = smov (%p29_p3, %s6469_s24), 0 }
   0xd   : > { %s120_s28 = ssub.s32 %s4857_s22, %s6471_s24  ;;  %s125_s30 = sadd.s32 1, %s4841_s18 }
   0xe   : > { %p178_p7 = pnand %p4227_p4, %p177_p6  ;;  %s122_s29 = sor.u32 %s121_s26, %s120_s28 }
   0xf   : > { %p123_p8 = scmp.eq.s32.totalorder %s122_s29, 0 }
  0x10   : > { %181 = sbr.rel (%p178_p7) target bundleno = 2262 (0x8d6), region = 36 }
  0x11   : > { %s4950_s5 = scalar_select %p123_p8, %s4841_s18, %s125_s30  }
  0x15   : > { %s199_s6 = sand.u32 1, %s4837_s17   ;;  %p202_p9 = scmp.lt.s32.totalorder %s4849_s20, 1 }
  0x16   : > { %s4228_s7 = sshll.u32 %s199_s6, 6  ;;  %p4231_p10 = scmp.ne.s32.totalorder %s4845_s19, 0 }
  0x17   : > { %s203_s8 = scalar_select %p202_p9, %s4849_s20, 1 }
  0x18   : > { %s4960_s13 = scalar_lea.vmem [#allocation6], %s4228_s7  ;;  %211 = sbr.rel (%p4231_p10) target bundleno = 361 (0x169), region = 40 }
  0x19   : > { %s4506_s9 = sshll.u32 %s203_s8, 7 }
  0x1a   : > { %s4958_s12 = scalar_lea.vmem %s6424_s0, %s4506_s9 }
  0x1d   : > { %v244_v0 = vld [vmem:[%s6425_s1] sm:$0xff]  ;;  %v245_v1 = vld [vmem:[%s6425_s1 + $0x8] sm:$0xf]  ;;  %vm391_vm0 = vcmask 1043456   ;;  %vm342_vm1 = vcmask 64512   ;;  %v4509_v15 = vld [vmem:[%s4958_s12 + $0x10] sm:$0xff] }
  0x1e   : > { %v336_v2 = vunpack.c.l.b16 %v244_v0  ;;  %v337_v3 = vunpack.c.h.b16 %v244_v0  ;;  %v338_v4 = vunpack.c.l.b16 %v245_v1  ;;  %v4507_v11 = vld [vmem:[%s4958_s12] sm:$0xff]  ;;  %v4508_v13 = vld [vmem:[%s4958_s12 + $0x8] sm:$0xff]  ;;  %v4986_v16 = vld [vmem:[%s4958_s12 + $0x70] sm:$0xff]  ;;  %vm892_vm2 = vcmask 60416  }
  0x1f   : > { %v4519_v12 = vld [vmem:[%s4958_s12 + $0x60] sm:$0xff]  ;;  %v4977_v14 = vld [vmem:[%s4958_s12 + $0x68] sm:$0xff]  ;;  %v4510_v17 = vld [vmem:[%s4958_s12 + $0x18] sm:$0xff] }
  0x20   : > { %v339_v5 = vpack.c.b16 %v336_v2, %v336_v2  ;;  %v340_v6 = vpack.c.b16 %v337_v3, %v337_v3  ;;  %v341_v7 = vpack.c.b16 %v338_v4, %v338_v4  ;;  %v4995_v18 = vld [vmem:[%s4958_s12 + $0x78] sm:$0xff]  ;;  %v4511_v19 = vld [vmem:[%s4958_s12 + $0x20] sm:$0xff]  ;;  %v4512_v20 = vld [vmem:[%s4958_s12 + $0x28] sm:$0xff] }
  0x21   : > { %v4513_v21 = vld [vmem:[%s4958_s12 + $0x30] sm:$0xff]  ;;  %v4514_v22 = vld [vmem:[%s4958_s12 + $0x38] sm:$0xff]  ;;  %v246_v23 = vld [vmem:[%s6426_s2] sm:$0x7] }
  0x22   : > { %v393_v8 = vsel %vm391_vm0, %v339_v5, 0  ;;  %v396_v9 = vsel %vm391_vm0, %v340_v6, 0  ;;  %v399_v10 = vsel %vm391_vm0, %v341_v7, 0  ;;  %v5028_v24 = vperm.slane %v246_v23, 0  ;;  %v4515_v26 = vld [vmem:[%s4958_s12 + $0x40] sm:$0xff]  ;;  %v4516_v49 = vld [vmem:[%s4958_s12 + $0x48] sm:$0xff] }
  0x23   : > { %408 = vmatpush.bf16.msra.mxu0 %v393_v8  ;;  %4650 = vmatpush.bf16.msra.mxu3 %v393_v8  ;;  %v5030_v25 = vperm.slane %v246_v23, 1  ;;  %v5039_v32 = vperm.slane %v246_v23, 2 }
  0x24   : > { %497 = vmatpush.bf16.msra.mxu1 %v396_v9  ;;  %586 = vmatpush.bf16.msra.mxu2 %v399_v10 }
  0x26   : > { %4296 = vmatmul.msk.bf16.vlgmr.msra.gmra.mxu0 %vm342_vm1, %v4507_v11  ;;  %4308 = vmatmul.msk.bf16.vlgmr.msra.gmra.mxu3 %vm342_vm1, %v4519_v12 }
  0x27   : > { %4651 = vmatpush.bf16.msrb.mxu3 %v396_v9  ;;  %4312 = vmatmul.msk.bf16.vlgmr.msra.gmra.mxu1 %vm342_vm1, %v4507_v11 }
  0x28   : > { %4328 = vmatmul.msk.bf16.vlgmr.msra.gmra.mxu2 %vm342_vm1, %v4507_v11 }
  0x2b   : > { %4652 = vmatpush.bf16.msra.mxu3 %v399_v10  ;;  %v4517_v10 = vld [vmem:[%s4958_s12 + $0x50] sm:$0xff] }
  0x36   : > { %4297 = vmatmul.msk.bf16.gmra.mxu0 %vm342_vm1, %v4508_v13  ;;  %4309 = vmatmul.msk.bf16.gmra.mxu3 %vm342_vm1, %v4977_v14 }
  0x37   : > { %4313 = vmatmul.msk.bf16.gmra.mxu1 %vm342_vm1, %v4508_v13 }
  0x38   : > { %4329 = vmatmul.msk.bf16.gmra.mxu2 %vm342_vm1, %v4508_v13 }
  0x46   : > { %4298 = vmatmul.msk.bf16.gmra.mxu0 %vm342_vm1, %v4509_v15  ;;  %4310 = vmatmul.msk.bf16.gmra.mxu3 %vm342_vm1, %v4986_v16 }
  0x47   : > { %4314 = vmatmul.msk.bf16.gmra.mxu1 %vm342_vm1, %v4509_v15 }
  0x48   : > { %4330 = vmatmul.msk.bf16.gmra.mxu2 %vm342_vm1, %v4509_v15 }
  0x56   : > { %4299 = vmatmul.msk.bf16.gmra.mxu0 %vm342_vm1, %v4510_v17  ;;  %4311 = vmatmul.msk.bf16.gmra.mxu3 %vm342_vm1, %v4995_v18 }
  0x57   : > { %4315 = vmatmul.msk.bf16.gmra.mxu1 %vm342_vm1, %v4510_v17 }
  0x58   : > { %4331 = vmatmul.msk.bf16.gmra.mxu2 %vm342_vm1, %v4510_v17 }
  0x66   : > { %4300 = vmatmul.msk.bf16.gmra.mxu0 %vm342_vm1, %v4511_v19  ;;  %4324 = vmatmul.msk.bf16.vlgmr.msrb.gmra.mxu3 %vm342_vm1, %v4519_v12 }
  0x67   : > { %4316 = vmatmul.msk.bf16.gmra.mxu1 %vm342_vm1, %v4511_v19 }
  0x68   : > { %4332 = vmatmul.msk.bf16.gmra.mxu2 %vm342_vm1, %v4511_v19 }
  0x76   : > { %4301 = vmatmul.msk.bf16.gmra.mxu0 %vm342_vm1, %v4512_v20  ;;  %4325 = vmatmul.msk.bf16.gmra.mxu3 %vm342_vm1, %v4977_v14 }
  0x77   : > { %4317 = vmatmul.msk.bf16.gmra.mxu1 %vm342_vm1, %v4512_v20 }
  0x78   : > { %4333 = vmatmul.msk.bf16.gmra.mxu2 %vm342_vm1, %v4512_v20 }
  0x86   : > { %4302 = vmatmul.msk.bf16.gmra.mxu0 %vm342_vm1, %v4513_v21  ;;  %4326 = vmatmul.msk.bf16.gmra.mxu3 %vm342_vm1, %v4986_v16 }
  0x87   : > { %4318 = vmatmul.msk.bf16.gmra.mxu1 %vm342_vm1, %v4513_v21 }
  0x88   : > { %4334 = vmatmul.msk.bf16.gmra.mxu2 %vm342_vm1, %v4513_v21 }
  0x96   : > { %4303 = vmatmul.msk.bf16.gmra.mxu0 %vm342_vm1, %v4514_v22  ;;  %4327 = vmatmul.msk.bf16.gmra.mxu3 %vm342_vm1, %v4995_v18 }
  0x97   : > { %4319 = vmatmul.msk.bf16.gmra.mxu1 %vm342_vm1, %v4514_v22 }
  0x98   : > { %4335 = vmatmul.msk.bf16.gmra.mxu2 %vm342_vm1, %v4514_v22 }
  0xa3   : > { %v410_v27 = vpop.f32.mrf.mxu0 }
  0xa4   : > { %v411_v28 = vadd.f32 %v410_v27, %v5028_v24  ;;  %v499_v29 = vpop.f32.mrf.mxu1 }
  0xa5   : > { %v500_v30 = vadd.f32 %v499_v29, %v5030_v25 }
  0xa6   : > { %4304 = vmatmul.msk.bf16.gmra.mxu0 %vm342_vm1, %v4515_v26  ;;  %4340 = vmatmul.msk.bf16.vlgmr.msra.gmra.mxu3 %vm342_vm1, %v4519_v12 }
  0xa7   : > { %v668_v31 = vpack.c.bf16 %v500_v30, %v411_v28  ;;  %4320 = vmatmul.msk.bf16.gmra.mxu1 %vm342_vm1, %v4515_v26 }
  0xa8   : > { %4336 = vmatmul.msk.bf16.gmra.mxu2 %vm342_vm1, %v4515_v26 }
  0xa9   : > { %v796_v33 = vrot.slane %v668_v31, 4  ;;  %v470_v34 = vpop.f32.mrf.mxu3 }
  0xaa   : > { %v5046_v46 = vadd.f32 %v470_v34, %v5028_v24 }
  0xab   : > { %v588_v35 = vpop.f32.mrf.mxu2  ;;  %860 = vst [vmem:[#allocation3] sm:$0xf] %v796_v33  ;;  %v412_v37 = vpop.f32.mrf.mxu0 }
  0xac   : > { %v589_v36 = vadd.f32 %v588_v35, %v5039_v32  ;;  %v413_v38 = vadd.f32 %v412_v37, %v5028_v24  ;;  %v501_v39 = vpop.f32.mrf.mxu1 }
  0xad   : > { %v502_v41 = vadd.f32 %v501_v39, %v5030_v25  ;;  %v4518_v39 = vld [vmem:[%s4958_s12 + $0x58] sm:$0xff] }
  0xae   : > { %v669_v40 = vpack.c.bf16 %v589_v36, %v589_v36  ;;  %v4558_v42 = vpack.c.bf16 %v413_v38, %v411_v28 }
  0xaf   : > { %v670_v43 = vpack.c.bf16 %v502_v41, %v413_v38 }
  0xb0   : > { %893 = vst.msk [vmem:[#allocation4] sm:$0xf] %vm892_vm2, %v669_v40 }
  0xb1   : > { %4559 = vst [vmem:[#allocation2] sm:$0xff] %v4558_v42   ;;  %v797_v44 = vrot.slane %v670_v43, 4  ;;  %v472_v45 = vpop.f32.mrf.mxu3 }
  0xb2   : > { %v5049_v47 = vadd.f32 %v472_v45, %v5028_v24 }
  0xb3   : > { %v590_v48 = vpop.f32.mrf.mxu2  ;;  %861 = vst [vmem:[#allocation3 + $0x4] sm:$0xf] %v797_v44  ;;  %v415_v51 = vpop.f32.mrf.mxu0 }
  0xb4   : > { %v591_v50 = vadd.f32 %v590_v48, %v5039_v32  ;;  %v4618_v52 = vpack.c.bf16 %v5049_v47, %v5046_v46  ;;  %v416_v53 = vadd.f32 %v415_v51, %v5028_v24  ;;  %v504_v54 = vpop.f32.mrf.mxu1 }
  0xb5   : > { %v505_v56 = vadd.f32 %v504_v54, %v5030_v25 }
  0xb6   : > { %v671_v55 = vpack.c.bf16 %v591_v50, %v591_v50  ;;  %4646 = vst [vmem:[#allocation2 + $0x60] sm:$0xff] %v4618_v52   ;;  %4305 = vmatmul.msk.bf16.gmra.mxu0 %vm342_vm1, %v4516_v49  ;;  %4341 = vmatmul.msk.bf16.gmra.mxu3 %vm342_vm1, %v4977_v14 }
  0xb7   : > { %v672_v57 = vpack.c.bf16 %v505_v56, %v416_v53  ;;  %4321 = vmatmul.msk.bf16.gmra.mxu1 %vm342_vm1, %v4516_v49 }
  0xb8   : > { %894 = vst.msk [vmem:[#allocation4 + $0x4] sm:$0xf] %vm892_vm2, %v671_v55  ;;  %4337 = vmatmul.msk.bf16.gmra.mxu2 %vm342_vm1, %v4516_v49 }
  0xb9   : > { %v798_v58 = vrot.slane %v672_v57, 4  ;;  %v475_v59 = vpop.f32.mrf.mxu3 }
  0xba   : > { %v5068_v7 = vadd.f32 %v475_v59, %v5028_v24 }
  0xbb   : > { %v593_v60 = vpop.f32.mrf.mxu2  ;;  %862 = vst [vmem:[#allocation3 + $0x8] sm:$0xf] %v798_v58  ;;  %v417_v62 = vpop.f32.mrf.mxu0 }
  0xbc   : > { %v594_v61 = vadd.f32 %v593_v60, %v5039_v32  ;;  %v418_v63 = vadd.f32 %v417_v62, %v5028_v24  ;;  %v506_v0 = vpop.f32.mrf.mxu1 }
  0xbd   : > { %v507_v2 = vadd.f32 %v506_v0, %v5030_v25 }
  0xbe   : > { %v673_v1 = vpack.c.bf16 %v594_v61, %v594_v61  ;;  %v4563_v3 = vpack.c.bf16 %v418_v63, %v416_v53 }
  0xbf   : > { %v674_v4 = vpack.c.bf16 %v507_v2, %v418_v63 }
  0xc0   : > { %895 = vst.msk [vmem:[#allocation4 + $0x8] sm:$0xf] %vm892_vm2, %v673_v1 }
  0xc1   : > { %4635 = vst [vmem:[#allocation2 + $0x8] sm:$0xff] %v4563_v3   ;;  %v799_v5 = vrot.slane %v674_v4, 4  ;;  %v477_v6 = vpop.f32.mrf.mxu3 }
  0xc2   : > { %v5071_v8 = vadd.f32 %v477_v6, %v5028_v24 }
  0xc3   : > { %v595_v9 = vpop.f32.mrf.mxu2  ;;  %863 = vst [vmem:[#allocation3 + $0xc] sm:$0xf] %v799_v5  ;;  %v420_v12 = vpop.f32.mrf.mxu0 }
  0xc4   : > { %v596_v11 = vadd.f32 %v595_v9, %v5039_v32  ;;  %v4623_v13 = vpack.c.bf16 %v5071_v8, %v5068_v7  ;;  %v421_v14 = vadd.f32 %v420_v12, %v5028_v24  ;;  %v509_v15 = vpop.f32.mrf.mxu1 }
  0xc5   : > { %v510_v19 = vadd.f32 %v509_v15, %v5030_v25 }
  0xc6   : > { %v675_v17 = vpack.c.bf16 %v596_v11, %v596_v11  ;;  %4647 = vst [vmem:[#allocation2 + $0x68] sm:$0xff] %v4623_v13   ;;  %4306 = vmatmul.msk.bf16.gmra.mxu0 %vm342_vm1, %v4517_v10  ;;  %4342 = vmatmul.msk.bf16.gmra.mxu3 %vm342_vm1, %v4986_v16 }
  0xc7   : > { %v676_v20 = vpack.c.bf16 %v510_v19, %v421_v14  ;;  %4322 = vmatmul.msk.bf16.gmra.mxu1 %vm342_vm1, %v4517_v10 }
  0xc8   : > { %896 = vst.msk [vmem:[#allocation4 + $0xc] sm:$0xf] %vm892_vm2, %v675_v17  ;;  %4338 = vmatmul.msk.bf16.gmra.mxu2 %vm342_vm1, %v4517_v10 }
  0xc9   : > { %v800_v21 = vrot.slane %v676_v20, 4  ;;  %v480_v22 = vpop.f32.mrf.mxu3 }
  0xca   : > { %v5090_v36 = vadd.f32 %v480_v22, %v5028_v24 }
  0xcb   : > { %v598_v23 = vpop.f32.mrf.mxu2  ;;  %864 = vst [vmem:[#allocation3 + $0x10] sm:$0xf] %v800_v21  ;;  %v422_v27 = vpop.f32.mrf.mxu0 }
  0xcc   : > { %v599_v26 = vadd.f32 %v598_v23, %v5039_v32  ;;  %v423_v28 = vadd.f32 %v422_v27, %v5028_v24  ;;  %v511_v29 = vpop.f32.mrf.mxu1 }
  0xcd   : > { %v512_v16 = vadd.f32 %v511_v29, %v5030_v25 }
  0xce   : > { %v677_v30 = vpack.c.bf16 %v599_v26, %v599_v26  ;;  %v4568_v31 = vpack.c.bf16 %v423_v28, %v421_v14 }
  0xcf   : > { %v678_v33 = vpack.c.bf16 %v512_v16, %v423_v28 }
  0xd0   : > { %897 = vst.msk [vmem:[#allocation4 + $0x10] sm:$0xf] %vm892_vm2, %v677_v30 }
  0xd1   : > { %4636 = vst [vmem:[#allocation2 + $0x10] sm:$0xff] %v4568_v31   ;;  %v801_v34 = vrot.slane %v678_v33, 4  ;;  %v482_v35 = vpop.f32.mrf.mxu3 }
  0xd2   : > { %v5093_v37 = vadd.f32 %v482_v35, %v5028_v24 }
  0xd3   : > { %v600_v38 = vpop.f32.mrf.mxu2  ;;  %865 = vst [vmem:[#allocation3 + $0x14] sm:$0xf] %v801_v34  ;;  %v425_v41 = vpop.f32.mrf.mxu0 }
  0xd4   : > { %v601_v40 = vadd.f32 %v600_v38, %v5039_v32  ;;  %v4628_v42 = vpack.c.bf16 %v5093_v37, %v5090_v36  ;;  %v426_v43 = vadd.f32 %v425_v41, %v5028_v24  ;;  %v514_v44 = vpop.f32.mrf.mxu1 }
  0xd5   : > { %v515_v48 = vadd.f32 %v514_v44, %v5030_v25 }
  0xd6   : > { %v679_v45 = vpack.c.bf16 %v601_v40, %v601_v40  ;;  %4648 = vst [vmem:[#allocation2 + $0x70] sm:$0xff] %v4628_v42   ;;  %4307 = vmatmul.msk.bf16.gmra.mxu0 %vm342_vm1, %v4518_v39  ;;  %4343 = vmatmul.msk.bf16.gmra.mxu3 %vm342_vm1, %v4995_v18 }
  0xd7   : > { %v680_v49 = vpack.c.bf16 %v515_v48, %v426_v43  ;;  %4323 = vmatmul.msk.bf16.gmra.mxu1 %vm342_vm1, %v4518_v39 }
  0xd8   : > { %898 = vst.msk [vmem:[#allocation4 + $0x14] sm:$0xf] %vm892_vm2, %v679_v45  ;;  %4339 = vmatmul.msk.bf16.gmra.mxu2 %vm342_vm1, %v4518_v39 }
  0xd9   : > { %v802_v50 = vrot.slane %v680_v49, 4  ;;  %v485_v51 = vpop.f32.mrf.mxu3 }
  0xda   : > { %v5112_v62 = vadd.f32 %v485_v51, %v5028_v24 }
  0xdb   : > { %v603_v52 = vpop.f32.mrf.mxu2  ;;  %866 = vst [vmem:[#allocation3 + $0x18] sm:$0xf] %v802_v50  ;;  %v427_v54 = vpop.f32.mrf.mxu0 }
  0xdc   : > { %v604_v53 = vadd.f32 %v603_v52, %v5039_v32  ;;  %v428_v55 = vadd.f32 %v427_v54, %v5028_v24  ;;  %v516_v56 = vpop.f32.mrf.mxu1 }
  0xdd   : > { %v517_v18 = vadd.f32 %v516_v56, %v5030_v25 }
  0xde   : > { %v681_v57 = vpack.c.bf16 %v604_v53, %v604_v53  ;;  %v4573_v58 = vpack.c.bf16 %v428_v55, %v426_v43 }
  0xdf   : > { %v682_v59 = vpack.c.bf16 %v517_v18, %v428_v55 }
  0xe0   : > { %899 = vst.msk [vmem:[#allocation4 + $0x18] sm:$0xf] %vm892_vm2, %v681_v57 }
  0xe1   : > { %4637 = vst [vmem:[#allocation2 + $0x18] sm:$0xff] %v4573_v58   ;;  %v803_v60 = vrot.slane %v682_v59, 4  ;;  %v487_v61 = vpop.f32.mrf.mxu3 }
  0xe2   : > { %v5115_v63 = vadd.f32 %v487_v61, %v5028_v24 }
  0xe3   : > { %v605_v0 = vpop.f32.mrf.mxu2  ;;  %867 = vst [vmem:[#allocation3 + $0x1c] sm:$0xf] %v803_v60  ;;  %v430_v2 = vpop.f32.mrf.mxu0 }
  0xe4   : > { %v606_v1 = vadd.f32 %v605_v0, %v5039_v32  ;;  %v4633_v3 = vpack.c.bf16 %v5115_v63, %v5112_v62  ;;  %v431_v4 = vadd.f32 %v430_v2, %v5028_v24  ;;  %v519_v5 = vpop.f32.mrf.mxu1 }
  0xe5   : > { %v520_v9 = vadd.f32 %v519_v5, %v5030_v25 }
  0xe6   : > { %v683_v6 = vpack.c.bf16 %v606_v1, %v606_v1  ;;  %4649 = vst [vmem:[#allocation2 + $0x78] sm:$0xff] %v4633_v3  }
  0xe7   : > { %v684_v10 = vpack.c.bf16 %v520_v9, %v431_v4 }
  0xe8   : > { %900 = vst.msk [vmem:[#allocation4 + $0x1c] sm:$0xf] %vm892_vm2, %v683_v6 }
  0xe9   : > { %v804_v11 = vrot.slane %v684_v10, 4  ;;  %v559_v12 = vpop.f32.mrf.mxu3 }
  0xea   : > { %v560_v13 = vadd.f32 %v559_v12, %v5030_v25 }
  0xeb   : > { %v608_v14 = vpop.f32.mrf.mxu2  ;;  %868 = vst [vmem:[#allocation3 + $0x20] sm:$0xf] %v804_v11  ;;  %v432_v17 = vpop.f32.mrf.mxu0 }
  0xec   : > { %v609_v15 = vadd.f32 %v608_v14, %v5039_v32  ;;  %v716_v19 = vpack.c.bf16 %v560_v13, %v5046_v46  ;;  %v433_v20 = vadd.f32 %v432_v17, %v5028_v24  ;;  %v521_v21 = vpop.f32.mrf.mxu1 }
  0xed   : > { %v522_v23 = vadd.f32 %v521_v21, %v5030_v25 }
  0xee   : > { %v685_v22 = vpack.c.bf16 %v609_v15, %v609_v15  ;;  %v820_v26 = vrot.slane %v716_v19, 4  ;;  %v4578_v27 = vpack.c.bf16 %v433_v20, %v431_v4 }
  0xef   : > { %v686_v28 = vpack.c.bf16 %v522_v23, %v433_v20 }
  0xf0   : > { %901 = vst.msk [vmem:[#allocation4 + $0x20] sm:$0xf] %vm892_vm2, %v685_v22 }
  0xf1   : > { %884 = vst [vmem:[#allocation3 + $0x60] sm:$0xf] %v820_v26  ;;  %v805_v29 = vrot.slane %v686_v28, 4  ;;  %v561_v30 = vpop.f32.mrf.mxu3 }
  0xf2   : > { %4638 = vst [vmem:[#allocation2 + $0x20] sm:$0xff] %v4578_v27   ;;  %v562_v16 = vadd.f32 %v561_v30, %v5030_v25 }
  0xf3   : > { %v610_v31 = vpop.f32.mrf.mxu2  ;;  %869 = vst [vmem:[#allocation3 + $0x24] sm:$0xf] %v805_v29  ;;  %v435_v33 = vpop.f32.mrf.mxu0 }
  0xf4   : > { %v611_v46 = vadd.f32 %v610_v31, %v5039_v32  ;;  %v718_v34 = vpack.c.bf16 %v562_v16, %v5049_v47  ;;  %v436_v35 = vadd.f32 %v435_v33, %v5028_v24  ;;  %v524_v38 = vpop.f32.mrf.mxu1 }
  0xf5   : > { %v525_v40 = vadd.f32 %v524_v38, %v5030_v25 }
  0xf6   : > { %v687_v39 = vpack.c.bf16 %v611_v46, %v611_v46  ;;  %v821_v41 = vrot.slane %v718_v34, 4 }
  0xf7   : > { %v688_v42 = vpack.c.bf16 %v525_v40, %v436_v35 }
  0xf8   : > { %902 = vst.msk [vmem:[#allocation4 + $0x24] sm:$0xf] %vm892_vm2, %v687_v39 }
  0xf9   : > { %885 = vst [vmem:[#allocation3 + $0x64] sm:$0xf] %v821_v41  ;;  %v806_v43 = vrot.slane %v688_v42, 4  ;;  %v564_v44 = vpop.f32.mrf.mxu3 }
  0xfa   : > { %v565_v45 = vadd.f32 %v564_v44, %v5030_v25 }
  0xfb   : > { %v613_v48 = vpop.f32.mrf.mxu2  ;;  %870 = vst [vmem:[#allocation3 + $0x28] sm:$0xf] %v806_v43  ;;  %v437_v47 = vpop.f32.mrf.mxu0 }
  0xfc   : > { %v614_v49 = vadd.f32 %v613_v48, %v5039_v32  ;;  %v720_v50 = vpack.c.bf16 %v565_v45, %v5068_v7  ;;  %v438_v51 = vadd.f32 %v437_v47, %v5028_v24  ;;  %v526_v52 = vpop.f32.mrf.mxu1 }
  0xfd   : > { %v527_v54 = vadd.f32 %v526_v52, %v5030_v25 }
  0xfe   : > { %v689_v53 = vpack.c.bf16 %v614_v49, %v614_v49  ;;  %v822_v55 = vrot.slane %v720_v50, 4  ;;  %v4583_v56 = vpack.c.bf16 %v438_v51, %v436_v35 }
  0xff   : > { %v690_v57 = vpack.c.bf16 %v527_v54, %v438_v51 }
 0x100   : > { %903 = vst.msk [vmem:[#allocation4 + $0x28] sm:$0xf] %vm892_vm2, %v689_v53 }
 0x101   : > { %886 = vst [vmem:[#allocation3 + $0x68] sm:$0xf] %v822_v55  ;;  %v807_v18 = vrot.slane %v690_v57, 4  ;;  %v566_v58 = vpop.f32.mrf.mxu3 }
 0x102   : > { %4639 = vst [vmem:[#allocation2 + $0x28] sm:$0xff] %v4583_v56   ;;  %v567_v59 = vadd.f32 %v566_v58, %v5030_v25 }
 0x103   : > { %v615_v60 = vpop.f32.mrf.mxu2  ;;  %871 = vst [vmem:[#allocation3 + $0x2c] sm:$0xf] %v807_v18  ;;  %v440_v61 = vpop.f32.mrf.mxu0 }
 0x104   : > { %v616_v7 = vadd.f32 %v615_v60, %v5039_v32  ;;  %v722_v0 = vpack.c.bf16 %v567_v59, %v5071_v8  ;;  %v441_v1 = vadd.f32 %v440_v61, %v5028_v24  ;;  %v529_v2 = vpop.f32.mrf.mxu1 }
 0x105   : > { %v530_v4 = vadd.f32 %v529_v2, %v5030_v25 }
 0x106   : > { %v691_v3 = vpack.c.bf16 %v616_v7, %v616_v7  ;;  %v823_v5 = vrot.slane %v722_v0, 4 }
 0x107   : > { %v692_v6 = vpack.c.bf16 %v530_v4, %v441_v1 }
 0x108   : > { %904 = vst.msk [vmem:[#allocation4 + $0x2c] sm:$0xf] %vm892_vm2, %v691_v3 }
 0x109   : > { %887 = vst [vmem:[#allocation3 + $0x6c] sm:$0xf] %v823_v5  ;;  %v808_v9 = vrot.slane %v692_v6, 4  ;;  %v569_v10 = vpop.f32.mrf.mxu3 }
 0x10a   : > { %v570_v11 = vadd.f32 %v569_v10, %v5030_v25 }
 0x10b   : > { %v618_v12 = vpop.f32.mrf.mxu2  ;;  %872 = vst [vmem:[#allocation3 + $0x30] sm:$0xf] %v808_v9  ;;  %v442_v8 = vpop.f32.mrf.mxu0 }
 0x10c   : > { %v619_v13 = vadd.f32 %v618_v12, %v5039_v32  ;;  %v724_v14 = vpack.c.bf16 %v570_v11, %v5090_v36  ;;  %v443_v15 = vadd.f32 %v442_v8, %v5028_v24  ;;  %v531_v17 = vpop.f32.mrf.mxu1 }
 0x10d   : > { %v532_v20 = vadd.f32 %v531_v17, %v5030_v25 }
 0x10e   : > { %v693_v19 = vpack.c.bf16 %v619_v13, %v619_v13  ;;  %v824_v21 = vrot.slane %v724_v14, 4  ;;  %v4588_v22 = vpack.c.bf16 %v443_v15, %v441_v1 }
 0x10f   : > { %v694_v23 = vpack.c.bf16 %v532_v20, %v443_v15 }
 0x110   : > { %905 = vst.msk [vmem:[#allocation4 + $0x30] sm:$0xf] %vm892_vm2, %v693_v19 }
 0x111   : > { %888 = vst [vmem:[#allocation3 + $0x70] sm:$0xf] %v824_v21  ;;  %v809_v26 = vrot.slane %v694_v23, 4  ;;  %v571_v27 = vpop.f32.mrf.mxu3 }
 0x112   : > { %4640 = vst [vmem:[#allocation2 + $0x30] sm:$0xff] %v4588_v22   ;;  %v572_v28 = vadd.f32 %v571_v27, %v5030_v25 }
 0x113   : > { %v620_v29 = vpop.f32.mrf.mxu2  ;;  %873 = vst [vmem:[#allocation3 + $0x34] sm:$0xf] %v809_v26  ;;  %v445_v30 = vpop.f32.mrf.mxu0 }
 0x114   : > { %v621_v36 = vadd.f32 %v620_v29, %v5039_v32  ;;  %v726_v16 = vpack.c.bf16 %v572_v28, %v5093_v37  ;;  %v446_v31 = vadd.f32 %v445_v30, %v5028_v24  ;;  %v534_v46 = vpop.f32.mrf.mxu1 }
 0x115   : > { %v535_v34 = vadd.f32 %v534_v46, %v5030_v25 }
 0x116   : > { %v695_v33 = vpack.c.bf16 %v621_v36, %v621_v36  ;;  %v825_v35 = vrot.slane %v726_v16, 4 }
 0x117   : > { %v696_v38 = vpack.c.bf16 %v535_v34, %v446_v31 }
 0x118   : > { %906 = vst.msk [vmem:[#allocation4 + $0x34] sm:$0xf] %vm892_vm2, %v695_v33 }
 0x119   : > { %889 = vst [vmem:[#allocation3 + $0x74] sm:$0xf] %v825_v35  ;;  %v810_v39 = vrot.slane %v696_v38, 4  ;;  %v574_v40 = vpop.f32.mrf.mxu3 }
 0x11a   : > { %v575_v41 = vadd.f32 %v574_v40, %v5030_v25 }
 0x11b   : > { %v623_v42 = vpop.f32.mrf.mxu2  ;;  %874 = vst [vmem:[#allocation3 + $0x38] sm:$0xf] %v810_v39  ;;  %v447_v37 = vpop.f32.mrf.mxu0 }
 0x11c   : > { %v624_v43 = vadd.f32 %v623_v42, %v5039_v32  ;;  %v728_v44 = vpack.c.bf16 %v575_v41, %v5112_v62  ;;  %v448_v45 = vadd.f32 %v447_v37, %v5028_v24  ;;  %v536_v48 = vpop.f32.mrf.mxu1 }
 0x11d   : > { %v537_v47 = vadd.f32 %v536_v48, %v5030_v25 }
 0x11e   : > { %v697_v49 = vpack.c.bf16 %v624_v43, %v624_v43  ;;  %v826_v50 = vrot.slane %v728_v44, 4  ;;  %v4593_v51 = vpack.c.bf16 %v448_v45, %v446_v31 }
 0x11f   : > { %v698_v52 = vpack.c.bf16 %v537_v47, %v448_v45 }
 0x120   : > { %907 = vst.msk [vmem:[#allocation4 + $0x38] sm:$0xf] %vm892_vm2, %v697_v49 }
 0x121   : > { %890 = vst [vmem:[#allocation3 + $0x78] sm:$0xf] %v826_v50  ;;  %v811_v53 = vrot.slane %v698_v52, 4  ;;  %v576_v54 = vpop.f32.mrf.mxu3 }
 0x122   : > { %4641 = vst [vmem:[#allocation2 + $0x38] sm:$0xff] %v4593_v51   ;;  %v577_v55 = vadd.f32 %v576_v54, %v5030_v25 }
 0x123   : > { %v625_v56 = vpop.f32.mrf.mxu2  ;;  %875 = vst [vmem:[#allocation3 + $0x3c] sm:$0xf] %v811_v53  ;;  %v450_v57 = vpop.f32.mrf.mxu0 }
 0x124   : > { %v626_v62 = vadd.f32 %v625_v56, %v5039_v32  ;;  %v730_v18 = vpack.c.bf16 %v577_v55, %v5115_v63  ;;  %v451_v58 = vadd.f32 %v450_v57, %v5028_v24  ;;  %v539_v59 = vpop.f32.mrf.mxu1 }
 0x125   : > { %v540_v7 = vadd.f32 %v539_v59, %v5030_v25 }
 0x126   : > { %v699_v60 = vpack.c.bf16 %v626_v62, %v626_v62  ;;  %v827_v61 = vrot.slane %v730_v18, 4 }
 0x127   : > { %v700_v0 = vpack.c.bf16 %v540_v7, %v451_v58 }
 0x128   : > { %908 = vst.msk [vmem:[#allocation4 + $0x3c] sm:$0xf] %vm892_vm2, %v699_v60 }
 0x129   : > { %891 = vst [vmem:[#allocation3 + $0x7c] sm:$0xf] %v827_v61  ;;  %v812_v1 = vrot.slane %v700_v0, 4  ;;  %v648_v2 = vpop.f32.mrf.mxu3 }
 0x12a   : > { %v649_v4 = vadd.f32 %v648_v2, %v5039_v32 }
 0x12b   : > { %v628_v3 = vpop.f32.mrf.mxu2  ;;  %876 = vst [vmem:[#allocation3 + $0x40] sm:$0xf] %v812_v1  ;;  %v452_v63 = vpop.f32.mrf.mxu0 }
 0x12c   : > { %v629_v5 = vadd.f32 %v628_v3, %v5039_v32  ;;  %v717_v6 = vpack.c.bf16 %v649_v4, %v649_v4  ;;  %v453_v9 = vadd.f32 %v452_v63, %v5028_v24  ;;  %v541_v10 = vpop.f32.mrf.mxu1 }
 0x12d   : > { %v542_v12 = vadd.f32 %v541_v10, %v5030_v25 }
 0x12e   : > { %v701_v11 = vpack.c.bf16 %v629_v5, %v629_v5  ;;  %917 = vst.msk [vmem:[#allocation4 + $0x60] sm:$0xf] %vm892_vm2, %v717_v6  ;;  %v4598_v13 = vpack.c.bf16 %v453_v9, %v451_v58 }
 0x12f   : > { %v702_v8 = vpack.c.bf16 %v542_v12, %v453_v9 }
 0x130   : > { %909 = vst.msk [vmem:[#allocation4 + $0x40] sm:$0xf] %vm892_vm2, %v701_v11 }
 0x131   : > { %4642 = vst [vmem:[#allocation2 + $0x40] sm:$0xff] %v4598_v13   ;;  %v813_v14 = vrot.slane %v702_v8, 4  ;;  %v650_v15 = vpop.f32.mrf.mxu3 }
 0x132   : > { %v651_v19 = vadd.f32 %v650_v15, %v5039_v32 }
 0x133   : > { %v630_v17 = vpop.f32.mrf.mxu2  ;;  %877 = vst [vmem:[#allocation3 + $0x44] sm:$0xf] %v813_v14  ;;  %v455_v21 = vpop.f32.mrf.mxu0 }
 0x134   : > { %v631_v20 = vadd.f32 %v630_v17, %v5039_v32  ;;  %v719_v22 = vpack.c.bf16 %v651_v19, %v651_v19  ;;  %v456_v23 = vadd.f32 %v455_v21, %v5028_v24  ;;  %v544_v26 = vpop.f32.mrf.mxu1 }
 0x135   : > { %v545_v28 = vadd.f32 %v544_v26, %v5030_v25 }
 0x136   : > { %v703_v27 = vpack.c.bf16 %v631_v20, %v631_v20  ;;  %918 = vst.msk [vmem:[#allocation4 + $0x64] sm:$0xf] %vm892_vm2, %v719_v22 }
 0x137   : > { %v704_v29 = vpack.c.bf16 %v545_v28, %v456_v23 }
 0x138   : > { %910 = vst.msk [vmem:[#allocation4 + $0x44] sm:$0xf] %vm892_vm2, %v703_v27 }
 0x139   : > { %v814_v36 = vrot.slane %v704_v29, 4  ;;  %v653_v30 = vpop.f32.mrf.mxu3 }
 0x13a   : > { %v654_v31 = vadd.f32 %v653_v30, %v5039_v32 }
 0x13b   : > { %v633_v16 = vpop.f32.mrf.mxu2  ;;  %878 = vst [vmem:[#allocation3 + $0x48] sm:$0xf] %v814_v36  ;;  %v457_v33 = vpop.f32.mrf.mxu0 }
 0x13c   : > { %v634_v46 = vadd.f32 %v633_v16, %v5039_v32  ;;  %v721_v34 = vpack.c.bf16 %v654_v31, %v654_v31  ;;  %v458_v35 = vadd.f32 %v457_v33, %v5028_v24  ;;  %v546_v38 = vpop.f32.mrf.mxu1 }
 0x13d   : > { %v547_v40 = vadd.f32 %v546_v38, %v5030_v25 }
 0x13e   : > { %v705_v39 = vpack.c.bf16 %v634_v46, %v634_v46  ;;  %919 = vst.msk [vmem:[#allocation4 + $0x68] sm:$0xf] %vm892_vm2, %v721_v34  ;;  %v4603_v41 = vpack.c.bf16 %v458_v35, %v456_v23 }
 0x13f   : > { %v706_v42 = vpack.c.bf16 %v547_v40, %v458_v35 }
 0x140   : > { %911 = vst.msk [vmem:[#allocation4 + $0x48] sm:$0xf] %vm892_vm2, %v705_v39 }
 0x141   : > { %4643 = vst [vmem:[#allocation2 + $0x48] sm:$0xff] %v4603_v41   ;;  %v815_v43 = vrot.slane %v706_v42, 4  ;;  %v655_v37 = vpop.f32.mrf.mxu3 }
 0x142   : > { %v656_v45 = vadd.f32 %v655_v37, %v5039_v32 }
 0x143   : > { %v635_v44 = vpop.f32.mrf.mxu2  ;;  %879 = vst [vmem:[#allocation3 + $0x4c] sm:$0xf] %v815_v43  ;;  %v460_v49 = vpop.f32.mrf.mxu0 }
 0x144   : > { %v636_v48 = vadd.f32 %v635_v44, %v5039_v32  ;;  %v723_v47 = vpack.c.bf16 %v656_v45, %v656_v45  ;;  %v461_v50 = vadd.f32 %v460_v49, %v5028_v24  ;;  %v549_v51 = vpop.f32.mrf.mxu1 }
 0x145   : > { %v550_v53 = vadd.f32 %v549_v51, %v5030_v25 }
 0x146   : > { %v707_v52 = vpack.c.bf16 %v636_v48, %v636_v48  ;;  %920 = vst.msk [vmem:[#allocation4 + $0x6c] sm:$0xf] %vm892_vm2, %v723_v47 }
 0x147   : > { %v708_v54 = vpack.c.bf16 %v550_v53, %v461_v50 }
 0x148   : > { %912 = vst.msk [vmem:[#allocation4 + $0x4c] sm:$0xf] %vm892_vm2, %v707_v52 }
 0x149   : > { %v816_v55 = vrot.slane %v708_v54, 4  ;;  %v658_v56 = vpop.f32.mrf.mxu3 }
 0x14a   : > { %v659_v57 = vadd.f32 %v658_v56, %v5039_v32 }
 0x14b   : > { %v638_v62 = vpop.f32.mrf.mxu2  ;;  %880 = vst [vmem:[#allocation3 + $0x50] sm:$0xf] %v816_v55  ;;  %v462_v58 = vpop.f32.mrf.mxu0 }
 0x14c   : > { %v639_v18 = vadd.f32 %v638_v62, %v5039_v32  ;;  %v725_v59 = vpack.c.bf16 %v659_v57, %v659_v57  ;;  %v463_v60 = vadd.f32 %v462_v58, %v5028_v24  ;;  %v551_v7 = vpop.f32.mrf.mxu1 }
 0x14d   : > { %v552_v0 = vadd.f32 %v551_v7, %v5030_v25 }
 0x14e   : > { %v709_v61 = vpack.c.bf16 %v639_v18, %v639_v18  ;;  %921 = vst.msk [vmem:[#allocation4 + $0x70] sm:$0xf] %vm892_vm2, %v725_v59  ;;  %v4608_v1 = vpack.c.bf16 %v463_v60, %v461_v50 }
 0x14f   : > { %v710_v2 = vpack.c.bf16 %v552_v0, %v463_v60 }
 0x150   : > { %913 = vst.msk [vmem:[#allocation4 + $0x50] sm:$0xf] %vm892_vm2, %v709_v61 }
 0x151   : > { %4644 = vst [vmem:[#allocation2 + $0x50] sm:$0xff] %v4608_v1   ;;  %v817_v3 = vrot.slane %v710_v2, 4  ;;  %v660_v4 = vpop.f32.mrf.mxu3 }
 0x152   : > { %v661_v63 = vadd.f32 %v660_v4, %v5039_v32 }
 0x153   : > { %v640_v5 = vpop.f32.mrf.mxu2  ;;  %881 = vst [vmem:[#allocation3 + $0x54] sm:$0xf] %v817_v3  ;;  %v465_v9 = vpop.f32.mrf.mxu0 }
 0x154   : > { %v641_v6 = vadd.f32 %v640_v5, %v5039_v32  ;;  %v727_v10 = vpack.c.bf16 %v661_v63, %v661_v63  ;;  %v466_v11 = vadd.f32 %v465_v9, %v5028_v24  ;;  %v554_v12 = vpop.f32.mrf.mxu1 }
 0x155   : > { %v555_v8 = vadd.f32 %v554_v12, %v5030_v25 }
 0x156   : > { %v711_v13 = vpack.c.bf16 %v641_v6, %v641_v6  ;;  %922 = vst.msk [vmem:[#allocation4 + $0x74] sm:$0xf] %vm892_vm2, %v727_v10 }
 0x157   : > { %v712_v14 = vpack.c.bf16 %v555_v8, %v466_v11 }
 0x158   : > { %914 = vst.msk [vmem:[#allocation4 + $0x54] sm:$0xf] %vm892_vm2, %v711_v13 }
 0x159   : > { %v818_v15 = vrot.slane %v712_v14, 4  ;;  %v663_v17 = vpop.f32.mrf.mxu3 }
 0x15a   : > { %v664_v20 = vadd.f32 %v663_v17, %v5039_v32 }
 0x15b   : > { %v643_v19 = vpop.f32.mrf.mxu2  ;;  %882 = vst [vmem:[#allocation3 + $0x58] sm:$0xf] %v818_v15  ;;  %v467_v22 = vpop.f32.mrf.mxu0 }
 0x15c   : > { %v644_v21 = vadd.f32 %v643_v19, %v5039_v32  ;;  %v729_v23 = vpack.c.bf16 %v664_v20, %v664_v20  ;;  %v468_v26 = vadd.f32 %v467_v22, %v5028_v24  ;;  %v556_v27 = vpop.f32.mrf.mxu1 }
 0x15d   : > { %v557_v29 = vadd.f32 %v556_v27, %v5030_v25 }
 0x15e   : > { %v713_v28 = vpack.c.bf16 %v644_v21, %v644_v21  ;;  %923 = vst.msk [vmem:[#allocation4 + $0x78] sm:$0xf] %vm892_vm2, %v729_v23  ;;  %v4613_v36 = vpack.c.bf16 %v468_v26, %v466_v11 }
 0x15f   : > { %v714_v30 = vpack.c.bf16 %v557_v29, %v468_v26 }
 0x160   : > { %915 = vst.msk [vmem:[#allocation4 + $0x58] sm:$0xf] %vm892_vm2, %v713_v28 }
 0x161   : > { %4645 = vst [vmem:[#allocation2 + $0x58] sm:$0xff] %v4613_v36   ;;  %v819_v16 = vrot.slane %v714_v30, 4  ;;  %v665_v31 = vpop.f32.mrf.mxu3 }
 0x162   : > { %v666_v33 = vadd.f32 %v665_v31, %v5039_v32 }
 0x163   : > { %v645_v46 = vpop.f32.mrf.mxu2  ;;  %883 = vst [vmem:[#allocation3 + $0x5c] sm:$0xf] %v819_v16 }
 0x164   : > { %v646_v34 = vadd.f32 %v645_v46, %v5039_v32  ;;  %v731_v24 = vpack.c.bf16 %v666_v33, %v666_v33 }
 0x166   : > { %v715_v35 = vpack.c.bf16 %v646_v34, %v646_v34  ;;  %924 = vst.msk [vmem:[#allocation4 + $0x7c] sm:$0xf] %vm892_vm2, %v731_v24 }
 0x168   : > { %916 = vst.msk [vmem:[#allocation4 + $0x5c] sm:$0xf] %vm892_vm2, %v715_v35 }
 0x169 PF: > { %s4344_s28 = sshll.u32 %s4845_s19, 3  ;;  %v4863_v25 = vmov 1983009808   ;;  %v4864_v39 = vmov 1934713408   ;;  %vm1065_vm3 = vcmask 1047556  }
 0x16a   : > { %s926_s29 = sshra.s32 %s4344_s28, 3  ;;  %v1068_v38 = vunpack.c.l.s4 %v4863_v25  ;;  %v1082_v40 = vunpack.c.l.s4 %v4864_v39  ;;  %vm2052_vm5 = vcmask 130048   ;;  %vm2120_vm7 = vcmask 130112   ;;  %s3924_s9 = sld [smem:[#allocation5]] }
 0x16b   : > { %s5218_s30 = sshll.u32 %s926_s29, 2  ;;  %vm2143_vm8 = vcmask 1041409   ;;  %vm2145_vm9 = vcmask 1042434   ;;  %vm2147_vm10 = vcmask 1043459   ;;  %vm2149_vm11 = vcmask 1044484   ;;  %s4502_s11 = sshll.u32 (%p4939_p5), %s4849_s20, 5 }
 0x16c   : > { %s965_s6 = scalar_lea.vmem [#allocation3], %s5218_s30  ;;  %v5221_v54 = vunpack.c.0.s8 %v1068_v38  ;;  %v5223_v55 = vunpack.c.0.s8 %v1082_v40  ;;  %s5246_s7 = scalar_lea.vmem [#allocation2], %s5218_s30  ;;  %vm2151_vm12 = vcmask 1045509   ;;  %vm2153_vm13 = vcmask 1046534  }
 0x16d   : > { %v970_v41 = vld [vmem:[%s965_s6 + $0x20] sm:$0xf]  ;;  %v971_v42 = vld [vmem:[%s965_s6 + $0x28] sm:$0xf]  ;;  %v972_v43 = vld [vmem:[%s965_s6 + $0x30] sm:$0xf]  ;;  %s6221_s10 = scalar_lea.vmem %s4958_s12, %s5218_s30  ;;  %s4047_s12 = sadd.s32 (%p4939_p5), %s4845_s19, %s4502_s11 }
 0x16e   : > { %v966_v32 = vld [vmem:[%s965_s6] sm:$0xf]  ;;  %v973_v37 = vld [vmem:[%s965_s6 + $0x38] sm:$0xf]  ;;  %v967_v44 = vld [vmem:[%s965_s6 + $0x8] sm:$0xf] }
 0x16f   : > { %v968_v45 = vld [vmem:[%s965_s6 + $0x10] sm:$0xf]  ;;  %v969_v48 = vld [vmem:[%s965_s6 + $0x18] sm:$0xf]  ;;  %v974_v49 = vld [vmem:[%s965_s6 + $0x40] sm:$0xf] }
 0x170   : > { %v975_v47 = vld [vmem:[%s965_s6 + $0x48] sm:$0xf]  ;;  %v976_v50 = vld [vmem:[%s965_s6 + $0x50] sm:$0xf]  ;;  %v978_v51 = vld [vmem:[%s965_s6 + $0x60] sm:$0xf] }
 0x171   : > { %v979_v52 = vld [vmem:[%s965_s6 + $0x68] sm:$0xf]  ;;  %v980_v53 = vld [vmem:[%s965_s6 + $0x70] sm:$0xf]  ;;  %6440 = vst [vmem:[#allocation7_spill] sm:$0xff] %v5221_v54  ;;  %v1225_v62 = vrot.slane %v970_v41, 4 }
 0x172   : > { %v981_v56 = vld [vmem:[%s965_s6 + $0x78] sm:$0xf]  ;;  %v1231_v57 = vrot.slane %v972_v43, 4  ;;  %v1253_v18 = vrot.slane %v971_v42, 4  ;;  %v1259_v58 = vrot.slane %v973_v37, 4  ;;  %v1281_v60 = vrot.slane %v978_v51, 4 }
 0x173   : > { %v977_v59 = vld [vmem:[%s965_s6 + $0x58] sm:$0xf]  ;;  %v1287_v7 = vrot.slane %v980_v53, 4  ;;  %v1309_v61 = vrot.slane %v979_v52, 4  ;;  %v1315_v0 = vrot.slane %v981_v56, 4  ;;  %v1226_v1 = vsel %vm1065_vm3, %v1225_v62, %v966_v32  ;;  %s983_s8 = scalar_lea.vmem [#allocation4], %s5218_s30 }
 0x174   : > { %v1232_v2 = vsel %vm1065_vm3, %v1231_v57, %v968_v45  ;;  %v1254_v3 = vsel %vm1065_vm3, %v1253_v18, %v967_v44  ;;  %v1260_v4 = vsel %vm1065_vm3, %v1259_v58, %v969_v48  ;;  %v5230_v5 = vperm.slane %v1226_v1, %v5221_v54  ;;  %v5249_v8 = vld [vmem:[%s5246_s7 + $0x20] sm:$0xf]  ;;  %v5260_v20 = vld [vmem:[%s5246_s7 + $0x30] sm:$0xf]  ;;  %v5272_v26 = vld [vmem:[%s5246_s7 + $0x28] sm:$0xf] }
 0x175   : > { %v5233_v63 = vperm.slane %v1232_v2, %v5221_v54  ;;  %v5236_v6 = vperm.slane %v1254_v3, %v5221_v54  ;;  %v5239_v9 = vperm.slane %v1260_v4, %v5221_v54  ;;  %v1282_v10 = vsel %vm1065_vm3, %v1281_v60, %v974_v49  ;;  %v5269_v23 = vld [vmem:[%s5246_s7] sm:$0xf]  ;;  %v5275_v27 = vld [vmem:[%s5246_s7 + $0x38] sm:$0xf]  ;;  %v5302_v53 = vld [vmem:[%s5246_s7 + $0x10] sm:$0xf] }
 0x176   : > { %v1288_v11 = vsel %vm1065_vm3, %v1287_v7, %v976_v50  ;;  %v1310_v12 = vsel %vm1065_vm3, %v1309_v61, %v975_v47  ;;  %v1316_v13 = vsel %vm1065_vm3, %v1315_v0, %v977_v59  ;;  %v5254_v17 = vperm.slane %v1282_v10, %v5221_v54  ;;  %v5307_v61 = vld [vmem:[%s5246_s7 + $0x8] sm:$0xf]  ;;  %v5311_v3 = vld [vmem:[%s5246_s7 + $0x18] sm:$0xf]  ;;  %s4503_s14 = sshll.u32 (%p4939_p5), %s4047_s12, 2 }
 0x177   : > { %v1237_v14 = vrot.slane %v5233_v63, 4  ;;  %v1265_v15 = vrot.slane %v5239_v9, 4  ;;  %v5257_v19 = vperm.slane %v1288_v11, %v5221_v54  ;;  %v5263_v21 = vperm.slane %v1310_v12, %v5221_v54  ;;  %s4049_s27 = scalar_lea.vmem (%p4939_p5), %s6428_s4, %s4503_s14 }
 0x178   : > { %v5266_v22 = vperm.slane %v1316_v13, %v5221_v54  ;;  %v1064_v30 = vrot.slane %v5249_v8, 4  ;;  %v1071_v33 = vrot.slane %v5260_v20, 4  ;;  %v1093_v35 = vrot.slane %v5272_v26, 4 }
 0x179   : > { %v1238_v28 = vsel %vm1065_vm3, %v1237_v14, %v5230_v5  ;;  %v1266_v29 = vsel %vm1065_vm3, %v1265_v15, %v5236_v6  ;;  %v1293_v36 = vrot.slane %v5257_v19, 4  ;;  %v1099_v25 = vrot.slane %v5275_v27, 4 }
 0x17a   : > { %v1244_v16 = vperm.slane %v1238_v28, %v5223_v55  ;;  %v1272_v31 = vperm.slane %v1266_v29, %v5223_v55  ;;  %v1321_v46 = vrot.slane %v5266_v22, 4  ;;  %v1066_v24 = vsel %vm1065_vm3, %v1064_v30, %v5269_v23  ;;  %v5316_v28 = vld [vmem:[%s5246_s7 + $0x60] sm:$0xf]  ;;  %v5319_v29 = vld [vmem:[%s5246_s7 + $0x70] sm:$0xf] }
 0x17b   : > { %v1294_v34 = vsel %vm1065_vm3, %v1293_v36, %v5254_v17  ;;  %v5298_v49 = vperm.slane %v1066_v24, %v5221_v54  ;;  %v1072_v4 = vsel %vm1065_vm3, %v1071_v33, %v5302_v53  ;;  %v1094_v33 = vsel %vm1065_vm3, %v1093_v35, %v5307_v61 }
 0x17c   : > { %v1300_v38 = vperm.slane %v1294_v34, %v5223_v55  ;;  %v1322_v39 = vsel %vm1065_vm3, %v1321_v46, %v5263_v21  ;;  %v1339_v40 = vpack.i.b16 %v1272_v31, %v1244_v16  ;;  %v1340_v41 = vshrl.u32 %v1244_v16, 16  ;;  %v5326_v46 = vld [vmem:[%s5246_s7 + $0x68] sm:$0xf] }
 0x17d   : > { %v1328_v32 = vperm.slane %v1322_v39, %v5223_v55  ;;  %v1341_v42 = vshrl.u32 %v1272_v31, 16  ;;  %v1249_v43 = vrot.slane %v1244_v16, 4  ;;  %v1277_v37 = vrot.slane %v1272_v31, 4  ;;  %v5333_v39 = vld [vmem:[%s5246_s7 + $0x40] sm:$0xf] }
 0x17e   : > { %v1549_v44 = vunpack.c.l.b16 %v1339_v40  ;;  %v1364_v45 = vshrl.u32 %v1300_v38, 16  ;;  %v1305_v48 = vrot.slane %v1300_v38, 4  ;;  %v5322_v36 = vperm.slane %v1072_v4, %v5221_v54  ;;  %v5336_v40 = vld [vmem:[%s5246_s7 + $0x50] sm:$0xf] }
 0x17f   : > { %v1363_v47 = vpack.i.b16 %v1328_v32, %v1300_v38  ;;  %v1342_v50 = vpack.i.b16 %v1341_v42, %v1340_v41  ;;  %v1365_v51 = vshrl.u32 %v1328_v32, 16  ;;  %v1250_v52 = vsel %vm1065_vm3, 0, %v1249_v43  ;;  %v5343_v43 = vld [vmem:[%s5246_s7 + $0x48] sm:$0xf] }
 0x180   : > { %v1278_v56 = vsel %vm1065_vm3, 0, %v1277_v37  ;;  %v1306_v62 = vsel %vm1065_vm3, 0, %v1305_v48  ;;  %v1333_v57 = vrot.slane %v1328_v32, 4  ;;  %v1346_v18 = vshrl.u32 %v1250_v52, 16 }
 0x181   : > { %v1550_v58 = vunpack.c.l.b16 %v1363_v47  ;;  %v1366_v59 = vpack.i.b16 %v1365_v51, %v1364_v45  ;;  %v1571_v60 = vunpack.c.l.b16 %v1342_v50  ;;  %v1345_v7 = vpack.i.b16 %v1278_v56, %v1250_v52  ;;  %v5351_v45 = vld [vmem:[%s5246_s7 + $0x78] sm:$0xf] }
 0x182   : > { %v1334_v0 = vsel %vm1065_vm3, 0, %v1333_v57  ;;  %v1347_v1 = vshrl.u32 %v1278_v56, 16  ;;  %v1370_v2 = vshrl.u32 %v1306_v62, 16  ;;  %v1079_v30 = vrot.slane %v5298_v49, 4 }
 0x183   : > { %v1551_v10 = vpack.c.b16 %v1550_v58, %v1549_v44  ;;  %v1572_v11 = vunpack.c.l.b16 %v1366_v59  ;;  %v1369_v12 = vpack.i.b16 %v1334_v0, %v1306_v62  ;;  %v1593_v13 = vunpack.c.l.b16 %v1345_v7 }
 0x184   : > { %v1348_v14 = vpack.i.b16 %v1347_v1, %v1346_v18  ;;  %v1371_v15 = vshrl.u32 %v1334_v0, 16  ;;  %v1100_v34 = vsel %vm1065_vm3, %v1099_v25, %v5311_v3  ;;  %v1077_v41 = vrot.slane %v5322_v36, 4  ;;  %v5364_v18 = vld [vmem:[%s5246_s7 + $0x58] sm:$0xf] }
 0x185   : > { %1560 = vmatpush.bf16.xpose.msra.mxu0 %v1551_v10  ;;  %v1573_v16 = vpack.c.b16 %v1572_v11, %v1571_v60  ;;  %v1594_v31 = vunpack.c.l.b16 %v1369_v12  ;;  %v5340_v32 = vperm.slane %v1094_v33, %v5221_v54  ;;  %v5346_v35 = vperm.slane %v1100_v34, %v5221_v54 }
 0x186   : > { %v1372_v24 = vpack.i.b16 %v1371_v15, %v1370_v2  ;;  %v1615_v38 = vunpack.c.l.b16 %v1348_v14  ;;  %v1121_v25 = vrot.slane %v5316_v28, 4  ;;  %v1127_v37 = vrot.slane %v5319_v29, 4 }
 0x187   : > { %1582 = vmatpush.bf16.xpose.msra.mxu1 %v1573_v16  ;;  %v1595_v42 = vpack.c.b16 %v1594_v31, %v1593_v13  ;;  %v1078_v48 = vsel %vm1065_vm3, %v1077_v41, %v5298_v49  ;;  %v1107_v47 = vrot.slane %v5340_v32, 4  ;;  %v1149_v50 = vrot.slane %v5326_v46, 4 }
 0x188   : > { %v1616_v44 = vunpack.c.l.b16 %v1372_v24  ;;  %v1084_v51 = vperm.slane %v1078_v48, %v5223_v55  ;;  %v1105_v52 = vrot.slane %v5346_v35, 4  ;;  %v1122_v56 = vsel %vm1065_vm3, %v1121_v25, %v5333_v39 }
 0x189   : > { %1604 = vmatpush.bf16.xpose.msra.mxu2 %v1595_v42  ;;  %v1128_v62 = vsel %vm1065_vm3, %v1127_v37, %v5336_v40  ;;  %v5367_v58 = vperm.slane %v1122_v56, %v5221_v54  ;;  %v1150_v60 = vsel %vm1065_vm3, %v1149_v50, %v5343_v43  ;;  %v1155_v1 = vrot.slane %v5351_v45, 4 }
 0x18a   : > { %v1617_v57 = vpack.c.b16 %v1616_v44, %v1615_v38  ;;  %v5370_v59 = vperm.slane %v1128_v62, %v5221_v54  ;;  %v1106_v7 = vsel %vm1065_vm3, %v1105_v52, %v5340_v32  ;;  %v5377_v0 = vperm.slane %v1150_v60, %v5221_v54 }
 0x18b   : > { %v1239_v2 = vrot.slane %v5230_v5, 4  ;;  %v1112_v4 = vperm.slane %v1106_v7, %v5223_v55  ;;  %v1135_v11 = vrot.slane %v5367_v58, 4  ;;  %v1267_v12 = vrot.slane %v5236_v6, 4 }
 0x18c   : > { %1626 = vmatpush.bf16.xpose.msra.mxu3 %v1617_v57  ;;  %v1133_v10 = vrot.slane %v5370_v59, 4  ;;  %v1156_v13 = vsel %vm1065_vm3, %v1155_v1, %v5364_v18  ;;  %v1163_v14 = vrot.slane %v5377_v0, 4  ;;  %v1295_v16 = vrot.slane %v5254_v17, 4 }
 0x18d   : > { %v1240_v15 = vsel %vm1065_vm3, %v5233_v63, %v1239_v2  ;;  %v5394_v31 = vperm.slane %v1156_v13, %v5221_v54  ;;  %v1179_v33 = vpack.i.b16 %v1112_v4, %v1084_v51  ;;  %v1268_v24 = vsel %vm1065_vm3, %v5239_v9, %v1267_v12 }
 0x18e   : > { %v1134_v5 = vsel %vm1065_vm3, %v1133_v10, %v5367_v58  ;;  %v1248_v34 = vperm.slane %v1240_v15, %v5223_v55  ;;  %v1296_v38 = vsel %vm1065_vm3, %v5257_v19, %v1295_v16  ;;  %v1323_v63 = vrot.slane %v5263_v21, 4 }
 0x18f   : > { %v1140_v6 = vperm.slane %v1134_v5, %v5223_v55  ;;  %v1161_v17 = vrot.slane %v5394_v31, 4  ;;  %v1545_v41 = vunpack.c.l.b16 %v1179_v33  ;;  %v1276_v42 = vperm.slane %v1268_v24, %v5223_v55 }
 0x190   : > { %v5406_v25 = vperm.slane %v1296_v38, %v5223_v55  ;;  %v1324_v37 = vsel %vm1065_vm3, %v5266_v22, %v1323_v63  ;;  %v1180_v44 = vshrl.u32 %v1084_v51, 16  ;;  %v1181_v48 = vshrl.u32 %v1112_v4, 16 }
 0x191   : > { %v1204_v50 = vshrl.u32 %v1140_v6, 16  ;;  %v1162_v9 = vsel %vm1065_vm3, %v1161_v17, %v5377_v0  ;;  %v1332_v19 = vperm.slane %v1324_v37, %v5223_v55  ;;  %v1351_v21 = vpack.i.b16 %v1276_v42, %v1248_v34 }
 0x192   : > { %v1089_v52 = vrot.slane %v1084_v51, 4  ;;  %v1168_v56 = vperm.slane %v1162_v9, %v5223_v55  ;;  %v1182_v62 = vpack.i.b16 %v1181_v48, %v1180_v44  ;;  %v1117_v57 = vrot.slane %v1112_v4, 4 }
 0x193   : > { %v1145_v60 = vrot.slane %v1140_v6, 4  ;;  %v1375_v7 = vpack.i.b16 %v1332_v19, %v5406_v25  ;;  %v1637_v1 = vunpack.c.l.b16 %v1351_v21  ;;  %v1352_v2 = vshrl.u32 %v1248_v34, 16 }
 0x194   : > { %v1090_v22 = vsel %vm1065_vm3, 0, %v1089_v52  ;;  %v1203_v10 = vpack.i.b16 %v1168_v56, %v1140_v6  ;;  %v1205_v12 = vshrl.u32 %v1168_v56, 16  ;;  %v1567_v13 = vunpack.c.l.b16 %v1182_v62 }
 0x195   : > { %v1118_v15 = vsel %vm1065_vm3, 0, %v1117_v57  ;;  %v1638_v16 = vunpack.c.l.b16 %v1375_v7  ;;  %v1146_v5 = vsel %vm1065_vm3, 0, %v1145_v60  ;;  %v1173_v51 = vrot.slane %v1168_v56, 4 }
 0x196   : > { %v1185_v33 = vpack.i.b16 %v1118_v15, %v1090_v22  ;;  %v1546_v24 = vunpack.c.l.b16 %v1203_v10  ;;  %v1206_v38 = vpack.i.b16 %v1205_v12, %v1204_v50  ;;  %v1186_v4 = vshrl.u32 %v1090_v22, 16 }
 0x197   : > { %v1187_v63 = vshrl.u32 %v1118_v15, 16  ;;  %v1639_v17 = vpack.c.b16 %v1638_v16, %v1637_v1  ;;  %v1174_v37 = vsel %vm1065_vm3, 0, %v1173_v51  ;;  %v1210_v48 = vshrl.u32 %v1146_v5, 16 }
 0x198   : > { %v1589_v44 = vunpack.c.l.b16 %v1185_v33  ;;  %v1547_v9 = vpack.c.b16 %v1546_v24, %v1545_v41  ;;  %v1568_v6 = vunpack.c.l.b16 %v1206_v38  ;;  %v1209_v21 = vpack.i.b16 %v1174_v37, %v1146_v5  ;;  %v4523_v24 = vld [vmem:[#allocation3] sm:$0xff] }
 0x199   : > { %v1188_v52 = vpack.i.b16 %v1187_v63, %v1186_v4  ;;  %1648 = vmatpush.bf16.xpose.msrb.mxu0 %v1639_v17  ;;  %v1211_v62 = vshrl.u32 %v1174_v37, 16  ;;  %v1353_v57 = vshrl.u32 %v1276_v42, 16  ;;  %v1376_v60 = vshrl.u32 %v5406_v25, 16  ;;  %v4524_v37 = vld [vmem:[#allocation3 + $0x8] sm:$0xff] }
 0x19a   : > { %v1377_v56 = vshrl.u32 %v1332_v19, 16  ;;  %1561 = vmatmul.bf16.vlgmr.msra.gmra.mxu0 %v1547_v9  ;;  %v1569_v7 = vpack.c.b16 %v1568_v6, %v1567_v13  ;;  %v1590_v50 = vunpack.c.l.b16 %v1209_v21  ;;  %v1251_v10 = vrot.slane %v1248_v34, 4 }
 0x19b   : > { %v1611_v22 = vunpack.c.l.b16 %v1188_v52  ;;  %v1212_v1 = vpack.i.b16 %v1211_v62, %v1210_v48  ;;  %v1354_v12 = vpack.i.b16 %v1353_v57, %v1352_v2  ;;  %v1279_v16 = vrot.slane %v1276_v42, 4 }
 0x19c   : > { %v1378_v15 = vpack.i.b16 %v1377_v56, %v1376_v60  ;;  %1583 = vmatmul.bf16.vlgmr.msra.gmra.mxu1 %v1569_v7  ;;  %v1591_v41 = vpack.c.b16 %v1590_v50, %v1589_v44  ;;  %v1252_v5 = vsel %vm1065_vm3, 0, %v1251_v10  ;;  %v1307_v51 = vrot.slane %v5406_v25, 4 }
 0x19d   : > { %v1335_v33 = vrot.slane %v1332_v19, 4  ;;  %v1612_v38 = vunpack.c.l.b16 %v1212_v1  ;;  %v1659_v4 = vunpack.c.l.b16 %v1354_v12  ;;  %v1280_v13 = vsel %vm1065_vm3, 0, %v1279_v16 }
 0x19e   : > { %v1660_v63 = vunpack.c.l.b16 %v1378_v15  ;;  %1605 = vmatmul.bf16.vlgmr.msra.gmra.mxu2 %v1591_v41  ;;  %v1308_v34 = vsel %vm1065_vm3, 0, %v1307_v51  ;;  %v1357_v17 = vpack.i.b16 %v1280_v13, %v1252_v5  ;;  %v1080_v42 = vsel %vm1065_vm3, %v5322_v36, %v1079_v30 }
 0x19f   : > { %v1336_v2 = vsel %vm1065_vm3, 0, %v1335_v33  ;;  %v1613_v25 = vpack.c.b16 %v1612_v38, %v1611_v22  ;;  %v1088_v48 = vperm.slane %v1080_v42, %v5223_v55  ;;  %v1108_v6 = vsel %vm1065_vm3, %v5346_v35, %v1107_v47  ;;  %v4527_v38 = vld [vmem:[#allocation3 + $0x20] sm:$0xff] }
 0x1a0   : > { %v1661_v19 = vpack.c.b16 %v1660_v63, %v1659_v4  ;;  %v1381_v44 = vpack.i.b16 %v1336_v2, %v1308_v34  ;;  %v1681_v9 = vunpack.c.l.b16 %v1357_v17  ;;  %v1136_v49 = vsel %vm1065_vm3, %v5370_v59, %v1135_v11  ;;  %v4525_v59 = vld [vmem:[#allocation3 + $0x10] sm:$0xff] }
 0x1a1   : > { %1761 = vmatpush.bf16.xpose.msra.mxu0 %v4523_v24  ;;  %v1164_v36 = vsel %vm1065_vm3, %v5394_v31, %v1163_v14  ;;  %1627 = vmatmul.bf16.vlgmr.msra.gmra.mxu3 %v1613_v25  ;;  %v1116_v21 = vperm.slane %v1108_v6, %v5223_v55  ;;  %v1144_v32 = vperm.slane %v1136_v49, %v5223_v55  ;;  %v1192_v35 = vshrl.u32 %v1088_v48, 16  ;;  %v4526_v25 = vld [vmem:[#allocation3 + $0x18] sm:$0xff] }
 0x1a2   : > { %1670 = vmatpush.bf16.xpose.msrb.mxu1 %v1661_v19  ;;  %v1682_v30 = vunpack.c.l.b16 %v1381_v44  ;;  %v1172_v52 = vperm.slane %v1164_v36, %v5223_v55  ;;  %v1358_v47 = vshrl.u32 %v1252_v5, 16  ;;  %v1359_v58 = vshrl.u32 %v1280_v13, 16  ;;  %v4528_v19 = vld [vmem:[#allocation3 + $0x28] sm:$0xff] }
 0x1a3   : > { %v1382_v62 = vshrl.u32 %v1308_v34, 16  ;;  %v1191_v0 = vpack.i.b16 %v1116_v21, %v1088_v48  ;;  %v1193_v60 = vshrl.u32 %v1116_v21, 16  ;;  %v1216_v14 = vshrl.u32 %v1144_v32, 16 }
 0x1a4   : > { %v1683_v11 = vpack.c.b16 %v1682_v30, %v1681_v9  ;;  %v1215_v57 = vpack.i.b16 %v1172_v52, %v1144_v32  ;;  %v1217_v31 = vshrl.u32 %v1172_v52, 16  ;;  %v1360_v56 = vpack.i.b16 %v1359_v58, %v1358_v47  ;;  %v4529_v47 = vld [vmem:[#allocation3 + $0x30] sm:$0xff] }
 0x1a5   : > { %v1383_v7 = vshrl.u32 %v1336_v2, 16  ;;  %v1633_v50 = vunpack.c.l.b16 %v1191_v0  ;;  %v1194_v10 = vpack.i.b16 %v1193_v60, %v1192_v35  ;;  %v1091_v1 = vrot.slane %v1088_v48, 4  ;;  %v4531_v0 = vld [vmem:[#allocation3 + $0x40] sm:$0xff]  ;;  %v4533_v60 = vld [vmem:[#allocation3 + $0x50] sm:$0xff] }
 0x1a6   : > { %1692 = vmatpush.bf16.xpose.msrb.mxu2 %v1683_v11  ;;  %v1634_v22 = vunpack.c.l.b16 %v1215_v57  ;;  %v1218_v12 = vpack.i.b16 %v1217_v31, %v1216_v14  ;;  %v1703_v16 = vunpack.c.l.b16 %v1360_v56  ;;  %v1119_v41 = vrot.slane %v1116_v21, 4  ;;  %v4532_v57 = vld [vmem:[#allocation3 + $0x48] sm:$0xff]  ;;  %v4534_v14 = vld [vmem:[#allocation3 + $0x58] sm:$0xff]  ;;  %v4535_v31 = vld [vmem:[#allocation3 + $0x60] sm:$0xff] }
 0x1a7   : > { %v1384_v15 = vpack.i.b16 %v1383_v7, %v1382_v62  ;;  %v1655_v51 = vunpack.c.l.b16 %v1194_v10  ;;  %v1092_v33 = vsel %vm1065_vm3, 0, %v1091_v1  ;;  %v1147_v24 = vrot.slane %v1144_v32, 4  ;;  %v4536_v56 = vld [vmem:[#allocation3 + $0x68] sm:$0xff]  ;;  %v4538_v7 = vld [vmem:[#allocation3 + $0x78] sm:$0xff] }
 0x1a8   : > { %v1635_v5 = vpack.c.b16 %v1634_v22, %v1633_v50  ;;  %v1656_v4 = vunpack.c.l.b16 %v1218_v12  ;;  %v1120_v13 = vsel %vm1065_vm3, 0, %v1119_v41  ;;  %v1175_v34 = vrot.slane %v1172_v52, 4 }
 0x1a9   : > { %v1704_v63 = vunpack.c.l.b16 %v1384_v15  ;;  %v1148_v2 = vsel %vm1065_vm3, 0, %v1147_v24  ;;  %v1197_v17 = vpack.i.b16 %v1120_v13, %v1092_v33  ;;  %v1198_v42 = vshrl.u32 %v1092_v33, 16 }
 0x1aa   : > { %1780 = vmatpush.bf16.xpose.msra.mxu1 %v4524_v37  ;;  %v1199_v37 = vshrl.u32 %v1120_v13, 16  ;;  %1649 = vmatmul.bf16.vlgmr.msrb.gmra.mxu0 %v1635_v5  ;;  %v1657_v44 = vpack.c.b16 %v1656_v4, %v1655_v51  ;;  %v1176_v9 = vsel %vm1065_vm3, 0, %v1175_v34  ;;  %v1222_v6 = vshrl.u32 %v1148_v2, 16 }
 0x1ab   : > { %v1705_v48 = vpack.c.b16 %v1704_v63, %v1703_v16  ;;  %v1221_v49 = vpack.i.b16 %v1176_v9, %v1148_v2  ;;  %v1677_v36 = vunpack.c.l.b16 %v1197_v17  ;;  %v1223_v21 = vshrl.u32 %v1176_v9, 16  ;;  %1837 = vmatpush.bf16.xpose.msrb.mxu0 %v4527_v38 }
 0x1ac   : > { %v1200_v30 = vpack.i.b16 %v1199_v37, %v1198_v42  ;;  %1671 = vmatmul.bf16.vlgmr.msrb.gmra.mxu1 %v1657_v44  ;;  %vm2155_vm14 = vcmask 1047559   ;;  %vm4022_vm15 = vcmask 60416  }
 0x1ad   : > { %1714 = vmatpush.bf16.xpose.msrb.mxu3 %v1705_v48  ;;  %v1678_v32 = vunpack.c.l.b16 %v1221_v49  ;;  %v1224_v52 = vpack.i.b16 %v1223_v21, %v1222_v6 }
 0x1ae   : > { %1799 = vmatpush.bf16.xpose.msra.mxu2 %v4525_v59  ;;  %v1699_v35 = vunpack.c.l.b16 %v1200_v30  ;;  %v4530_v59 = vld [vmem:[#allocation3 + $0x38] sm:$0xff] }
 0x1af   : > { %v1679_v58 = vpack.c.b16 %v1678_v32, %v1677_v36  ;;  %v1700_v62 = vunpack.c.l.b16 %v1224_v52 }
 0x1b1   : > { %1693 = vmatmul.bf16.vlgmr.msrb.gmra.mxu2 %v1679_v58  ;;  %v1701_v11 = vpack.c.b16 %v1700_v62, %v1699_v35 }
 0x1b2   : > { %1856 = vmatpush.bf16.xpose.msrb.mxu1 %v4528_v19 }
 0x1b4   : > { %1715 = vmatmul.bf16.vlgmr.msrb.gmra.mxu3 %v1701_v11 }
 0x1b5   : > { %1818 = vmatpush.bf16.xpose.msra.mxu3 %v4526_v25 }
 0x1b6   : > { %1875 = vmatpush.bf16.xpose.msrb.mxu2 %v4529_v47 }
 0x1ba   : > { %1762 = vmatmul.bf16.vlgmr.msra.gmra.mxu0 %v5269_v23  ;;  %v4537_v23 = vld [vmem:[#allocation3 + $0x70] sm:$0xff] }
 0x1bb   : > { %1913 = vmatpush.bf16.xpose.msra.mxu0 %v4531_v0 }
 0x1bc   : > { %1781 = vmatmul.bf16.vlgmr.msra.gmra.mxu1 %v5307_v61 }
 0x1bd   : > { %1894 = vmatpush.bf16.xpose.msrb.mxu3 %v4530_v59  ;;  %1932 = vmatpush.bf16.xpose.msra.mxu1 %v4532_v57 }
 0x1c1   : > { %1800 = vmatmul.bf16.vlgmr.msra.gmra.mxu2 %v5302_v53 }
 0x1c2   : > { %1951 = vmatpush.bf16.xpose.msra.mxu2 %v4533_v60 }
 0x1c4   : > { %1819 = vmatmul.bf16.vlgmr.msra.gmra.mxu3 %v5311_v3 }
 0x1c5   : > { %1970 = vmatpush.bf16.xpose.msra.mxu3 %v4534_v14 }
 0x1ca   : > { %1838 = vmatmul.bf16.vlgmr.msrb.gmra.mxu0 %v5249_v8  ;;  %v1721_v8 = vlaneseq }
 0x1cb   : > { %1989 = vmatpush.bf16.xpose.msrb.mxu0 %v4535_v31 }
 0x1cc   : > { %1857 = vmatmul.bf16.vlgmr.msrb.gmra.mxu1 %v5272_v26  ;;  %v5468_v26 = vand.u32 127, %v1721_v8 }
 0x1cd   : > { %2008 = vmatpush.bf16.xpose.msrb.mxu1 %v4536_v56 }
 0x1d1   : > { %1876 = vmatmul.bf16.vlgmr.msrb.gmra.mxu2 %v5260_v20  ;;  %v5465_v20 = vshrl.u32 %v1721_v8, 7 }
 0x1d2   : > { %2027 = vmatpush.bf16.xpose.msrb.mxu2 %v4537_v23 }
 0x1d3   : > { %4713 = vset.pattern.permute.xlu2 %v5465_v20  ;;  %vm5472_vm4 = vcmp.eq.s32.totalorder %v5465_v20, %v5468_v26 }
 0x1d4   : > { %1895 = vmatmul.bf16.vlgmr.msrb.gmra.mxu3 %v5275_v27 }
 0x1d5   : > { %2046 = vmatpush.bf16.xpose.msrb.mxu3 %v4538_v7 }
 0x1da   : > { %1914 = vmatmul.bf16.vlgmr.msra.gmra.mxu0 %v5333_v39 }
 0x1dc   : > { %1933 = vmatmul.bf16.vlgmr.msra.gmra.mxu1 %v5343_v43 }
 0x1e1   : > { %1952 = vmatmul.bf16.vlgmr.msra.gmra.mxu2 %v5336_v40 }
 0x1e4   : > { %1971 = vmatmul.bf16.vlgmr.msra.gmra.mxu3 %v5364_v18 }
 0x1ea   : > { %1990 = vmatmul.bf16.vlgmr.msrb.gmra.mxu0 %v5316_v28 }
 0x1ec   : > { %2009 = vmatmul.bf16.vlgmr.msrb.gmra.mxu1 %v5326_v46 }
 0x1f1   : > { %2028 = vmatmul.bf16.vlgmr.msrb.gmra.mxu2 %v5319_v29  ;;  %v5483_v29 = vadd.s32 8, %v5465_v20 }
 0x1f3   : > { %vm5493_vm6 = vcmp.eq.s32.totalorder %v5483_v29, %v5468_v26 }
 0x1f4   : > { %2047 = vmatmul.bf16.vlgmr.msrb.gmra.mxu3 %v5351_v45 }
 0x217   : > { %v1562_v53 = vpop.f32.mrf.mxu0 }
 0x218   : > { %v5478_v61 = vsel %vm5472_vm4, -inf, %v1562_v53 }
 0x219   : > { %v1584_v3 = vpop.f32.mrf.mxu1  ;;  %v2053_v28 = vsel %vm2052_vm5, %v5478_v61, -inf }
 0x21a   : > { %v5487_v46 = vsel %vm5472_vm4, -inf, %v1584_v3  ;;  %2054 = vmax.xlane.f32.xlu0 %v2053_v28 }
 0x21b   : > { %v2059_v39 = vsel %vm2052_vm5, %v5487_v46, -inf }
 0x21c   : > { %2060 = vmax.xlane.f32.xlu1 %v2059_v39 }
 0x21f   : > { %v1564_v43 = vpop.f32.mrf.mxu0 }
 0x220   : > { %v5499_v45 = vsel %vm5493_vm6, -inf, %v1564_v43 }
 0x221   : > { %v1606_v18 = vpop.f32.mrf.mxu2  ;;  %v1586_v50 = vpop.f32.mrf.mxu1  ;;  %v2056_v22 = vsel %vm2052_vm5, %v5499_v45, -inf }
 0x222   : > { %v5505_v10 = vsel %vm5472_vm4, -inf, %v1606_v18  ;;  %v5509_v1 = vsel %vm5493_vm6, -inf, %v1586_v50  ;;  %2057 = vmax.xlane.f32.xlu0 %v2056_v22 }
 0x223   : > { %v2065_v12 = vsel %vm2052_vm5, %v5505_v10, -inf  ;;  %v2062_v15 = vsel %vm2052_vm5, %v5509_v1, -inf }
 0x224   : > { %v1628_v16 = vpop.f32.mrf.mxu3  ;;  %2066 = vmax.xlane.f32.xlu2 %v2065_v12  ;;  %2063 = vmax.xlane.f32.xlu1 %v2062_v15 }
 0x225   : > { %v5517_v41 = vsel %vm5472_vm4, -inf, %v1628_v16 }
 0x226   : > { %v2071_v51 = vsel %vm2052_vm5, %v5517_v41, -inf }
 0x227   : > { %v1650_v5 = vpop.f32.mrf.mxu0 }
 0x228   : > { %v5523_v33 = vsel %vm5472_vm4, -inf, %v1650_v5 }
 0x229   : > { %v1672_v24 = vpop.f32.mrf.mxu1  ;;  %v2077_v38 = vsel %vm2052_vm5, %v5523_v33, -inf  ;;  %v1608_v4 = vpop.f32.mrf.mxu2 }
 0x22a   : > { %v5529_v63 = vsel %vm5472_vm4, -inf, %v1672_v24  ;;  %2072 = vmax.xlane.f32.xlu0 %v2071_v51  ;;  %v5535_v17 = vsel %vm5493_vm6, -inf, %v1608_v4 }
 0x22b   : > { %v2083_v13 = vsel %vm2052_vm5, %v5529_v63, -inf  ;;  %v2068_v44 = vsel %vm2052_vm5, %v5535_v17, -inf }
 0x22c   : > { %2078 = vmax.xlane.f32.xlu2 %v2077_v38  ;;  %2084 = vmax.xlane.f32.xlu1 %v2083_v13  ;;  %v1630_v34 = vpop.f32.mrf.mxu3 }
 0x22d   : > { %v5539_v42 = vsel %vm5493_vm6, -inf, %v1630_v34 }
 0x22e   : > { %v2074_v48 = vsel %vm2052_vm5, %v5539_v42, -inf }
 0x22f   : > { %v1652_v2 = vpop.f32.mrf.mxu0 }
 0x230   : > { %v5543_v37 = vsel %vm5493_vm6, -inf, %v1652_v2 }
 0x231   : > { %v1674_v25 = vpop.f32.mrf.mxu1  ;;  %v2080_v19 = vsel %vm2052_vm5, %v5543_v37, -inf }
 0x232   : > { %2081 = vmax.xlane.f32.xlu0 %v2080_v19  ;;  %v5561_v21 = vsel %vm5493_vm6, -inf, %v1674_v25 }
 0x233   : > { %v2086_v52 = vsel %vm2052_vm5, %v5561_v21, -inf }
 0x234   : > { %v1694_v9 = vpop.f32.mrf.mxu2  ;;  %2069 = vmax.xlane.f32.xlu2 %v2068_v44  ;;  %2075 = vmax.xlane.f32.xlu1 %v2074_v48 }
 0x235   : > { %v5553_v6 = vsel %vm5472_vm4, -inf, %v1694_v9 }
 0x236   : > { %v2089_v36 = vsel %vm2052_vm5, %v5553_v6, -inf }
 0x237   : > { %v1716_v49 = vpop.f32.mrf.mxu3  ;;  %v5557_v30 = vpop.f32.mrf.mxu0 }
 0x238   : > { %v5573_v58 = vsel %vm5472_vm4, -inf, %v1716_v49  ;;  %v2190_v8 = vsel %vm2052_vm5, %v5557_v30, -inf }
 0x239   : > { %v5563_v32 = vpop.f32.mrf.mxu1  ;;  %v2095_v60 = vsel %vm2052_vm5, %v5573_v58, -inf }
 0x23a   : > { %2090 = vmax.xlane.f32.xlu0 %v2089_v36  ;;  %v2193_v11 = vsel %vm2052_vm5, %v5563_v32, -inf }
 0x23c   : > { %v1696_v35 = vpop.f32.mrf.mxu2  ;;  %2087 = vmax.xlane.f32.xlu2 %v2086_v52 }
 0x23d   : > { %v5569_v47 = vsel %vm5493_vm6, -inf, %v1696_v35 }
 0x23e   : > { %v2092_v62 = vsel %vm2052_vm5, %v5569_v47, -inf }
 0x23f   : > { %v1718_v59 = vpop.f32.mrf.mxu3  ;;  %2093 = vmax.xlane.f32.xlu1 %v2092_v62  ;;  %v1765_v0 = vpop.f32.mrf.mxu0 }
 0x240   : > { %v5585_v31 = vsel %vm5493_vm6, -inf, %v1718_v59 }
 0x241   : > { %v1784_v57 = vpop.f32.mrf.mxu1  ;;  %v2098_v7 = vsel %vm2052_vm5, %v5585_v31, -inf }
 0x242   : > { %2194 = vmax.xlane.f32.xlu0 %v2193_v11 }
 0x244   : > { %2096 = vmax.xlane.f32.xlu2 %v2095_v60  ;;  %v5581_v14 = vpop.f32.mrf.mxu2 }
 0x245   : > { %v2196_v40 = vsel %vm2052_vm5, %v5581_v14, -inf }
 0x247   : > { %v5587_v56 = vpop.f32.mrf.mxu3  ;;  %v5589_v23 = vpop.f32.mrf.mxu0 }
 0x248   : > { %v2199_v28 = vsel %vm2052_vm5, %v5587_v56, -inf  ;;  %v2202_v15 = vsel %vm2052_vm5, %v5589_v23, -inf }
 0x249   : > { %v5595_v27 = vpop.f32.mrf.mxu1 }
 0x24a   : > { %2099 = vmax.xlane.f32.xlu0 %v2098_v7  ;;  %v2205_v22 = vsel %vm2052_vm5, %v5595_v27, -inf }
 0x24c   : > { %2191 = vmax.xlane.f32.xlu2 %v2190_v8  ;;  %v1803_v53 = vpop.f32.mrf.mxu2 }
 0x24f   : > { %v1822_v3 = vpop.f32.mrf.mxu3  ;;  %v1841_v39 = vpop.f32.mrf.mxu0 }
 0x251   : > { %v1860_v43 = vpop.f32.mrf.mxu1 }
 0x252   : > { %2200 = vmax.xlane.f32.xlu0 %v2199_v28 }
 0x254   : > { %2197 = vmax.xlane.f32.xlu2 %v2196_v40  ;;  %v5601_v18 = vpop.f32.mrf.mxu2 }
 0x255   : > { %v2208_v4 = vsel %vm2052_vm5, %v5601_v18, -inf }
 0x257   : > { %v5603_v50 = vpop.f32.mrf.mxu3  ;;  %v5607_v12 = vpop.f32.mrf.mxu0 }
 0x258   : > { %v2211_v24 = vsel %vm2052_vm5, %v5603_v50, -inf  ;;  %v2214_v44 = vsel %vm2052_vm5, %v5607_v12, -inf }
 0x259   : > { %v5611_v16 = vpop.f32.mrf.mxu1 }
 0x25a   : > { %2206 = vmax.xlane.f32.xlu0 %v2205_v22  ;;  %v2217_v25 = vsel %vm2052_vm5, %v5611_v16, -inf }
 0x25c   : > { %2203 = vmax.xlane.f32.xlu2 %v2202_v15  ;;  %v1879_v5 = vpop.f32.mrf.mxu2 }
 0x25f   : > { %v1898_v51 = vpop.f32.mrf.mxu3  ;;  %v1917_v38 = vpop.f32.mrf.mxu0 }
 0x260   : > { %v5646_v38 = vadd.s32 4294967288, %v5468_v26 }
 0x261   : > { %v1936_v13 = vpop.f32.mrf.mxu1 }
 0x262   : > { %2212 = vmax.xlane.f32.xlu0 %v2211_v24 }
 0x264   : > { %2209 = vmax.xlane.f32.xlu2 %v2208_v4  ;;  %v5617_v34 = vpop.f32.mrf.mxu2 }
 0x265   : > { %v2220_v35 = vsel %vm2052_vm5, %v5617_v34, -inf }
 0x267   : > { %v5619_v2 = vpop.f32.mrf.mxu3  ;;  %v5623_v19 = vpop.f32.mrf.mxu0 }
 0x268   : > { %v2223_v36 = vsel %vm2052_vm5, %v5619_v2, -inf  ;;  %v2226_v60 = vsel %vm2052_vm5, %v5623_v19, -inf }
 0x269   : > { %v5627_v48 = vpop.f32.mrf.mxu1 }
 0x26a   : > { %2218 = vmax.xlane.f32.xlu0 %v2217_v25  ;;  %v2229_v0 = vsel %vm2052_vm5, %v5627_v48, -inf }
 0x26c   : > { %2215 = vmax.xlane.f32.xlu2 %v2214_v44  ;;  %v1955_v9 = vpop.f32.mrf.mxu2 }
 0x26f   : > { %v1974_v49 = vpop.f32.mrf.mxu3  ;;  %v1993_v52 = vpop.f32.mrf.mxu0 }
 0x271   : > { %v2012_v62 = vpop.f32.mrf.mxu1 }
 0x272   : > { %2224 = vmax.xlane.f32.xlu0 %v2223_v36 }
 0x274   : > { %2221 = vmax.xlane.f32.xlu2 %v2220_v35  ;;  %v5633_v59 = vpop.f32.mrf.mxu2 }
 0x275   : > { %v2232_v53 = vsel %vm2052_vm5, %v5633_v59, -inf }
 0x277   : > { %v5635_v11 = vpop.f32.mrf.mxu3 }
 0x278   : > { %v2235_v57 = vsel %vm2052_vm5, %v5635_v11, -inf }
 0x279   : > { %2236 = vmax.xlane.f32.xlu1 %v2235_v57 }
 0x27a   : > { %2230 = vmax.xlane.f32.xlu0 %v2229_v0 }
 0x27c   : > { %2227 = vmax.xlane.f32.xlu2 %v2226_v60  ;;  %v2031_v7 = vpop.f32.mrf.mxu2 }
 0x27f   : > { %v2050_v8 = vpop.f32.mrf.mxu3 }
 0x284   : > { %2233 = vmax.xlane.f32.xlu2 %v2232_v53 }
 0x28d   : > { %v2055_v3 = vpop.xlane.xlu0 %2054 }
 0x28e   : > { %v2117_v35 = vperm.slane %v2055_v3, %v5468_v26 }
 0x28f   : > { %v2061_v28 = vpop.xlane.xlu1 %2060 }
 0x290   : > { %v2122_v25 = vperm.slane %v2061_v28, %v5468_v26 }
 0x295   : > { %v2058_v39 = vpop.xlane.xlu0 %2057 }
 0x296   : > { %v2119_v49 = vperm.slane %v2058_v39, %v5646_v38 }
 0x297   : > { %v2067_v40 = vpop.xlane.xlu2 %2066  ;;  %v2064_v43 = vpop.xlane.xlu1 %2063 }
 0x298   : > { %v2123_v44 = vperm.slane %v2064_v43, %v5646_v38  ;;  %v2125_v36 = vperm.slane %v2067_v40, %v5468_v26  ;;  %v2121_v60 = vsel %vm2120_vm7, %v2119_v49, %v2117_v35 }
 0x29a   : > { %v2124_v62 = vsel %vm2120_vm7, %v2123_v44, %v2122_v25 }
 0x29b   : > { %v2144_v8 = vsel %vm2143_vm8, %v2124_v62, %v2121_v60 }
 0x29d   : > { %v2073_v22 = vpop.xlane.xlu0 %2072 }
 0x29e   : > { %v2128_v7 = vperm.slane %v2073_v22, %v5468_v26 }
 0x29f   : > { %v2079_v15 = vpop.xlane.xlu2 %2078  ;;  %v2085_v5 = vpop.xlane.xlu1 %2084 }
 0x2a5   : > { %v2082_v51 = vpop.xlane.xlu0 %2081 }
 0x2a6   : > { %v2132_v43 = vperm.slane %v2082_v51, %v5646_v38 }
 0x2a7   : > { %v2070_v24 = vpop.xlane.xlu2 %2069  ;;  %v2076_v4 = vpop.xlane.xlu1 %2075 }
 0x2a8   : > { %v2126_v9 = vperm.slane %v2070_v24, %v5646_v38  ;;  %v2129_v0 = vperm.slane %v2076_v4, %v5646_v38  ;;  %v2134_v24 = vperm.slane %v2085_v5, %v5468_v26  ;;  %v2131_v4 = vperm.slane %v2079_v15, %v5468_v26 }
 0x2aa   : > { %v2127_v57 = vsel %vm2120_vm7, %v2126_v9, %v2125_v36  ;;  %v2130_v3 = vsel %vm2120_vm7, %v2129_v0, %v2128_v7  ;;  %v2133_v9 = vsel %vm2120_vm7, %v2132_v43, %v2131_v4 }
 0x2ab   : > { %v2146_v28 = vsel %vm2145_vm9, %v2127_v57, %v2144_v8 }
 0x2ac   : > { %v2148_v25 = vsel %vm2147_vm10, %v2130_v3, %v2146_v28 }
 0x2ad   : > { %v2091_v13 = vpop.xlane.xlu0 %2090 }
 0x2ae   : > { %v2137_v49 = vperm.slane %v2091_v13, %v5468_v26 }
 0x2af   : > { %v2088_v52 = vpop.xlane.xlu2 %2087 }
 0x2b0   : > { %v2135_v39 = vperm.slane %v2088_v52, %v5646_v38  ;;  %v2150_v52 = vsel %vm2149_vm11, %v2133_v9, %v2148_v25 }
 0x2b2   : > { %v2094_v40 = vpop.xlane.xlu1 %2093  ;;  %v2136_v44 = vsel %vm2120_vm7, %v2135_v39, %v2134_v24 }
 0x2b3   : > { %v2138_v22 = vperm.slane %v2094_v40, %v5646_v38  ;;  %v2152_v15 = vsel %vm2151_vm12, %v2136_v44, %v2150_v52 }
 0x2b5   : > { %v2195_v53 = vpop.xlane.xlu0 %2194  ;;  %v2139_v5 = vsel %vm2120_vm7, %v2138_v22, %v2137_v49 }
 0x2b6   : > { %v2154_v57 = vsel %vm2153_vm13, %v2139_v5, %v2152_v15  ;;  %v2255_v44 = vperm.slane %v2195_v53, %v5468_v26 }
 0x2b7   : > { %v2097_v36 = vpop.xlane.xlu2 %2096 }
 0x2b8   : > { %v2140_v35 = vperm.slane %v2097_v36, %v5468_v26 }
 0x2bd   : > { %v2100_v51 = vpop.xlane.xlu0 %2099 }
 0x2be   : > { %v2141_v62 = vperm.slane %v2100_v51, %v5646_v38 }
 0x2bf   : > { %v2192_v60 = vpop.xlane.xlu2 %2191 }
 0x2c0   : > { %v2142_v0 = vsel %vm2120_vm7, %v2141_v62, %v2140_v35  ;;  %v2254_v25 = vperm.slane %v2192_v60, %v5468_v26 }
 0x2c1   : > { %v2156_v13 = vsel %vm2155_vm14, %v2142_v0, %v2154_v57 }
 0x2c2   : > { %2158 = vxpose.xlu1.b32.start.end [1/1] (short) (narrow) %v2156_v13, 16  ;;  %v2270_v49 = vsel %vm2143_vm8, %v2255_v44, %v2254_v25 }
 0x2c5   : > { %v2201_v8 = vpop.xlane.xlu0 %2200 }
 0x2c6   : > { %v2257_v36 = vperm.slane %v2201_v8, %v5468_v26 }
 0x2c7   : > { %v2198_v7 = vpop.xlane.xlu2 %2197 }
 0x2c8   : > { %v2256_v22 = vperm.slane %v2198_v7, %v5468_v26 }
 0x2ca   : > { %v2271_v51 = vsel %vm2145_vm9, %v2256_v22, %v2270_v49 }
 0x2cb   : > { %v2272_v62 = vsel %vm2147_vm10, %v2257_v36, %v2271_v51 }
 0x2cd   : > { %v2207_v3 = vpop.xlane.xlu0 %2206 }
 0x2ce   : > { %v2259_v0 = vperm.slane %v2207_v3, %v5468_v26 }
 0x2cf   : > { %v2204_v28 = vpop.xlane.xlu2 %2203 }
 0x2d0   : > { %v2258_v5 = vperm.slane %v2204_v28, %v5468_v26 }
 0x2d2   : > { %v2273_v53 = vsel %vm2149_vm11, %v2258_v5, %v2272_v62 }
 0x2d3   : > { %v2274_v8 = vsel %vm2151_vm12, %v2259_v0, %v2273_v53 }
 0x2d5   : > { %v2213_v40 = vpop.xlane.xlu0 %2212 }
 0x2d6   : > { %v2261_v28 = vperm.slane %v2213_v40, %v5468_v26 }
 0x2d7   : > { %v2210_v39 = vpop.xlane.xlu2 %2209 }
 0x2d8   : > { %v2260_v13 = vperm.slane %v2210_v39, %v5468_v26 }
 0x2da   : > { %v2275_v22 = vsel %vm2153_vm13, %v2260_v13, %v2274_v8 }
 0x2db   : > { %v2276_v49 = vsel %vm2155_vm14, %v2261_v28, %v2275_v22 }
 0x2dd   : > { %v2219_v24 = vpop.xlane.xlu0 %2218 }
 0x2de   : > { %v2263_v35 = vperm.slane %v2219_v24, %v5468_v26 }
 0x2df   : > { %v2216_v43 = vpop.xlane.xlu2 %2215 }
 0x2e0   : > { %v2262_v15 = vperm.slane %v2216_v43, %v5468_v26 }
 0x2e2   : > { %v2277_v7 = vsel %vm2143_vm8, %v2263_v35, %v2262_v15 }
 0x2e5   : > { %v2225_v9 = vpop.xlane.xlu0 %2224 }
 0x2e6   : > { %v2265_v43 = vperm.slane %v2225_v9, %v5468_v26 }
 0x2e7   : > { %v2222_v4 = vpop.xlane.xlu2 %2221 }
 0x2e8   : > { %v2264_v60 = vperm.slane %v2222_v4, %v5468_v26 }
 0x2ea   : > { %v2278_v24 = vsel %vm2145_vm9, %v2264_v60, %v2277_v7 }
 0x2eb   : > { %v2279_v39 = vsel %vm2147_vm10, %v2265_v43, %v2278_v24 }
 0x2ec   : > { %v2237_v57 = vpop.xlane.xlu1 %2236 }
 0x2ed   : > { %v2231_v3 = vpop.xlane.xlu0 %2230  ;;  %v2269_v35 = vperm.slane %v2237_v57, %v5468_v26 }
 0x2ee   : > { %v2267_v4 = vperm.slane %v2231_v3, %v5468_v26 }
 0x2ef   : > { %v2228_v52 = vpop.xlane.xlu2 %2227 }
 0x2f0   : > { %v2266_v25 = vperm.slane %v2228_v52, %v5468_v26 }
 0x2f2   : > { %v2280_v51 = vsel %vm2149_vm11, %v2266_v25, %v2279_v39 }
 0x2f3   : > { %v2281_v52 = vsel %vm2151_vm12, %v2267_v4, %v2280_v51 }
 0x2f7   : > { %v2234_v44 = vpop.xlane.xlu2 %2233 }
 0x2f8   : > { %v2268_v40 = vperm.slane %v2234_v44, %v5468_v26 }
 0x2fa   : > { %v2282_v62 = vsel %vm2153_vm13, %v2268_v40, %v2281_v52 }
 0x2fb   : > { %v2283_v0 = vsel %vm2155_vm14, %v2269_v35, %v2282_v62 }
 0x315   : > { %4712 = vset.pattern.permute.xlu1 %v5465_v20 }
 0x366   : > { %v2174_v36 = vpop.trf.xlu1 }
 0x367   : > { %v2286_v9 = vmax.f32 %v2174_v36, %v2276_v49 }
 0x369   : > { %2288 = vxpose.xlu0.b32.start [1/2] (short) (narrow) %v2286_v9, 8  ;;  %v2479_v5 = vperm.slane %v2286_v9, 1  ;;  %v2472_v15 = vperm.slane %v2286_v9, 0  ;;  %v2493_v60 = vperm.slane %v2286_v9, 3  ;;  %v2486_v7 = vperm.slane %v2286_v9, 2 }
 0x36a   : > { %v2507_v8 = vperm.slane %v2286_v9, 5  ;;  %v2500_v28 = vperm.slane %v2286_v9, 4  ;;  %v2521_v43 = vperm.slane %v2286_v9, 7  ;;  %v2514_v24 = vperm.slane %v2286_v9, 6 }
 0x36b   : > { %2484 = vperm.xlu2 %4713, %v2479_v5   ;;  %2477 = vperm.xlu1 %4712, %v2472_v15  }
 0x36e   : > { %v2175_v53 = vpop.trf.xlu1 }
 0x36f   : > { %v2287_v13 = vmax.f32 %v2175_v53, %v2283_v0 }
 0x371   : > { %2289 = vxpose.xlu0.b32.end [2/2] (short) (narrow) %v2287_v13, 8  ;;  %v2542_v57 = vperm.slane %v2287_v13, 2  ;;  %v2528_v25 = vperm.slane %v2287_v13, 0  ;;  %v2556_v3 = vperm.slane %v2287_v13, 4  ;;  %v2549_v22 = vperm.slane %v2287_v13, 3 }
 0x372   : > { %v2577_v44 = vperm.slane %v2287_v13, 7  ;;  %v2563_v39 = vperm.slane %v2287_v13, 5  ;;  %v2535_v4 = vperm.slane %v2287_v13, 1  ;;  %v2570_v49 = vperm.slane %v2287_v13, 6 }
 0x373   : > { %2498 = vperm.xlu2 %4713, %v2493_v60   ;;  %2491 = vperm.xlu1 %4712, %v2486_v7  }
 0x37b   : > { %2512 = vperm.xlu2 %4713, %v2507_v8   ;;  %2505 = vperm.xlu1 %4712, %v2500_v28  }
 0x383   : > { %2526 = vperm.xlu2 %4713, %v2521_v43   ;;  %2519 = vperm.xlu1 %4712, %v2514_v24  }
 0x38b   : > { %2547 = vperm.xlu2 %4713, %v2542_v57   ;;  %2533 = vperm.xlu1 %4712, %v2528_v25  }
 0x393   : > { %2561 = vperm.xlu2 %4713, %v2556_v3   ;;  %2554 = vperm.xlu1 %4712, %v2549_v22  }
 0x39b   : > { %2582 = vperm.xlu2 %4713, %v2577_v44   ;;  %2568 = vperm.xlu1 %4712, %v2563_v39  }
 0x3c5   : > { %v5717_v15 = vpop.permute.xlu2 %2484 }
 0x3cd   : > { %v2499_v35 = vpop.permute.xlu2 %2498 }
 0x3ce   : > { %v2587_v24 = vsub.f32 %v5587_v56, %v2499_v35 }
 0x3d0   : > { %v2606_v25 = vmul.f32 1.442695, %v2587_v24 }
 0x3d5   : > { %v5727_v0 = vpop.permute.xlu2 %2512 }
 0x3d8   : > { %4714 = vset.pattern.permute.xlu0 %v5465_v20 }
 0x3dd   : > { %v2478_v51 = vpop.permute.xlu1 %2477  ;;  %v2527_v28 = vpop.permute.xlu2 %2526 }
 0x3de   : > { %v2584_v53 = vsub.f32 %v5557_v30, %v2478_v51  ;;  %v2591_v57 = vsub.f32 %v5603_v50, %v2527_v28 }
 0x3e0   : > { %2540 = vperm.xlu0 %4714, %v2535_v4   ;;  %v2600_v60 = vmul.f32 1.442695, %v2584_v53  ;;  %v2614_v3 = vmul.f32 1.442695, %v2591_v57 }
 0x3e2   : > { %4739 = vpow2.f32 %v2600_v60 }
 0x3e5   : > { %v2492_v52 = vpop.permute.xlu1 %2491 }
 0x3e6   : > { %v2586_v13 = vsub.f32 %v5581_v14, %v2492_v52 }
 0x3e8   : > { %2575 = vperm.xlu0 %4714, %v2570_v49   ;;  %v2604_v8 = vmul.f32 1.442695, %v2586_v13  ;;  %v5735_v30 = vpop.eup %4739 }
 0x3e9   : > { %v2760_v39 = vsel %vm2052_vm5, %v5735_v30, 0.0 }
 0x3ea   : > { %4741 = vpow2.f32 %v2604_v8 }
 0x3eb   : > { %4743 = vpow2.f32 %v2606_v25 }
 0x3ec   : > { %4745 = vpow2.f32 %v2614_v3 }
 0x3ed   : > { %v5725_v62 = vpop.permute.xlu1 %2505 }
 0x3f0   : > { %4719 = vset.pattern.permute.xlu0 %v5483_v29  ;;  %v5737_v44 = vpop.eup %4741 }
 0x3f1   : > { %v2766_v50 = vsel %vm2052_vm5, %v5737_v44, 0.0  ;;  %v5746_v51 = vpop.eup %4743 }
 0x3f2   : > { %v5748_v52 = vpop.eup %4745 }
 0x3f3   : > { %v2781_v35 = vsel %vm2052_vm5, %v5748_v52, 0.0 }
 0x3f5   : > { %v2520_v7 = vpop.permute.xlu1 %2519 }
 0x3f6   : > { %v2590_v14 = vsub.f32 %v5601_v18, %v2520_v7 }
 0x3f8   : > { %v2612_v4 = vmul.f32 1.442695, %v2590_v14 }
 0x3fa   : > { %4747 = vpow2.f32 %v2612_v4 }
 0x3fd   : > { %v2534_v22 = vpop.permute.xlu1 %2533 }
 0x3fe   : > { %v2592_v56 = vsub.f32 %v5607_v12, %v2534_v22  ;;  %v2769_v12 = vsel %vm2052_vm5, %v5746_v51, 0.0 }
 0x400   : > { %v2616_v49 = vmul.f32 1.442695, %v2592_v56  ;;  %v5755_v13 = vpop.eup %4747 }
 0x402   : > { %4749 = vpow2.f32 %v2616_v49 }
 0x408   : > { %v5757_v60 = vpop.eup %4749 }
 0x409   : > { %6445 = vst [vmem:[#allocation8_spill] sm:$0xff] %v5757_v60  ;;  %v2784_v7 = vsel %vm2052_vm5, %v5757_v60, 0.0 }
 0x40d   : > { %v5712_v36 = vpop.trf.xlu0 }
 0x40e   : > { %v2320_v40 = vperm.slane %v5712_v36, 0  ;;  %v2346_v9 = vperm.slane %v5712_v36, 2  ;;  %v2398_v5 = vperm.slane %v5712_v36, 6  ;;  %v2333_v43 = vperm.slane %v5712_v36, 1 }
 0x40f   : > { %v2359_v22 = vperm.slane %v5712_v36, 3 }
 0x410   : > { %2325 = vperm.xlu2 %4713, %v2320_v40   ;;  %2357 = vperm.xlu0 %4719, %v2346_v9  }
 0x411   : > { %2403 = vperm.xlu1 %4712, %v2398_v5  }
 0x418   : > { %4715 = vset.pattern.permute.xlu2 %v5483_v29  ;;  %4727 = vset.pattern.permute.xlu0 %v5465_v20 }
 0x420   : > { %2331 = vperm.xlu2 %4715, %v2320_v40   ;;  %v2548_v40 = vpop.permute.xlu2 %2547 }
 0x421   : > { %v2594_v18 = vsub.f32 %v5617_v34, %v2548_v40  ;;  %v2778_v34 = vsel %vm2052_vm5, %v5755_v13, 0.0 }
 0x423   : > { %v2620_v53 = vmul.f32 1.442695, %v2594_v18 }
 0x425   : > { %4751 = vpow2.f32 %v2620_v53 }
 0x428   : > { %4716 = vset.pattern.permute.xlu2 %v5465_v20  ;;  %v2562_v28 = vpop.permute.xlu2 %2561 }
 0x429   : > { %v2596_v25 = vsub.f32 %v5623_v19, %v2562_v28 }
 0x42b   : > { %v5764_v8 = vpop.eup %4751  ;;  %v2624_v14 = vmul.f32 1.442695, %v2596_v25 }
 0x42c   : > { %v2790_v24 = vsel %vm2052_vm5, %v5764_v8, 0.0 }
 0x430   : > { %2338 = vperm.xlu2 %4716, %v2333_v43   ;;  %v2583_v56 = vpop.permute.xlu2 %2582 }
 0x431   : > { %v2599_v4 = vsub.f32 %v5635_v11, %v2583_v56  ;;  %v2385_v56 = vperm.slane %v5712_v36, 5 }
 0x433   : > { %v2630_v19 = vmul.f32 1.442695, %v2599_v4 }
 0x438   : > { %4717 = vset.pattern.permute.xlu2 %v5483_v29 }
 0x43a   : > { %2761 = vadd.xlane.f32.xlu0 %v2760_v39 }
 0x43b   : > { %2767 = vadd.xlane.f32.xlu1 %v2766_v50 }
 0x440   : > { %2344 = vperm.xlu2 %4717, %v2333_v43  }
 0x442   : > { %2770 = vadd.xlane.f32.xlu0 %v2769_v12 }
 0x443   : > { %2782 = vadd.xlane.f32.xlu1 %v2781_v35 }
 0x448   : > { %4718 = vset.pattern.permute.xlu2 %v5465_v20 }
 0x44a   : > { %2779 = vadd.xlane.f32.xlu0 %v2778_v34 }
 0x44b   : > { %2785 = vadd.xlane.f32.xlu1 %v2784_v7 }
 0x450   : > { %2351 = vperm.xlu2 %4718, %v2346_v9  }
 0x452   : > { %v2541_v43 = vpop.permute.xlu0 %2540 }
 0x453   : > { %v2593_v57 = vsub.f32 %v5611_v16, %v2541_v43  ;;  %2791 = vadd.xlane.f32.xlu1 %v2790_v24  ;;  %v2372_v24 = vperm.slane %v5712_v36, 4 }
 0x455   : > { %v2618_v3 = vmul.f32 1.442695, %v2593_v57 }
 0x457   : > { %4753 = vpow2.f32 %v2618_v3 }
 0x458   : > { %2364 = vperm.xlu2 %4718, %v2359_v22   ;;  %4755 = vpow2.f32 %v2624_v14 }
 0x45a   : > { %v2576_v39 = vpop.permute.xlu0 %2575 }
 0x45b   : > { %v2598_v50 = vsub.f32 %v5633_v59, %v2576_v39  ;;  %v5809_v39 = vpop.permute.xlu1 %2554 }
 0x45d   : > { %v5774_v9 = vpop.eup %4753  ;;  %v2628_v49 = vmul.f32 1.442695, %v2598_v50 }
 0x45e   : > { %6446 = vst [vmem:[#allocation9_spill] sm:$0xff] %v5774_v9  ;;  %v2787_v16 = vsel %vm2052_vm5, %v5774_v9, 0.0  ;;  %v5780_v40 = vpop.eup %4755 }
 0x45f   : > { %4757 = vpow2.f32 %v2628_v49  ;;  %2788 = vadd.xlane.f32.xlu0 %v2787_v16  ;;  %6447 = vst [vmem:[#allocation10_spill] sm:$0xff] %v5780_v40  ;;  %v2796_v59 = vsel %vm2052_vm5, %v5780_v40, 0.0 }
 0x460   : > { %4720 = vset.pattern.permute.xlu2 %v5483_v29  ;;  %4759 = vpow2.f32 %v2630_v19 }
 0x463   : > { %v5813_v49 = vpop.permute.xlu1 %2568 }
 0x465   : > { %v5782_v18 = vpop.eup %4757 }
 0x466   : > { %6448 = vst [vmem:[#allocation11_spill] sm:$0xff] %v5782_v18  ;;  %v2802_v11 = vsel %vm2052_vm5, %v5782_v18, 0.0  ;;  %v5788_v35 = vpop.eup %4759 }
 0x467   : > { %2797 = vadd.xlane.f32.xlu0 %v2796_v59  ;;  %2803 = vadd.xlane.f32.xlu1 %v2802_v11  ;;  %6449 = vst [vmem:[#allocation12_spill] sm:$0xff] %v5788_v35  ;;  %v2805_v7 = vsel %vm2052_vm5, %v5788_v35, 0.0 }
 0x468   : > { %2370 = vperm.xlu2 %4720, %v2359_v22  }
 0x46a   : > { %v2326_v12 = vpop.permute.xlu2 %2325 }
 0x46b   : > { %v2424_v53 = vsub.f32 %v5478_v61, %v2326_v12 }
 0x46d   : > { %v2440_v34 = vmul.f32 1.442695, %v2424_v53 }
 0x46f   : > { %4761 = vpow2.f32 %v2440_v34  ;;  %2806 = vadd.xlane.f32.xlu0 %v2805_v7 }
 0x470   : > { %4721 = vset.pattern.permute.xlu2 %v5465_v20 }
 0x475   : > { %v5794_v28 = vpop.eup %4761 }
 0x476   : > { %v2632_v43 = vsel %vm2052_vm5, %v5794_v28, 0.0 }
 0x477   : > { %2633 = vadd.xlane.f32.xlu1 %v2632_v43 }
 0x478   : > { %2377 = vperm.xlu2 %4721, %v2372_v24  }
 0x47a   : > { %v2332_v57 = vpop.permute.xlu2 %2331 }
 0x47b   : > { %v2425_v61 = vsub.f32 %v5499_v45, %v2332_v57 }
 0x47d   : > { %v2442_v25 = vmul.f32 1.442695, %v2425_v61 }
 0x47f   : > { %4763 = vpow2.f32 %v2442_v25 }
 0x480   : > { %4722 = vset.pattern.permute.xlu2 %v5483_v29 }
 0x482   : > { %v5820_v34 = vpop.permute.xlu0 %2357 }
 0x483   : > { %v2404_v11 = vpop.permute.xlu1 %2403 }
 0x485   : > { %v5801_v3 = vpop.eup %4763 }
 0x486   : > { %v2635_v22 = vsel %vm2052_vm5, %v5801_v3, 0.0 }
 0x487   : > { %2636 = vadd.xlane.f32.xlu0 %v2635_v22 }
 0x488   : > { %2383 = vperm.xlu2 %4722, %v2372_v24  }
 0x48a   : > { %v5806_v14 = vpop.permute.xlu2 %2338 }
 0x490   : > { %4723 = vset.pattern.permute.xlu2 %v5465_v20 }
 0x498   : > { %2390 = vperm.xlu2 %4723, %v2385_v56  }
 0x49a   : > { %v2345_v45 = vpop.permute.xlu2 %2344 }
 0x49b   : > { %v2427_v50 = vsub.f32 %v5509_v1, %v2345_v45 }
 0x49d   : > { %v2446_v4 = vmul.f32 1.442695, %v2427_v50 }
 0x49f   : > { %4765 = vpow2.f32 %v2446_v4 }
 0x4a0   : > { %4724 = vset.pattern.permute.xlu2 %v5483_v29 }
 0x4a5   : > { %v5815_v16 = vpop.eup %4765 }
 0x4a6   : > { %v2641_v19 = vsel %vm2052_vm5, %v5815_v16, 0.0 }
 0x4a7   : > { %2642 = vadd.xlane.f32.xlu1 %v2641_v19 }
 0x4a8   : > { %2396 = vperm.xlu2 %4724, %v2385_v56  }
 0x4aa   : > { %v2352_v59 = vpop.permute.xlu2 %2351 }
 0x4ab   : > { %v2428_v12 = vsub.f32 %v5505_v10, %v2352_v59 }
 0x4ad   : > { %v2448_v53 = vmul.f32 1.442695, %v2428_v12  ;;  %v5829_v61 = vpop.xlane.xlu0 %2761 }
 0x4ae   : > { %v5824_v7 = vpop.xlane.xlu1 %2767 }
 0x4af   : > { %4767 = vpow2.f32 %v2448_v53 }
 0x4b0   : > { %2409 = vperm.xlu2 %4724, %v2398_v5  }
 0x4b2   : > { %v2365_v1 = vpop.permute.xlu2 %2364 }
 0x4b3   : > { %v2430_v43 = vsub.f32 %v5517_v41, %v2365_v1  ;;  %v2411_v41 = vperm.slane %v5712_v36, 7 }
 0x4b5   : > { %v5827_v24 = vpop.eup %4767  ;;  %v2452_v57 = vmul.f32 1.442695, %v2430_v43  ;;  %v5841_v56 = vpop.xlane.xlu0 %2770 }
 0x4b6   : > { %v2644_v10 = vsel %vm2052_vm5, %v5827_v24, 0.0  ;;  %v5836_v5 = vpop.xlane.xlu1 %2782 }
 0x4b7   : > { %4769 = vpow2.f32 %v2452_v57  ;;  %2645 = vadd.xlane.f32.xlu0 %v2644_v10 }
 0x4b8   : > { %4725 = vset.pattern.permute.xlu2 %v5465_v20 }
 0x4bd   : > { %v5834_v25 = vpop.eup %4769  ;;  %v5845_v59 = vpop.xlane.xlu0 %2779 }
 0x4be   : > { %v2650_v22 = vsel %vm2052_vm5, %v5834_v25, 0.0  ;;  %v2786_v19 = vpop.xlane.xlu1 %2785 }
 0x4bf   : > { %2651 = vadd.xlane.f32.xlu1 %v2650_v22  ;;  %v2832_v43 = vperm.slane %v2786_v19, %v5468_v26  ;;  %v2585_v19 = vsub.f32 %v5563_v32, %v5717_v15 }
 0x4c0   : > { %2416 = vperm.xlu2 %4725, %v2411_v41  }
 0x4c1   : > { %v2602_v40 = vmul.f32 1.442695, %v2585_v19 }
 0x4c2   : > { %v2371_v45 = vpop.permute.xlu2 %2370 }
 0x4c3   : > { %v2431_v50 = vsub.f32 %v5539_v42, %v2371_v45 }
 0x4c5   : > { %v2454_v4 = vmul.f32 1.442695, %v2431_v50 }
 0x4c6   : > { %v2792_v36 = vpop.xlane.xlu1 %2791 }
 0x4c7   : > { %4771 = vpow2.f32 %v2454_v4  ;;  %v2834_v57 = vperm.slane %v2792_v36, %v5468_v26 }
 0x4c8   : > { %4726 = vset.pattern.permute.xlu2 %v5483_v29 }
 0x4cd   : > { %v5847_v12 = vpop.eup %4771 }
 0x4ce   : > { %v2653_v53 = vsel %vm2052_vm5, %v5847_v12, 0.0 }
 0x4cf   : > { %2654 = vadd.xlane.f32.xlu0 %v2653_v53 }
 0x4d0   : > { %2422 = vperm.xlu2 %4726, %v2411_v41   ;;  %v2436_v41 = vsub.f32 %v5553_v6, %v2404_v11 }
 0x4d2   : > { %v2789_v1 = vpop.xlane.xlu0 %2788  ;;  %v5858_v45 = vpop.permute.xlu2 %2377 }
 0x4d3   : > { %v2833_v42 = vperm.slane %v2789_v1, %v5468_v26  ;;  %v2464_v1 = vmul.f32 1.442695, %v2436_v41  ;;  %v2595_v41 = vsub.f32 %v5619_v2, %v5809_v39 }
 0x4d5   : > { %v2847_v10 = vsel %vm2143_vm8, %v2833_v42, %v2832_v43  ;;  %v2588_v43 = vsub.f32 %v5589_v23, %v5725_v62  ;;  %v2589_v23 = vsub.f32 %v5595_v27, %v5727_v0 }
 0x4d6   : > { %v5856_v22 = vsel %vm2145_vm9, %v2834_v57, %v2847_v10 }
 0x4e2   : > { %v2384_v50 = vpop.permute.xlu2 %2383 }
 0x4e3   : > { %v2433_v4 = vsub.f32 %v5543_v37, %v2384_v50  ;;  %v2608_v37 = vmul.f32 1.442695, %v2588_v43 }
 0x4e5   : > { %v2458_v53 = vmul.f32 1.442695, %v2433_v4 }
 0x4e7   : > { %4773 = vpow2.f32 %v2458_v53  ;;  %v2622_v53 = vmul.f32 1.442695, %v2595_v41 }
 0x4e8   : > { %4775 = vpow2.f32 %v2464_v1  ;;  %v2597_v1 = vsub.f32 %v5627_v48, %v5813_v49 }
 0x4e9   : > { %4777 = vpow2.f32 %v2602_v40  ;;  %v2610_v40 = vmul.f32 1.442695, %v2589_v23  ;;  %v2429_v23 = vsub.f32 %v5535_v17, %v5820_v34 }
 0x4ea   : > { %4779 = vpow2.f32 %v2608_v37 }
 0x4ed   : > { %v5864_v36 = vpop.eup %4773 }
 0x4ee   : > { %v2659_v42 = vsel %vm2052_vm5, %v5864_v36, 0.0  ;;  %v5870_v11 = vpop.eup %4775 }
 0x4ef   : > { %2660 = vadd.xlane.f32.xlu1 %v2659_v42  ;;  %v5873_v15 = vpop.eup %4777  ;;  %v2668_v10 = vsel %vm2052_vm5, %v5870_v11, 0.0  ;;  %v2626_v42 = vmul.f32 1.442695, %v2597_v1 }
 0x4f0   : > { %v2763_v62 = vsel %vm2052_vm5, %v5873_v15, 0.0  ;;  %v5881_v50 = vpop.eup %4779 }
 0x4f1   : > { %v2772_v27 = vsel %vm2052_vm5, %v5881_v50, 0.0 }
 0x4f2   : > { %v2391_v6 = vpop.permute.xlu2 %2390 }
 0x4f3   : > { %v2434_v32 = vsub.f32 %v5529_v63, %v2391_v6 }
 0x4f5   : > { %v2460_v57 = vmul.f32 1.442695, %v2434_v32  ;;  %v2426_v32 = vsub.f32 %v5487_v46, %v5806_v14  ;;  %v2450_v14 = vmul.f32 1.442695, %v2429_v23 }
 0x4f7   : > { %4781 = vpow2.f32 %v2460_v57  ;;  %2669 = vadd.xlane.f32.xlu1 %v2668_v10  ;;  %v2444_v49 = vmul.f32 1.442695, %v2426_v32 }
 0x4f8   : > { %4783 = vpow2.f32 %v2610_v40  ;;  %v2432_v40 = vsub.f32 %v5523_v33, %v5858_v45 }
 0x4f9   : > { %2764 = vadd.xlane.f32.xlu2 %v2763_v62  ;;  %4785 = vpow2.f32 %v2622_v53 }
 0x4fa   : > { %4787 = vpow2.f32 %v2626_v42 }
 0x4fd   : > { %v5883_v63 = vpop.eup %4781 }
 0x4fe   : > { %v2662_v4 = vsel %vm2052_vm5, %v5883_v63, 0.0  ;;  %v5891_v19 = vpop.eup %4783 }
 0x4ff   : > { %2663 = vadd.xlane.f32.xlu0 %v2662_v4  ;;  %v2775_v43 = vsel %vm2052_vm5, %v5891_v19, 0.0  ;;  %v5898_v39 = vpop.eup %4785 }
 0x500   : > { %v2793_v48 = vsel %vm2052_vm5, %v5898_v39, 0.0  ;;  %v5904_v57 = vpop.eup %4787 }
 0x501   : > { %2773 = vadd.xlane.f32.xlu2 %v2772_v27  ;;  %6450 = vst [vmem:[#allocation13_spill] sm:$0xff] %v5904_v57  ;;  %v2799_v46 = vsel %vm2052_vm5, %v5904_v57, 0.0  ;;  %v2456_v27 = vmul.f32 1.442695, %v2432_v40 }
 0x502   : > { %v2397_v0 = vpop.permute.xlu2 %2396 }
 0x503   : > { %v2435_v34 = vsub.f32 %v5561_v21, %v2397_v0 }
 0x505   : > { %v2462_v1 = vmul.f32 1.442695, %v2435_v34 }
 0x509   : > { %2776 = vadd.xlane.f32.xlu2 %v2775_v43 }
 0x50a   : > { %v2410_v37 = vpop.permute.xlu2 %2409 }
 0x50b   : > { %v2437_v2 = vsub.f32 %v5569_v47, %v2410_v37 }
 0x50d   : > { %v2466_v6 = vmul.f32 1.442695, %v2437_v2 }
 0x50f   : > { %4789 = vpow2.f32 %v2466_v6 }
 0x510   : > { %4791 = vpow2.f32 %v2444_v49 }
 0x511   : > { %2794 = vadd.xlane.f32.xlu2 %v2793_v48  ;;  %4793 = vpow2.f32 %v2450_v14  ;;  %v2827_v14 = vperm.slane %v5841_v56, %v5468_v26  ;;  %v2831_v56 = vperm.slane %v5836_v5, %v5468_v26 }
 0x512   : > { %4795 = vpow2.f32 %v2456_v27 }
 0x513   : > { %4797 = vpow2.f32 %v2462_v1  ;;  %v2798_v1 = vpop.xlane.xlu0 %2797 }
 0x515   : > { %v5906_v10 = vpop.eup %4789 }
 0x516   : > { %v2671_v47 = vsel %vm2052_vm5, %v5906_v10, 0.0  ;;  %v5914_v62 = vpop.eup %4791 }
 0x517   : > { %2672 = vadd.xlane.f32.xlu0 %v2671_v47  ;;  %v2638_v4 = vsel %vm2052_vm5, %v5914_v62, 0.0  ;;  %v5920_v17 = vpop.eup %4793  ;;  %v2824_v47 = vperm.slane %v5829_v61, %v5468_v26 }
 0x518   : > { %v2647_v53 = vsel %vm2052_vm5, %v5920_v17, 0.0  ;;  %v5926_v33 = vpop.eup %4795 }
 0x519   : > { %2800 = vadd.xlane.f32.xlu2 %v2799_v46  ;;  %v2656_v2 = vsel %vm2052_vm5, %v5926_v33, 0.0  ;;  %v5931_v0 = vpop.eup %4797  ;;  %v2826_v46 = vperm.slane %v5824_v7, %v5468_v26  ;;  %v2830_v7 = vperm.slane %v5845_v59, %v5468_v26 }
 0x51a   : > { %v2417_v41 = vpop.permute.xlu2 %2416 }
 0x51b   : > { %v2438_v37 = vsub.f32 %v5573_v58, %v2417_v41 }
 0x51d   : > { %v2468_v21 = vmul.f32 1.442695, %v2438_v37 }
 0x521   : > { %2639 = vadd.xlane.f32.xlu2 %v2638_v4 }
 0x529   : > { %2648 = vadd.xlane.f32.xlu2 %v2647_v53 }
 0x52a   : > { %v2423_v43 = vpop.permute.xlu2 %2422 }
 0x52b   : > { %v2439_v42 = vsub.f32 %v5585_v31, %v2423_v43  ;;  %v2665_v31 = vsel %vm2052_vm5, %v5931_v0, 0.0 }
 0x52d   : > { %v2470_v45 = vmul.f32 1.442695, %v2439_v42 }
 0x52f   : > { %4799 = vpow2.f32 %v2470_v45  ;;  %v2804_v45 = vpop.xlane.xlu1 %2803 }
 0x530   : > { %4801 = vpow2.f32 %v2468_v21 }
 0x531   : > { %2657 = vadd.xlane.f32.xlu2 %v2656_v2 }
 0x535   : > { %v5933_v6 = vpop.eup %4799 }
 0x536   : > { %v2677_v32 = vsel %vm2052_vm5, %v5933_v6, 0.0  ;;  %v5939_v58 = vpop.eup %4801 }
 0x537   : > { %2678 = vadd.xlane.f32.xlu1 %v2677_v32  ;;  %v2674_v48 = vsel %vm2052_vm5, %v5939_v58, 0.0 }
 0x539   : > { %2666 = vadd.xlane.f32.xlu2 %v2665_v31  ;;  %v2836_v31 = vperm.slane %v2798_v1, %v5468_v26 }
 0x541   : > { %2675 = vadd.xlane.f32.xlu2 %v2674_v48  ;;  %v2807_v48 = vpop.xlane.xlu0 %2806 }
 0x56c   : > { %v2765_v49 = vpop.xlane.xlu2 %2764 }
 0x56d   : > { %v2825_v23 = vperm.slane %v2765_v49, %v5468_v26  ;;  %v2634_v49 = vpop.xlane.xlu1 %2633 }
 0x56f   : > { %v2840_v40 = vsel %vm2143_vm8, %v2825_v23, %v2824_v47 }
 0x570   : > { %v2841_v4 = vsel %vm2145_vm9, %v2826_v46, %v2840_v40  ;;  %v2838_v46 = vperm.slane %v2804_v45, %v5468_v26  ;;  %v2637_v40 = vpop.xlane.xlu0 %2636 }
 0x571   : > { %v2842_v41 = vsel %vm2147_vm10, %v2827_v14, %v2841_v4  ;;  %v2839_v14 = vperm.slane %v2807_v48, %v5468_v26 }
 0x574   : > { %v2774_v27 = vpop.xlane.xlu2 %2773 }
 0x575   : > { %v2828_v34 = vperm.slane %v2774_v27, %v5468_v26 }
 0x577   : > { %v2843_v53 = vsel %vm2149_vm11, %v2828_v34, %v2842_v41  ;;  %v2643_v41 = vpop.xlane.xlu1 %2642 }
 0x57c   : > { %v2777_v61 = vpop.xlane.xlu2 %2776 }
 0x57d   : > { %v2829_v43 = vperm.slane %v2777_v61, %v5468_v26 }
 0x57f   : > { %v2844_v42 = vsel %vm2151_vm12, %v2829_v43, %v2843_v53  ;;  %v2652_v61 = vpop.xlane.xlu1 %2651 }
 0x580   : > { %v2845_v37 = vsel %vm2153_vm13, %v2830_v7, %v2844_v42 }
 0x581   : > { %v5963_v2 = vsel %vm2155_vm14, %v2831_v56, %v2845_v37 }
 0x584   : > { %v2795_v21 = vpop.xlane.xlu2 %2794 }
 0x585   : > { %v2835_v32 = vperm.slane %v2795_v21, %v5468_v26  ;;  %v2697_v21 = vperm.slane %v2637_v40, %v5646_v38 }
 0x587   : > { %v2849_v59 = vsel %vm2147_vm10, %v2835_v32, %v5856_v22  ;;  %v2646_v22 = vpop.xlane.xlu0 %2645  ;;  %v2661_v7 = vpop.xlane.xlu1 %2660  ;;  %v2700_v32 = vperm.slane %v2643_v41, %v5646_v38 }
 0x588   : > { %v2850_v5 = vsel %vm2149_vm11, %v2836_v31, %v2849_v59  ;;  %v2702_v31 = vperm.slane %v2646_v22, %v5468_v26  ;;  %v2696_v59 = vperm.slane %v2634_v49, %v5468_v26  ;;  %v2709_v41 = vperm.slane %v2661_v7, %v5646_v38 }
 0x58c   : > { %v2801_v47 = vpop.xlane.xlu2 %2800 }
 0x58d   : > { %v2837_v23 = vperm.slane %v2801_v47, %v5468_v26 }
 0x58f   : > { %v2851_v4 = vsel %vm2151_vm12, %v2837_v23, %v2850_v5  ;;  %v2655_v43 = vpop.xlane.xlu0 %2654  ;;  %v2670_v48 = vpop.xlane.xlu1 %2669 }
 0x590   : > { %v2852_v27 = vsel %vm2153_vm13, %v2838_v46, %v2851_v4  ;;  %v2706_v4 = vperm.slane %v2655_v43, %v5646_v38 }
 0x591   : > { %v2853_v34 = vsel %vm2155_vm14, %v2839_v14, %v2852_v27  ;;  %v2698_v14 = vsel %vm2120_vm7, %v2697_v21, %v2696_v59 }
 0x594   : > { %v2640_v53 = vpop.xlane.xlu2 %2639 }
 0x595   : > { %v2699_v45 = vperm.slane %v2640_v53, %v5468_v26  ;;  %v2705_v53 = vperm.slane %v2652_v61, %v5468_v26  ;;  %v2714_v61 = vperm.slane %v2670_v48, %v5468_v26 }
 0x597   : > { %v2664_v42 = vpop.xlane.xlu0 %2663  ;;  %v2701_v5 = vsel %vm2120_vm7, %v2700_v32, %v2699_v45  ;;  %v2707_v45 = vsel %vm2120_vm7, %v2706_v4, %v2705_v53 }
 0x598   : > { %v2720_v27 = vsel %vm2143_vm8, %v2701_v5, %v2698_v14  ;;  %v2711_v49 = vperm.slane %v2664_v42, %v5468_v26 }
 0x59c   : > { %v2649_v1 = vpop.xlane.xlu2 %2648 }
 0x59d   : > { %v2703_v37 = vperm.slane %v2649_v1, %v5646_v38 }
 0x59f   : > { %v2704_v47 = vsel %vm2120_vm7, %v2703_v37, %v2702_v31  ;;  %v2673_v22 = vpop.xlane.xlu0 %2672 }
 0x5a0   : > { %v2721_v1 = vsel %vm2145_vm9, %v2704_v47, %v2720_v27  ;;  %v2715_v43 = vperm.slane %v2673_v22, %v5646_v38 }
 0x5a1   : > { %v2722_v21 = vsel %vm2147_vm10, %v2707_v45, %v2721_v1 }
 0x5a2   : > { %v2716_v47 = vsel %vm2120_vm7, %v2715_v43, %v2714_v61 }
 0x5a4   : > { %v2658_v56 = vpop.xlane.xlu2 %2657 }
 0x5a5   : > { %v2708_v23 = vperm.slane %v2658_v56, %v5468_v26 }
 0x5a7   : > { %v2710_v56 = vsel %vm2120_vm7, %v2709_v41, %v2708_v23 }
 0x5a8   : > { %v2723_v32 = vsel %vm2149_vm11, %v2710_v56, %v2722_v21 }
 0x5aa   : > { %v2679_v7 = vpop.xlane.xlu1 %2678 }
 0x5ab   : > { %v2718_v59 = vperm.slane %v2679_v7, %v5646_v38 }
 0x5ac   : > { %v2667_v46 = vpop.xlane.xlu2 %2666 }
 0x5ad   : > { %v2712_v40 = vperm.slane %v2667_v46, %v5646_v38 }
 0x5af   : > { %v2713_v37 = vsel %vm2120_vm7, %v2712_v40, %v2711_v49 }
 0x5b0   : > { %v2724_v42 = vsel %vm2151_vm12, %v2713_v37, %v2723_v32 }
 0x5b1   : > { %v2725_v46 = vsel %vm2153_vm13, %v2716_v47, %v2724_v42 }
 0x5b4   : > { %v2676_v31 = vpop.xlane.xlu2 %2675 }
 0x5b5   : > { %v2717_v5 = vperm.slane %v2676_v31, %v5468_v26 }
 0x5b7   : > { %v2719_v23 = vsel %vm2120_vm7, %v2718_v59, %v2717_v5 }
 0x5b8   : > { %v2726_v14 = vsel %vm2155_vm14, %v2719_v23, %v2725_v46  ;;  %v990_v23 = vld [vmem:[%s983_s8 + $0x30] sm:$0xf]  ;;  %v991_v46 = vld [vmem:[%s983_s8 + $0x38] sm:$0xf] }
 0x5b9   : > { %2728 = vxpose.xlu2.b32.start.end [1/1] (short) (narrow) %v2726_v14, 16  ;;  %v998_v14 = vld [vmem:[%s983_s8 + $0x70] sm:$0xf] }
 0x61b   : > { %4729 = vset.pattern.permute.xlu2 %v5465_v20 }
 0x652   : > { %v2744_v4 = vpop.trf.xlu2 }
 0x653   : > { %v2856_v48 = vadd.f32 %v5963_v2, %v2744_v4  ;;  %v1391_v4 = vrot.slane %v990_v23, 4  ;;  %v993_v23 = vld [vmem:[%s983_s8 + $0x48] sm:$0xf] }
 0x655   : > { %4803 = vrcp.f32 %v2856_v48  ;;  %v1419_v48 = vrot.slane %v991_v46, 4 }
 0x65a   : > { %v2745_v40 = vpop.trf.xlu2 }
 0x65b   : > { %v6009_v41 = vpop.eup %4803  ;;  %v2857_v38 = vadd.f32 %v2853_v34, %v2745_v40  ;;  %v1447_v40 = vrot.slane %v998_v14, 4 }
 0x65c   : > { %2860 = vxpose.xlu1.b32.start [1/2] (short) (narrow) %v6009_v41, 8  ;;  %v3028_v56 = vperm.slane %v6009_v41, 0  ;;  %v3042_v45 = vperm.slane %v6009_v41, 2  ;;  %v3077_v37 = vperm.slane %v6009_v41, 7  ;;  %v3035_v43 = vperm.slane %v6009_v41, 1 }
 0x65d   : > { %4805 = vrcp.f32 %v2857_v38  ;;  %v3056_v7 = vperm.slane %v6009_v41, 4  ;;  %v986_v38 = vld [vmem:[%s983_s8 + $0x10] sm:$0xf] }
 0x663   : > { %v6012_v26 = vpop.eup %4805 }
 0x664   : > { %2861 = vxpose.xlu1.b32.end [2/2] (short) (narrow) %v6012_v26, 8  ;;  %v3098_v21 = vperm.slane %v6012_v26, 2  ;;  %v3091_v32 = vperm.slane %v6012_v26, 1  ;;  %v3105_v61 = vperm.slane %v6012_v26, 3  ;;  %v3112_v31 = vperm.slane %v6012_v26, 4 }
 0x665   : > { %v3126_v42 = vperm.slane %v6012_v26, 6  ;;  %v3119_v5 = vperm.slane %v6012_v26, 5 }
 0x6b7   : > { %4731 = vset.pattern.permute.xlu1 %v5483_v29 }
 0x700   : > { %v6016_v27 = vpop.trf.xlu1 }
 0x701   : > { %v2931_v53 = vperm.slane %v6016_v27, 3  ;;  %v2905_v2 = vperm.slane %v6016_v27, 1  ;;  %v2892_v49 = vperm.slane %v6016_v27, 0  ;;  %v6430_v34 = vperm.slane %v6016_v27, 5 }
 0x702   : > { %v2918_v22 = vperm.slane %v6016_v27, 2  ;;  %v6431_v1 = vperm.slane %v6016_v27, 4  ;;  %v2970_v59 = vperm.slane %v6016_v27, 6  ;;  %v2983_v47 = vperm.slane %v6016_v27, 7 }
 0x703   : > { %2936 = vperm.xlu2 %4729, %v2931_v53   ;;  %2916 = vperm.xlu1 %4731, %v2905_v2  }
 0x704   : > { %2897 = vperm.xlu0 %4727, %v2892_v49  }
 0x70b   : > { %4736 = vset.pattern.permute.xlu2 %v5483_v29  ;;  %2968 = vperm.xlu1 %4731, %v6430_v34  }
 0x70c   : > { %2923 = vperm.xlu0 %4727, %v2918_v22  }
 0x713   : > { %2955 = vperm.xlu2 %4736, %v6431_v1   ;;  %4738 = vset.pattern.permute.xlu1 %v5465_v20 }
 0x714   : > { %4728 = vset.pattern.permute.xlu0 %v5483_v29 }
 0x71b   : > { %4737 = vset.pattern.permute.xlu2 %v5465_v20  ;;  %3033 = vperm.xlu1 %4738, %v3028_v56   ;;  %v1392_v56 = vsel %vm1065_vm3, %v1391_v4, %v986_v38 }
 0x71c   : > { %2929 = vperm.xlu0 %4728, %v2918_v22   ;;  %v994_v22 = vld [vmem:[%s983_s8 + $0x50] sm:$0xf] }
 0x723   : > { %3047 = vperm.xlu2 %4737, %v3042_v45   ;;  %3082 = vperm.xlu1 %4738, %v3077_v37   ;;  %v984_v37 = vld [vmem:[%s983_s8] sm:$0xf] }
 0x724   : > { %2942 = vperm.xlu0 %4728, %v2931_v53   ;;  %v987_v53 = vld [vmem:[%s983_s8 + $0x18] sm:$0xf] }
 0x725   : > { %v1420_v45 = vsel %vm1065_vm3, %v1419_v48, %v987_v53  ;;  %v995_v48 = vld [vmem:[%s983_s8 + $0x58] sm:$0xf] }
 0x72b   : > { %3040 = vperm.xlu2 %4737, %v3035_v43   ;;  %3103 = vperm.xlu1 %4738, %v3098_v21   ;;  %v985_v43 = vld [vmem:[%s983_s8 + $0x8] sm:$0xf]  ;;  %v999_v21 = vld [vmem:[%s983_s8 + $0x78] sm:$0xf] }
 0x72c   : > { %2903 = vperm.xlu0 %4728, %v2892_v49   ;;  %v989_v49 = vld [vmem:[%s983_s8 + $0x28] sm:$0xf] }
 0x72d   : > { %v1413_v4 = vrot.slane %v989_v49, 4 }
 0x733   : > { %3061 = vperm.xlu2 %4737, %v3056_v7   ;;  %3096 = vperm.xlu1 %4738, %v3091_v32   ;;  %v6052_v7 = vperm.slane %v1392_v56, %v5221_v54  ;;  %v6055_v32 = vperm.slane %v1420_v45, %v5221_v54  ;;  %v1475_v45 = vrot.slane %v999_v21, 4 }
 0x734   : > { %4730 = vset.pattern.permute.xlu0 %v5465_v20 }
 0x735   : > { %v1397_v14 = vrot.slane %v6052_v7, 4  ;;  %v1425_v38 = vrot.slane %v6055_v32, 4 }
 0x73b   : > { %3110 = vperm.xlu2 %4737, %v3105_v61   ;;  %3117 = vperm.xlu1 %4738, %v3112_v31   ;;  %v1448_v61 = vsel %vm1065_vm3, %v1447_v40, %v994_v22  ;;  %v992_v31 = vld [vmem:[%s983_s8 + $0x40] sm:$0xf]  ;;  %v1414_v40 = vsel %vm1065_vm3, %v1413_v4, %v985_v43 }
 0x73c   : > { %2910 = vperm.xlu0 %4730, %v2905_v2   ;;  %v988_v2 = vld [vmem:[%s983_s8 + $0x20] sm:$0xf] }
 0x73d   : > { %v1385_v46 = vrot.slane %v988_v2, 4  ;;  %v6071_v2 = vperm.slane %v1414_v40, %v5221_v54 }
 0x73f   : > { %v1386_v34 = vsel %vm1065_vm3, %v1385_v46, %v984_v37  ;;  %v1476_v37 = vsel %vm1065_vm3, %v1475_v45, %v995_v48 }
 0x743   : > { %3131 = vperm.xlu2 %4737, %v3126_v42   ;;  %v996_v42 = vld [vmem:[%s983_s8 + $0x60] sm:$0xf] }
 0x744   : > { %2975 = vperm.xlu0 %4730, %v2970_v59   ;;  %v1441_v53 = vrot.slane %v996_v42, 4 }
 0x746   : > { %v1442_v49 = vsel %vm1065_vm3, %v1441_v53, %v992_v31 }
 0x747   : > { %v6076_v21 = vperm.slane %v1442_v49, %v5221_v54 }
 0x74b   : > { %3124 = vperm.xlu2 %4737, %v3119_v5   ;;  %v6059_v5 = vperm.slane %v1448_v61, %v5221_v54  ;;  %v6068_v61 = vperm.slane %v1386_v34, %v5221_v54 }
 0x74c   : > { %4732 = vset.pattern.permute.xlu0 %v5483_v29 }
 0x74d   : > { %v1453_v22 = vrot.slane %v6059_v5, 4  ;;  %v1398_v43 = vsel %vm1065_vm3, %v1397_v14, %v6068_v61 }
 0x74e   : > { %v1404_v31 = vperm.slane %v1398_v43, %v5223_v55 }
 0x74f   : > { %v1454_v46 = vsel %vm1065_vm3, %v1453_v22, %v6076_v21 }
 0x750   : > { %v1460_v4 = vperm.slane %v1454_v46, %v5223_v55  ;;  %v1409_v48 = vrot.slane %v1404_v31, 4 }
 0x752   : > { %v1410_v45 = vsel %vm1065_vm3, 0, %v1409_v48 }
 0x754   : > { %2981 = vperm.xlu0 %4732, %v2970_v59   ;;  %v997_v59 = vld [vmem:[%s983_s8 + $0x68] sm:$0xf] }
 0x755   : > { %v1469_v56 = vrot.slane %v997_v59, 4  ;;  %v6087_v59 = vperm.slane %v1476_v37, %v5221_v54 }
 0x757   : > { %v1470_v42 = vsel %vm1065_vm3, %v1469_v56, %v993_v23  ;;  %v1481_v14 = vrot.slane %v6087_v59, 4 }
 0x758   : > { %v6084_v34 = vperm.slane %v1470_v42, %v5221_v54 }
 0x75a   : > { %v1482_v56 = vsel %vm1065_vm3, %v1481_v14, %v6084_v34 }
 0x75b   : > { %v1488_v49 = vperm.slane %v1482_v56, %v5223_v55 }
 0x75c   : > { %4733 = vset.pattern.permute.xlu0 %v5465_v20 }
 0x75d   : > { %v1493_v37 = vrot.slane %v1488_v49, 4 }
 0x75f   : > { %v1494_v43 = vsel %vm1065_vm3, 0, %v1493_v37  ;;  %v1523_v37 = vpack.i.b16 %v1488_v49, %v1460_v4 }
 0x760   : > { %v1531_v35 = vshrl.u32 %v1494_v43, 16 }
 0x764   : > { %2988 = vperm.xlu0 %4733, %v2983_v47  }
 0x76c   : > { %4734 = vset.pattern.permute.xlu0 %v5483_v29  ;;  %v1426_v29 = vsel %vm1065_vm3, %v1425_v38, %v6071_v2  ;;  %v1465_v38 = vrot.slane %v1460_v4, 4 }
 0x76d   : > { %v1432_v23 = vperm.slane %v1426_v29, %v5223_v55  ;;  %v1506_v29 = vshrl.u32 %v1410_v45, 16 }
 0x76e   : > { %v1466_v22 = vsel %vm1065_vm3, 0, %v1465_v38 }
 0x76f   : > { %v1437_v53 = vrot.slane %v1432_v23, 4  ;;  %v1529_v1 = vpack.i.b16 %v1494_v43, %v1466_v22  ;;  %v1530_v57 = vshrl.u32 %v1466_v22, 16  ;;  %v1499_v60 = vpack.i.b16 %v1432_v23, %v1404_v31 }
 0x771   : > { %v1438_v40 = vsel %vm1065_vm3, 0, %v1437_v53  ;;  %v3230_v9 = vunpack.c.l.b16 %v1529_v1  ;;  %v1532_v48 = vpack.i.b16 %v1531_v35, %v1530_v57  ;;  %v6452_v57 = vperm.slane %v6016_v27, 5 }
 0x772   : > { %v1505_v42 = vpack.i.b16 %v1438_v40, %v1410_v45  ;;  %v1507_v46 = vshrl.u32 %v1438_v40, 16  ;;  %v3177_v45 = vunpack.c.l.b16 %v1499_v60  ;;  %v3178_v40 = vunpack.c.l.b16 %v1523_v37  ;;  %v2937_v60 = vpop.permute.xlu2 %2936 }
 0x773   : > { %v3256_v56 = vunpack.c.l.b16 %v1532_v48  ;;  %v1501_v1 = vshrl.u32 %v1432_v23, 16 }
 0x774   : > { %2994 = vperm.xlu0 %4734, %v2983_v47   ;;  %v3229_v54 = vunpack.c.l.b16 %v1505_v42  ;;  %v1508_v14 = vpack.i.b16 %v1507_v46, %v1506_v29  ;;  %v6451_v42 = vperm.slane %v6016_v27, 4  ;;  %v3179_v22 = vpack.c.b16 %v3178_v40, %v3177_v45 }
 0x775   : > { %v1524_v29 = vshrl.u32 %v1460_v4, 16  ;;  %v1525_v46 = vshrl.u32 %v1488_v49, 16 }
 0x776   : > { %v3255_v18 = vunpack.c.l.b16 %v1508_v14  ;;  %v2898_v53 = vpop.permute.xlu0 %2897  ;;  %v3231_v47 = vpack.c.b16 %v3230_v9, %v3229_v54  ;;  %3191 = vmatpush.bf16.msra.mxu0 %v3179_v22  ;;  %v3070_v22 = vperm.slane %v6009_v41, 6 }
 0x777   : > { %v2996_v49 = vmul.f32 %v5794_v28, %v2898_v53  ;;  %v3063_v53 = vperm.slane %v6009_v41, 5 }
 0x778   : > { %3243 = vmatpush.bf16.msra.mxu2 %v3231_v47  ;;  %v3257_v38 = vpack.c.b16 %v3256_v56, %v3255_v18  ;;  %v1500_v18 = vshrl.u32 %v1404_v31, 16  ;;  %v3049_v47 = vperm.slane %v6009_v41, 3  ;;  %v1526_v56 = vpack.i.b16 %v1525_v46, %v1524_v29 }
 0x779   : > { %v1483_v29 = vrot.slane %v6084_v34, 4 }
 0x77a   : > { %3269 = vmatpush.bf16.msra.mxu3 %v3257_v38  ;;  %v1502_v48 = vpack.i.b16 %v1501_v1, %v1500_v18  ;;  %v3002_v38 = vmul.f32 %v5834_v25, %v2937_v60  ;;  %v3204_v45 = vunpack.c.l.b16 %v1526_v56  ;;  %v1427_v18 = vrot.slane %v6071_v2, 4  ;;  %v2917_v56 = vpop.permute.xlu1 %2916 }
 0x77b   : > { %v1455_v1 = vrot.slane %v6076_v21, 4  ;;  %v1484_v21 = vsel %vm1065_vm3, %v6087_v59, %v1483_v29 }
 0x77c   : > { %4735 = vset.pattern.permute.xlu0 %v5465_v20  ;;  %v3203_v27 = vunpack.c.l.b16 %v1502_v48  ;;  %v3018_v31 = vpack.c.bf16 %v3002_v38, %v3002_v38  ;;  %v6140_v34 = vperm.slane %v1484_v21, %v5223_v55 }
 0x77e   : > { %v2924_v43 = vpop.permute.xlu0 %2923  ;;  %v3252_v25 = vunpack.c.l.b16 %v3018_v31 }
 0x77f   : > { %v3000_v35 = vmul.f32 %v5827_v24, %v2924_v43 }
 0x781   : > { %v3016_v54 = vpack.c.bf16 %v3000_v35, %v3000_v35 }
 0x783   : > { %v3226_v24 = vunpack.c.l.b16 %v3016_v54 }
 0x784   : > { %2949 = vperm.xlu0 %4735, %v6451_v42  }
 0x78c   : > { %2962 = vperm.xlu0 %4735, %v6452_v57   ;;  %v3012_v57 = vpack.c.bf16 %v2996_v49, %v2996_v49 }
 0x78e   : > { %v2930_v20 = vpop.permute.xlu0 %2929  ;;  %v3174_v28 = vunpack.c.l.b16 %v3012_v57 }
 0x78f   : > { %v3001_v9 = vmul.f32 %v5920_v17, %v2930_v20  ;;  %v3205_v17 = vpack.c.b16 %v3204_v45, %v3203_v27  ;;  %v3084_v45 = vperm.slane %v6012_v26, 0 }
 0x791   : > { %v3017_v14 = vpack.c.bf16 %v3001_v9, %v3001_v9  ;;  %3217 = vmatpush.bf16.msra.mxu1 %v3205_v17 }
 0x793   : > { %v3227_v37 = vunpack.c.l.b16 %v3017_v14  ;;  %v1456_v14 = vsel %vm1065_vm3, %v6059_v5, %v1455_v1 }
 0x794   : > { %3054 = vperm.xlu0 %4735, %v3049_v47   ;;  %v6135_v41 = vperm.slane %v1456_v14, %v5223_v55  ;;  %v1495_v47 = vrot.slane %v6140_v34, 4 }
 0x795   : > { %v3228_v40 = vpack.c.b16 %v3227_v37, %v3226_v24 }
 0x796   : > { %v2943_v42 = vpop.permute.xlu0 %2942  ;;  %v1467_v48 = vrot.slane %v6135_v41, 4  ;;  %v1496_v37 = vsel %vm1065_vm3, 0, %v1495_v47 }
 0x797   : > { %v3003_v23 = vmul.f32 %v5847_v12, %v2943_v42  ;;  %4415 = vmatmul.msk.bf16.vlgmr.msra.gmra.mxu2 %vm2052_vm5, %v3228_v40  ;;  %v1399_v12 = vrot.slane %v6068_v61, 4  ;;  %v2999_v42 = vmul.f32 %v5815_v16, %v2917_v56  ;;  %v1543_v29 = vshrl.u32 %v1496_v37, 16 }
 0x798   : > { %v1468_v59 = vsel %vm1065_vm3, 0, %v1467_v48  ;;  %v1535_v56 = vpack.i.b16 %v6140_v34, %v6135_v41 }
 0x799   : > { %v3019_v4 = vpack.c.bf16 %v3003_v23, %v3003_v23  ;;  %v1400_v46 = vsel %vm1065_vm3, %v6052_v7, %v1399_v12  ;;  %v1541_v40 = vpack.i.b16 %v1496_v37, %v1468_v59  ;;  %v3015_v49 = vpack.c.bf16 %v2999_v42, %v2999_v42 }
 0x79a   : > { %v6129_v61 = vperm.slane %v1400_v46, %v5223_v55 }
 0x79b   : > { %v3253_v43 = vunpack.c.l.b16 %v3019_v4  ;;  %v3334_v31 = vunpack.c.l.b16 %v1541_v40  ;;  %v1536_v40 = vshrl.u32 %v6135_v41, 16 }
 0x79c   : > { %3075 = vperm.xlu0 %4735, %v3070_v22  }
 0x79d   : > { %v3254_v35 = vpack.c.b16 %v3253_v43, %v3252_v25  ;;  %v3133_v43 = vperm.slane %v6012_v26, 7 }
 0x79e   : > { %v2904_v54 = vpop.permute.xlu0 %2903 }
 0x79f   : > { %v2997_v20 = vmul.f32 %v5801_v3, %v2904_v54  ;;  %4416 = vmatmul.msk.bf16.vlgmr.msra.gmra.mxu3 %vm2052_vm5, %v3254_v35  ;;  %v1428_v3 = vsel %vm1065_vm3, %v6055_v32, %v1427_v18  ;;  %v1411_v32 = vrot.slane %v6129_v61, 4  ;;  %v3201_v35 = vunpack.c.l.b16 %v3015_v49 }
 0x7a0   : > { %v6132_v2 = vperm.slane %v1428_v3, %v5223_v55 }
 0x7a1   : > { %v3013_v9 = vpack.c.bf16 %v2997_v20, %v2997_v20  ;;  %v1412_v38 = vsel %vm1065_vm3, 0, %v1411_v32  ;;  %v4541_v20 = vld [vmem:[#allocation4 + $0x10] sm:$0xff]  ;;  %v2956_v32 = vpop.permute.xlu2 %2955 }
 0x7a2   : > { %v1439_v5 = vrot.slane %v6132_v2, 4  ;;  %v1511_v47 = vpack.i.b16 %v6132_v2, %v6129_v61 }
 0x7a3   : > { %v3175_v60 = vunpack.c.l.b16 %v3013_v9 }
 0x7a4   : > { %3068 = vperm.xlu0 %4735, %v3063_v53   ;;  %v1440_v24 = vsel %vm1065_vm3, 0, %v1439_v5  ;;  %v1542_v53 = vshrl.u32 %v1468_v59, 16 }
 0x7a5   : > { %v3176_v7 = vpack.c.b16 %v3175_v60, %v3174_v28  ;;  %v1517_v27 = vpack.i.b16 %v1440_v24, %v1412_v38  ;;  %v1519_v28 = vshrl.u32 %v1440_v24, 16  ;;  %v3282_v24 = vunpack.c.l.b16 %v1535_v56 }
 0x7a6   : > { %v1544_v46 = vpack.i.b16 %v1543_v29, %v1542_v53 }
 0x7a7   : > { %4413 = vmatmul.msk.bf16.vlgmr.msra.gmra.mxu0 %vm2052_vm5, %v3176_v7  ;;  %v3333_v17 = vunpack.c.l.b16 %v1517_v27  ;;  %v1512_v27 = vshrl.u32 %v6129_v61, 16 }
 0x7a8   : > { %v3360_v7 = vunpack.c.l.b16 %v1544_v46 }
 0x7a9   : > { %v3335_v4 = vpack.c.b16 %v3334_v31, %v3333_v17  ;;  %v1537_v17 = vshrl.u32 %v6140_v34, 16  ;;  %v4540_v34 = vld [vmem:[#allocation4 + $0x8] sm:$0xff] }
 0x7ab   : > { %3347 = vmatpush.bf16.msrb.mxu2 %v3335_v4  ;;  %v1538_v31 = vpack.i.b16 %v1537_v17, %v1536_v40 }
 0x7ac   : > { %3089 = vperm.xlu0 %4735, %v3084_v45   ;;  %v1513_v45 = vshrl.u32 %v6132_v2, 16 }
 0x7ad   : > { %v3308_v4 = vunpack.c.l.b16 %v1538_v31 }
 0x7ae   : > { %v2911_v23 = vpop.permute.xlu0 %2910 }
 0x7af   : > { %v2998_v22 = vmul.f32 %v5914_v62, %v2911_v23  ;;  %3440 = vmatpush.bf16.msra.mxu2 %v4541_v20  ;;  %v1518_v62 = vshrl.u32 %v1412_v38, 16  ;;  %v3281_v38 = vunpack.c.l.b16 %v1511_v47 }
 0x7b1   : > { %v3014_v25 = vpack.c.bf16 %v2998_v22, %v2998_v22  ;;  %v1520_v60 = vpack.i.b16 %v1519_v28, %v1518_v62  ;;  %v3283_v37 = vpack.c.b16 %v3282_v24, %v3281_v38  ;;  %v4547_v38 = vld [vmem:[#allocation4 + $0x40] sm:$0xff] }
 0x7b3   : > { %v3200_v57 = vunpack.c.l.b16 %v3014_v25  ;;  %v3359_v21 = vunpack.c.l.b16 %v1520_v60  ;;  %3295 = vmatpush.bf16.msrb.mxu0 %v3283_v37  ;;  %v4542_v25 = vld [vmem:[#allocation4 + $0x18] sm:$0xff] }
 0x7b4   : > { %3138 = vperm.xlu0 %4735, %v3133_v43  }
 0x7b5   : > { %v3202_v54 = vpack.c.b16 %v3201_v35, %v3200_v57  ;;  %v3361_v48 = vpack.c.b16 %v3360_v7, %v3359_v21  ;;  %v4539_v35 = vld [vmem:[#allocation4] sm:$0xff]  ;;  %v4549_v21 = vld [vmem:[#allocation4 + $0x50] sm:$0xff] }
 0x7b6   : > { %v2976_v16 = vpop.permute.xlu0 %2975 }
 0x7b7   : > { %4414 = vmatmul.msk.bf16.vlgmr.msra.gmra.mxu1 %vm2052_vm5, %v3202_v54  ;;  %v3008_v9 = vmul.f32 %v5870_v11, %v2976_v16  ;;  %3373 = vmatpush.bf16.msrb.mxu3 %v3361_v48  ;;  %v3048_v11 = vpop.permute.xlu2 %3047  ;;  %v4545_v16 = vld [vmem:[#allocation4 + $0x30] sm:$0xff] }
 0x7b8   : > { %3396 = vmatpush.bf16.msra.mxu0 %v4539_v35 }
 0x7b9   : > { %v3024_v12 = vpack.c.bf16 %v3008_v9, %v3008_v9  ;;  %v3005_v9 = vmul.f32 %v5864_v36, %v2956_v32 }
 0x7bb   : > { %v3330_v3 = vunpack.c.l.b16 %v3024_v12  ;;  %3462 = vmatpush.bf16.msra.mxu3 %v4542_v25 }
 0x7bf   : > { %v3041_v56 = vpop.permute.xlu2 %3040 }
 0x7c6   : > { %v2982_v18 = vpop.permute.xlu0 %2981 }
 0x7c7   : > { %v3009_v1 = vmul.f32 %v5906_v10, %v2982_v18  ;;  %v3142_v10 = vmul.f32 %v5737_v44, %v3048_v11  ;;  %v1514_v44 = vpack.i.b16 %v1513_v45, %v1512_v27  ;;  %v3021_v18 = vpack.c.bf16 %v3005_v9, %v3005_v9 }
 0x7c8   : > { %v3141_v45 = vmul.f32 %v5873_v15, %v3041_v56 }
 0x7c9   : > { %v3025_v26 = vpack.c.bf16 %v3009_v1, %v3009_v1  ;;  %v3158_v59 = vpack.c.bf16 %v3142_v10, %v3142_v10  ;;  %v3307_v23 = vunpack.c.l.b16 %v1514_v44  ;;  %v2969_v1 = vpop.permute.xlu1 %2968  ;;  %v3279_v28 = vunpack.c.l.b16 %v3021_v18  ;;  %v4550_v10 = vld [vmem:[#allocation4 + $0x58] sm:$0xff]  ;;  %v3062_v44 = vpop.permute.xlu2 %3061 }
 0x7ca   : > { %v3007_v53 = vmul.f32 %v5931_v0, %v2969_v1  ;;  %v3144_v31 = vmul.f32 %v5881_v50, %v3062_v44  ;;  %v4552_v50 = vld [vmem:[#allocation4 + $0x68] sm:$0xff] }
 0x7cb   : > { %v3331_v14 = vunpack.c.l.b16 %v3025_v26  ;;  %v3309_v22 = vpack.c.b16 %v3308_v4, %v3307_v23  ;;  %v4543_v26 = vld [vmem:[#allocation4 + $0x20] sm:$0xff]  ;;  %v6456_v1 = vld [vmem:[#allocation12_spill] sm:$0xff] }
 0x7cd   : > { %v3332_v5 = vpack.c.b16 %v3331_v14, %v3330_v3  ;;  %3321 = vmatpush.bf16.msrb.mxu1 %v3309_v22  ;;  %v3023_v3 = vpack.c.bf16 %v3007_v53, %v3007_v53  ;;  %v3160_v22 = vpack.c.bf16 %v3144_v31, %v3144_v31  ;;  %v6457_v53 = vld [vmem:[#allocation10_spill] sm:$0xff] }
 0x7cf   : > { %4419 = vmatmul.msk.bf16.vlgmr.msrb.gmra.mxu2 %vm2052_vm5, %v3332_v5  ;;  %v3305_v7 = vunpack.c.l.b16 %v3023_v3 }
 0x7d0   : > { %3528 = vmatpush.bf16.msrb.mxu2 %v4545_v16  ;;  %v6454_v16 = vld [vmem:[#allocation11_spill] sm:$0xff] }
 0x7d1   : > { %3418 = vmatpush.bf16.msra.mxu1 %v4540_v34  ;;  %v3034_v48 = vpop.permute.xlu1 %3033 }
 0x7d6   : > { %v2989_v42 = vpop.permute.xlu0 %2988 }
 0x7d7   : > { %v3010_v49 = vmul.f32 %v5939_v58, %v2989_v42  ;;  %v4546_v58 = vld [vmem:[#allocation4 + $0x38] sm:$0xff]  ;;  %v3157_v42 = vpack.c.bf16 %v3141_v45, %v3141_v45 }
 0x7d9   : > { %v3026_v61 = vpack.c.bf16 %v3010_v49, %v3010_v49  ;;  %v3083_v27 = vpop.permute.xlu1 %3082  ;;  %v4551_v49 = vld [vmem:[#allocation4 + $0x60] sm:$0xff] }
 0x7da   : > { %v3147_v17 = vmul.f32 %v5748_v52, %v3083_v27  ;;  %v3111_v52 = vpop.permute.xlu2 %3110 }
 0x7db   : > { %v3356_v57 = vunpack.c.l.b16 %v3026_v61 }
 0x7dc   : > { %v3163_v23 = vpack.c.bf16 %v3147_v17, %v3147_v17 }
 0x7df   : > { %4435 = vmatmul.msk.bf16.vlgmr.msra.gmra.mxu2 %vm2052_vm5, %v3158_v59 }
 0x7e0   : > { %3616 = vmatpush.bf16.msra.mxu2 %v4549_v21 }
 0x7e1   : > { %v3104_v4 = vpop.permute.xlu1 %3103 }
 0x7e2   : > { %v3150_v25 = vmul.f32 %v5764_v8, %v3104_v4 }
 0x7e6   : > { %v2995_v43 = vpop.permute.xlu0 %2994 }
 0x7e7   : > { %v3011_v2 = vmul.f32 %v5933_v6, %v2995_v43  ;;  %v3166_v43 = vpack.c.bf16 %v3150_v25, %v3150_v25 }
 0x7e9   : > { %v3027_v41 = vpack.c.bf16 %v3011_v2, %v3011_v2  ;;  %v3151_v2 = vmul.f32 %v5898_v39, %v3111_v52 }
 0x7eb   : > { %v3357_v54 = vunpack.c.l.b16 %v3027_v41  ;;  %v3167_v34 = vpack.c.bf16 %v3151_v2, %v3151_v2 }
 0x7ed   : > { %v3358_v20 = vpack.c.b16 %v3357_v54, %v3356_v57  ;;  %v6453_v57 = vld [vmem:[#allocation8_spill] sm:$0xff]  ;;  %v3132_v54 = vpop.permute.xlu2 %3131 }
 0x7ef   : > { %4420 = vmatmul.msk.bf16.vlgmr.msrb.gmra.mxu3 %vm2052_vm5, %v3358_v20  ;;  %v3097_v20 = vpop.permute.xlu1 %3096 }
 0x7f0   : > { %3550 = vmatpush.bf16.msrb.mxu3 %v4546_v58  ;;  %v3154_v58 = vmul.f32 %v6454_v16, %v3132_v54 }
 0x7f2   : > { %v3170_v9 = vpack.c.bf16 %v3154_v58, %v3154_v58 }
 0x7f6   : > { %v2950_v12 = vpop.permute.xlu0 %2949 }
 0x7f7   : > { %v3004_v6 = vmul.f32 %v5926_v33, %v2950_v12  ;;  %v4544_v33 = vld [vmem:[#allocation4 + $0x28] sm:$0xff]  ;;  %v6455_v12 = vld [vmem:[#allocation9_spill] sm:$0xff] }
 0x7f8   : > { %v3149_v39 = vmul.f32 %v6455_v12, %v3097_v20 }
 0x7f9   : > { %v3020_v62 = vpack.c.bf16 %v3004_v6, %v3004_v6 }
 0x7fa   : > { %v3165_v6 = vpack.c.bf16 %v3149_v39, %v3149_v39  ;;  %v6229_v39 = vld [vmem:[%s6221_s10] sm:$0xf] }
 0x7fb   : > { %v3278_v29 = vunpack.c.l.b16 %v3020_v62 }
 0x7fd   : > { %v3280_v60 = vpack.c.b16 %v3279_v28, %v3278_v29  ;;  %v3118_v28 = vpop.permute.xlu1 %3117 }
 0x7fe   : > { %v2963_v46 = vpop.permute.xlu0 %2962  ;;  %v3152_v29 = vmul.f32 %v6457_v53, %v3118_v28 }
 0x7ff   : > { %v3006_v14 = vmul.f32 %v5883_v63, %v2963_v46  ;;  %4417 = vmatmul.msk.bf16.vlgmr.msrb.gmra.mxu0 %vm2052_vm5, %v3280_v60  ;;  %v3140_v63 = vmul.f32 %v5735_v30, %v3034_v48  ;;  %v4548_v30 = vld [vmem:[#allocation4 + $0x48] sm:$0xff]  ;;  %v3125_v46 = vpop.permute.xlu2 %3124 }
 0x800   : > { %3484 = vmatpush.bf16.msrb.mxu0 %v4543_v26  ;;  %v3168_v60 = vpack.c.bf16 %v3152_v29, %v3152_v29 }
 0x801   : > { %v3022_v36 = vpack.c.bf16 %v3006_v14, %v3006_v14  ;;  %v3156_v24 = vpack.c.bf16 %v3140_v63, %v3140_v63  ;;  %v6458_v14 = vld [vmem:[#allocation13_spill] sm:$0xff] }
 0x803   : > { %v3304_v32 = vunpack.c.l.b16 %v3022_v36  ;;  %v3153_v36 = vmul.f32 %v6458_v14, %v3125_v46  ;;  %v6241_v14 = vstv %s3924_s9 }
 0x805   : > { %v3306_v5 = vpack.c.b16 %v3305_v7, %v3304_v32  ;;  %v3169_v21 = vpack.c.bf16 %v3153_v36, %v3153_v36  ;;  %v3974_v36 = vunpack.c.l.bf16 %v6229_v39 }
 0x806   : > { %v3055_v11 = vpop.permute.xlu0 %3054 }
 0x807   : > { %v3143_v0 = vmul.f32 %v5746_v51, %v3055_v11  ;;  %4418 = vmatmul.msk.bf16.vlgmr.msrb.gmra.mxu1 %vm2052_vm5, %v3306_v5  ;;  %v4553_v51 = vld [vmem:[#allocation4 + $0x70] sm:$0xff] }
 0x808   : > { %3506 = vmatpush.bf16.msrb.mxu1 %v4544_v33 }
 0x809   : > { %v3159_v47 = vpack.c.bf16 %v3143_v0, %v3143_v0 }
 0x80b   : > { %4440 = vmatmul.msk.bf16.vlgmr.msra.gmra.mxu3 %vm2052_vm5, %v3159_v47 }
 0x80c   : > { %3638 = vmatpush.bf16.msra.mxu3 %v4550_v10 }
 0x80e   : > { %v3076_v59 = vpop.permute.xlu0 %3075 }
 0x80f   : > { %v3146_v37 = vmul.f32 %v5755_v13, %v3076_v59  ;;  %4425 = vmatmul.msk.bf16.vlgmr.msra.gmra.mxu0 %vm2052_vm5, %v3156_v24  ;;  %v4554_v13 = vld [vmem:[#allocation4 + $0x78] sm:$0xff] }
 0x810   : > { %3572 = vmatpush.bf16.msra.mxu0 %v4547_v38 }
 0x811   : > { %v3162_v40 = vpack.c.bf16 %v3146_v37, %v3146_v37 }
 0x813   : > { %4455 = vmatmul.msk.bf16.vlgmr.msrb.gmra.mxu2 %vm2052_vm5, %v3162_v40 }
 0x814   : > { %3704 = vmatpush.bf16.msrb.mxu2 %v4553_v51 }
 0x816   : > { %v3069_v15 = vpop.permute.xlu0 %3068 }
 0x817   : > { %4430 = vmatmul.msk.bf16.vlgmr.msra.gmra.mxu1 %vm2052_vm5, %v3157_v42  ;;  %v3145_v61 = vmul.f32 %v5891_v19, %v3069_v15  ;;  %v6459_v42 = vld [vmem:[#allocation7_spill] sm:$0xff] }
 0x818   : > { %3594 = vmatpush.bf16.msra.mxu1 %v4548_v30 }
 0x819   : > { %v3161_v41 = vpack.c.bf16 %v3145_v61, %v3145_v61 }
 0x81a   : > { %v3245_v3 = vpop.f32.mrf.mxu2 }
 0x81b   : > { %4460 = vmatmul.msk.bf16.vlgmr.msrb.gmra.mxu3 %vm2052_vm5, %v3163_v23  ;;  %v3736_v59 = vpack.c.bf16 %v3245_v3, %v3245_v3 }
 0x81c   : > { %3726 = vmatpush.bf16.msrb.mxu3 %v4554_v13 }
 0x81e   : > { %v3090_v35 = vpop.permute.xlu0 %3089 }
 0x81f   : > { %4445 = vmatmul.msk.bf16.vlgmr.msrb.gmra.mxu0 %vm2052_vm5, %v3160_v22  ;;  %v3148_v8 = vmul.f32 %v6453_v57, %v3090_v35 }
 0x820   : > { %3660 = vmatpush.bf16.msrb.mxu0 %v4551_v49 }
 0x821   : > { %v3164_v19 = vpack.c.bf16 %v3148_v8, %v3148_v8 }
 0x822   : > { %v3247_v7 = vpop.f32.mrf.mxu2  ;;  %v3271_v48 = vpop.f32.mrf.mxu3 }
 0x823   : > { %4475 = vmatmul.msk.bf16.vlgmr.msra.gmra.mxu2 %vm2052_vm5, %v3166_v43  ;;  %v3738_v15 = vpack.c.bf16 %v3271_v48, %v3271_v48  ;;  %v3737_v22 = vpack.c.bf16 %v3247_v7, %v3247_v7 }
 0x824   : > { %v3193_v11 = vpop.f32.mrf.mxu0 }
 0x825   : > { %v3732_v44 = vpack.c.bf16 %v3193_v11, %v3193_v11 }
 0x826   : > { %v3139_v18 = vpop.permute.xlu0 %3138 }
 0x827   : > { %4450 = vmatmul.msk.bf16.vlgmr.msrb.gmra.mxu1 %vm2052_vm5, %v3161_v41  ;;  %v3155_v62 = vmul.f32 %v6456_v1, %v3139_v18 }
 0x828   : > { %3682 = vmatpush.bf16.msrb.mxu1 %v4552_v50 }
 0x829   : > { %v3171_v26 = vpack.c.bf16 %v3155_v62, %v3155_v62  ;;  %v6233_v62 = vld [vmem:[%s6221_s10 + $0x8] sm:$0xf] }
 0x82a   : > { %v3273_v10 = vpop.f32.mrf.mxu3  ;;  %v3975_v11 = vunpack.c.l.bf16 %v6233_v62 }
 0x82b   : > { %4480 = vmatmul.msk.bf16.vlgmr.msra.gmra.mxu3 %vm2052_vm5, %v3167_v34  ;;  %v3739_v12 = vpack.c.bf16 %v3273_v10, %v3273_v10 }
 0x82c   : > { %v3195_v56 = vpop.f32.mrf.mxu0 }
 0x82d   : > { %v3733_v53 = vpack.c.bf16 %v3195_v56, %v3195_v56 }
 0x82f   : > { %4465 = vmatmul.msk.bf16.vlgmr.msra.gmra.mxu0 %vm2052_vm5, %v3164_v19 }
 0x833   : > { %4495 = vmatmul.msk.bf16.vlgmr.msrb.gmra.mxu2 %vm2052_vm5, %v3170_v9 }
 0x834   : > { %v3219_v63 = vpop.f32.mrf.mxu1 }
 0x835   : > { %v3734_v16 = vpack.c.bf16 %v3219_v63, %v3219_v63 }
 0x837   : > { %4470 = vmatmul.msk.bf16.vlgmr.msra.gmra.mxu1 %vm2052_vm5, %v3165_v6 }
 0x83b   : > { %4500 = vmatmul.msk.bf16.vlgmr.msrb.gmra.mxu3 %vm2052_vm5, %v3171_v26 }
 0x83c   : > { %v6211_v51 = vpop.f32.mrf.mxu1 }
 0x83d   : > { %v3735_v29 = vpack.c.bf16 %v6211_v51, %v6211_v51 }
 0x83f   : > { %4485 = vmatmul.msk.bf16.vlgmr.msrb.gmra.mxu0 %vm2052_vm5, %v3168_v60 }
 0x847   : > { %4490 = vmatmul.msk.bf16.vlgmr.msrb.gmra.mxu1 %vm2052_vm5, %v3169_v21  ;;  %v6245_v21 = vld [vmem:[%s6221_s10 + $0x10] sm:$0xf] }
 0x852   : > { %v3349_v32 = vpop.f32.mrf.mxu2 }
 0x853   : > { %v3744_v47 = vpack.c.bf16 %v3349_v32, %v3349_v32 }
 0x855   : > { %v3754_v24 = vrot.slane %v3744_v47, 4 }
 0x857   : > { %v3755_v37 = vsel %vm1065_vm3, %v3754_v24, %v3736_v59  ;;  %v3976_v59 = vunpack.c.l.bf16 %v6245_v21 }
 0x858   : > { %v3759_v17 = vperm.slane %v3755_v37, %v6459_v42 }
 0x85a   : > { %v3351_v33 = vpop.f32.mrf.mxu2  ;;  %v3760_v25 = vrot.slane %v3759_v17, 4 }
 0x85b   : > { %v3745_v45 = vpack.c.bf16 %v3351_v33, %v3351_v33 }
 0x85d   : > { %v3810_v23 = vrot.slane %v3745_v45, 4 }
 0x85f   : > { %v3811_v50 = vsel %vm1065_vm3, %v3810_v23, %v3737_v22 }
 0x860   : > { %v6226_v58 = vperm.slane %v3811_v50, %v6459_v42 }
 0x862   : > { %v6208_v5 = vpop.f32.mrf.mxu2  ;;  %v3816_v46 = vrot.slane %v6226_v58, 4 }
 0x86a   : > { %v3444_v0 = vpop.f32.mrf.mxu2 }
 0x872   : > { %v3375_v38 = vpop.f32.mrf.mxu3 }
 0x873   : > { %v3746_v27 = vpack.c.bf16 %v3375_v38, %v3375_v38 }
 0x875   : > { %v3782_v13 = vrot.slane %v3746_v27, 4 }
 0x877   : > { %v3783_v43 = vsel %vm1065_vm3, %v3782_v13, %v3738_v15 }
 0x878   : > { %v3787_v20 = vperm.slane %v3783_v43, %v6459_v42 }
 0x87a   : > { %v3377_v4 = vpop.f32.mrf.mxu3  ;;  %v3788_v26 = vrot.slane %v3787_v20, 4 }
 0x87b   : > { %v3747_v61 = vpack.c.bf16 %v3377_v4, %v3377_v4 }
 0x87c   : > { %v3297_v40 = vpop.f32.mrf.mxu0 }
 0x87d   : > { %v3740_v30 = vpack.c.bf16 %v3297_v40, %v3297_v40  ;;  %v3838_v19 = vrot.slane %v3747_v61, 4 }
 0x87f   : > { %v3748_v31 = vrot.slane %v3740_v30, 4  ;;  %v3839_v3 = vsel %vm1065_vm3, %v3838_v19, %v3739_v12 }
 0x880   : > { %v6256_v38 = vperm.slane %v3839_v3, %v6459_v42 }
 0x881   : > { %v3749_v49 = vsel %vm1065_vm3, %v3748_v31, %v3732_v44  ;;  %v933_v44 = vld [vmem:[%s6221_s10 + $0x18] sm:$0xf] }
 0x882   : > { %v3753_v52 = vperm.slane %v3749_v49, %v6459_v42  ;;  %v3844_v50 = vrot.slane %v6256_v38, 4 }
 0x884   : > { %v3299_v2 = vpop.f32.mrf.mxu0  ;;  %v3323_v41 = vpop.f32.mrf.mxu1  ;;  %v3761_v35 = vsel %vm1065_vm3, %v3760_v25, %v3753_v52  ;;  %v3762_v34 = vrot.slane %v3753_v52, 4 }
 0x885   : > { %v3741_v57 = vpack.c.bf16 %v3299_v2, %v3299_v2  ;;  %v3742_v8 = vpack.c.bf16 %v3323_v41, %v3323_v41  ;;  %v3767_v54 = vperm.slane %v3761_v35, %v5223_v55  ;;  %v3977_v41 = vunpack.c.l.bf16 %v933_v44 }
 0x886   : > { %v3763_v28 = vsel %vm1065_vm3, %v3759_v17, %v3762_v34 }
 0x887   : > { %v3776_v9 = vrot.slane %v3742_v8, 4  ;;  %v3804_v18 = vrot.slane %v3741_v57, 4  ;;  %v3772_v1 = vrot.slane %v3767_v54, 4  ;;  %v6250_v0 = vperm.slane %v3763_v28, %v5223_v55 }
 0x888   : > { %v3864_v37 = vshrl.u32 %v3767_v54, 16 }
 0x889   : > { %v3777_v6 = vsel %vm1065_vm3, %v3776_v9, %v3734_v16  ;;  %v3805_v10 = vsel %vm1065_vm3, %v3804_v18, %v3733_v53  ;;  %v3773_v56 = vsel %vm1065_vm3, 0, %v3772_v1  ;;  %v3774_v31 = vrot.slane %v6250_v0, 4 }
 0x88a   : > { %v3781_v60 = vperm.slane %v3777_v6, %v6459_v42  ;;  %v6261_v17 = vperm.slane %v3805_v10, %v6459_v42  ;;  %v3872_v13 = vshrl.u32 %v3773_v56, 16 }
 0x88c   : > { %v3790_v7 = vrot.slane %v3781_v60, 4  ;;  %v3325_v32 = vpop.f32.mrf.mxu1  ;;  %v3398_v33 = vpop.f32.mrf.mxu0  ;;  %v3789_v48 = vsel %vm1065_vm3, %v3788_v26, %v3781_v60  ;;  %v3817_v34 = vsel %vm1065_vm3, %v3816_v46, %v6261_v17  ;;  %v936_v26 = vld [vmem:[%s6221_s10 + $0x30] sm:$0xf] }
 0x88d   : > { %v3743_v63 = vpack.c.bf16 %v3325_v32, %v3325_v32  ;;  %v3795_v47 = vperm.slane %v3789_v48, %v5223_v55 }
 0x88e   : > { %v3464_v24 = vpop.f32.mrf.mxu3  ;;  %v3791_v27 = vsel %vm1065_vm3, %v3787_v20, %v3790_v7 }
 0x88f   : > { %v3832_v51 = vrot.slane %v3743_v63, 4  ;;  %v3862_v45 = vpack.i.b16 %v3795_v47, %v3767_v54  ;;  %v3800_v40 = vrot.slane %v3795_v47, 4  ;;  %v3865_v30 = vshrl.u32 %v3795_v47, 16 }
 0x890   : > { %v6266_v23 = vperm.slane %v3791_v27, %v5223_v55 }
 0x891   : > { %v3833_v4 = vsel %vm1065_vm3, %v3832_v51, %v3735_v29  ;;  %v3925_v15 = vunpack.c.l.bf16 %v3862_v45  ;;  %v3801_v49 = vsel %vm1065_vm3, 0, %v3800_v40  ;;  %v3866_v22 = vpack.i.b16 %v3865_v30, %v3864_v37  ;;  %v937_v51 = vld [vmem:[%s6221_s10 + $0x38] sm:$0xf] }
 0x892   : > { %v6271_v25 = vperm.slane %v3833_v4, %v6459_v42  ;;  %v3870_v52 = vpack.i.b16 %v3801_v49, %v3773_v56  ;;  %v3873_v43 = vshrl.u32 %v3801_v49, 16  ;;  %v3802_v61 = vrot.slane %v6266_v23, 4 }
 0x893   : > { %v3941_v2 = vadd.f32 %v3925_v15, %v3398_v33  ;;  %v3926_v35 = vunpack.c.l.bf16 %v3866_v22  ;;  %v3775_v42 = vsel %vm1065_vm3, 0, %v3774_v31  ;;  %v3878_v60 = vpack.i.b16 %v6266_v23, %v6250_v0 }
 0x894   : > { %v3874_v57 = vpack.i.b16 %v3873_v43, %v3872_v13  ;;  %v3927_v8 = vunpack.c.l.bf16 %v3870_v52  ;;  %v3400_v54 = vpop.f32.mrf.mxu0  ;;  %v3420_v20 = vpop.f32.mrf.mxu1  ;;  %v3845_v16 = vsel %vm1065_vm3, %v3844_v50, %v6271_v25  ;;  %v3803_v12 = vsel %vm1065_vm3, 0, %v3802_v61 }
 0x895   : > { %v3958_v19 = vmul.f32 %v6241_v14, %v3941_v2  ;;  %v3942_v9 = vadd.f32 %v3926_v35, %v3420_v20  ;;  %v3886_v62 = vpack.i.b16 %v3803_v12, %v3775_v42  ;;  %v3889_v28 = vshrl.u32 %v3803_v12, 16 }
 0x896   : > { %v3928_v39 = vunpack.c.l.bf16 %v3874_v57  ;;  %v3943_v18 = vadd.f32 %v3927_v8, %v6208_v5  ;;  %v3466_v6 = vpop.f32.mrf.mxu3  ;;  %v3530_v1 = vpop.f32.mrf.mxu2  ;;  %v3888_v46 = vshrl.u32 %v3775_v42, 16  ;;  %v6289_v5 = vperm.slane %v3817_v34, %v5223_v55 }
 0x897   : > { %v3990_v53 = vadd.f32 %v3974_v36, %v3958_v19  ;;  %v3959_v29 = vmul.f32 %v6241_v14, %v3942_v9  ;;  %v3931_v7 = vunpack.c.l.bf16 %v3886_v62  ;;  %v6292_v48 = vperm.slane %v3845_v16, %v5223_v55  ;;  %v935_v16 = vld [vmem:[%s6221_s10 + $0x28] sm:$0xf] }
 0x898   : > { %v3944_v3 = vadd.f32 %v3928_v39, %v3464_v24  ;;  %v3960_v21 = vmul.f32 %v6241_v14, %v3943_v18  ;;  %v3890_v36 = vpack.i.b16 %v3889_v28, %v3888_v46  ;;  %v3980_v56 = vunpack.c.l.bf16 %v936_v26  ;;  %v934_v24 = vld [vmem:[%s6221_s10 + $0x20] sm:$0xf]  ;;  %v940_v39 = vld [vmem:[%s6221_s10 + $0x50] sm:$0xf] }
 0x899   : > { %v4006_v32 = vpack.c.bf16 %v3990_v53, %v3990_v53  ;;  %v3991_v33 = vadd.f32 %v3975_v11, %v3959_v29  ;;  %v3947_v47 = vadd.f32 %v3931_v7, %v3530_v1  ;;  %v3929_v27 = vunpack.c.l.bf16 %v3878_v60 }
 0x89a   : > { %v3961_v10 = vmul.f32 %v6241_v14, %v3944_v3  ;;  %v3992_v63 = vadd.f32 %v3976_v59, %v3960_v21  ;;  %v3881_v45 = vshrl.u32 %v6266_v23, 16  ;;  %v3856_v11 = vrot.slane %v6292_v48, 4 }
 0x89b   : > { %4023 = vst.msk [vmem:[%s4960_s13] sm:$0xf] %vm4022_vm15, %v4006_v32  ;;  %v4007_v37 = vpack.c.bf16 %v3991_v33, %v3991_v33  ;;  %v3964_v44 = vmul.f32 %v6241_v14, %v3947_v47  ;;  %v3828_v31 = vrot.slane %v6289_v5, 4  ;;  %v3978_v15 = vunpack.c.l.bf16 %v934_v24 }
 0x89c   : > { %v3993_v40 = vadd.f32 %v3977_v41, %v3961_v10  ;;  %v4008_v30 = vpack.c.bf16 %v3992_v63, %v3992_v63  ;;  %v3422_v13 = vpop.f32.mrf.mxu1  ;;  %v3486_v59 = vpop.f32.mrf.mxu0  ;;  %v3932_v49 = vunpack.c.l.bf16 %v3890_v36  ;;  %v3880_v22 = vshrl.u32 %v6250_v0, 16  ;;  %v938_v63 = vld [vmem:[%s6221_s10 + $0x40] sm:$0xf] }
 0x89d   : > { %4024 = vst.msk [vmem:[%s4960_s13 + $0x4] sm:$0xf] %vm4022_vm15, %v4007_v37  ;;  %v3945_v4 = vadd.f32 %v3929_v27, %v3486_v59  ;;  %v3996_v23 = vadd.f32 %v3980_v56, %v3964_v44  ;;  %v3981_v50 = vunpack.c.l.bf16 %v937_v51  ;;  %v3857_v2 = vsel %vm1065_vm3, 0, %v3856_v11 }
 0x89e   : > { %v4009_v52 = vpack.c.bf16 %v3993_v40, %v3993_v40  ;;  %4025 = vst.msk [vmem:[%s4960_s13 + $0x8] sm:$0xf] %vm4022_vm15, %v4008_v30  ;;  %v3532_v43 = vpop.f32.mrf.mxu2  ;;  %v3552_v61 = vpop.f32.mrf.mxu3  ;;  %v3846_v41 = vrot.slane %v6271_v25, 4  ;;  %v3882_v57 = vpack.i.b16 %v3881_v45, %v3880_v22  ;;  %v3818_v0 = vrot.slane %v6261_v17, 4  ;;  %v941_v30 = vld [vmem:[%s6221_s10 + $0x58] sm:$0xf] }
 0x89f   : > { %v3962_v35 = vmul.f32 %v6241_v14, %v3945_v4  ;;  %v3948_v34 = vadd.f32 %v3932_v49, %v3552_v61  ;;  %v4012_v8 = vpack.c.bf16 %v3996_v23, %v3996_v23  ;;  %v3829_v54 = vsel %vm1065_vm3, 0, %v3828_v31 }
 0x8a0   : > { %4026 = vst.msk [vmem:[%s4960_s13 + $0xc] sm:$0xf] %vm4022_vm15, %v4009_v52  ;;  %v3902_v19 = vpack.i.b16 %v3857_v2, %v3829_v54  ;;  %v3930_v12 = vunpack.c.l.bf16 %v3882_v57  ;;  %v3847_v17 = vsel %vm1065_vm3, %v6256_v38, %v3846_v41  ;;  %v3979_v1 = vunpack.c.l.bf16 %v935_v16  ;;  %v944_v57 = vld [vmem:[%s6221_s10 + $0x70] sm:$0xf] }
 0x8a1   : > { %v3994_v20 = vadd.f32 %v3978_v15, %v3962_v35  ;;  %v3965_v42 = vmul.f32 %v6241_v14, %v3948_v34  ;;  %4029 = vst.msk [vmem:[%s4960_s13 + $0x18] sm:$0xf] %vm4022_vm15, %v4012_v8  ;;  %v3819_v62 = vsel %vm1065_vm3, %v6226_v58, %v3818_v0  ;;  %v3905_v26 = vshrl.u32 %v3857_v2, 16  ;;  %v939_v2 = vld [vmem:[%s6221_s10 + $0x48] sm:$0xf] }
 0x8a2   : > { %v3935_v29 = vunpack.c.l.bf16 %v3902_v19  ;;  %v3984_v3 = vunpack.c.l.bf16 %v940_v39  ;;  %v6327_v21 = vperm.slane %v3847_v17, %v5223_v55  ;;  %v3894_v58 = vpack.i.b16 %v6292_v48, %v6289_v5 }
 0x8a3   : > { %v4010_v25 = vpack.c.bf16 %v3994_v20, %v3994_v20  ;;  %v3997_v9 = vadd.f32 %v3981_v50, %v3965_v42  ;;  %v3904_v32 = vshrl.u32 %v3829_v54, 16  ;;  %v6335_v33 = vperm.slane %v3819_v62, %v5223_v55 }
 0x8a4   : > { %v3488_v18 = vpop.f32.mrf.mxu0  ;;  %v3508_v6 = vpop.f32.mrf.mxu1  ;;  %v3858_v56 = vrot.slane %v6327_v21, 4  ;;  %v3933_v27 = vunpack.c.l.bf16 %v3894_v58  ;;  %v3897_v51 = vshrl.u32 %v6292_v48, 16  ;;  %v3982_v40 = vunpack.c.l.bf16 %v938_v63  ;;  %v945_v58 = vld [vmem:[%s6221_s10 + $0x78] sm:$0xf] }
 0x8a5   : > { %4027 = vst.msk [vmem:[%s4960_s13 + $0x10] sm:$0xf] %vm4022_vm15, %v4010_v25  ;;  %v4013_v28 = vpack.c.bf16 %v3997_v9, %v3997_v9  ;;  %v3946_v53 = vadd.f32 %v3930_v12, %v3508_v6  ;;  %v3906_v47 = vpack.i.b16 %v3905_v26, %v3904_v32  ;;  %v3830_v55 = vrot.slane %v6335_v33, 4 }
 0x8a6   : > { %v3554_v60 = vpop.f32.mrf.mxu3  ;;  %v3618_v46 = vpop.f32.mrf.mxu2  ;;  %v3896_v31 = vshrl.u32 %v6289_v5, 16  ;;  %v3859_v49 = vsel %vm1065_vm3, 0, %v3858_v56  ;;  %v3985_v52 = vunpack.c.l.bf16 %v941_v30  ;;  %v3983_v54 = vunpack.c.l.bf16 %v939_v2 }
 0x8a7   : > { %4030 = vst.msk [vmem:[%s4960_s13 + $0x1c] sm:$0xf] %vm4022_vm15, %v4013_v28  ;;  %v3963_v38 = vmul.f32 %v6241_v14, %v3946_v53  ;;  %v3951_v7 = vadd.f32 %v3935_v29, %v3618_v46  ;;  %v3936_v59 = vunpack.c.l.bf16 %v3906_v47  ;;  %v3831_v43 = vsel %vm1065_vm3, 0, %v3830_v55  ;;  %v942_v28 = vld [vmem:[%s6221_s10 + $0x60] sm:$0xf] }
 0x8a8   : > { %v3898_v23 = vpack.i.b16 %v3897_v51, %v3896_v31  ;;  %v3918_v5 = vpack.i.b16 %v3859_v49, %v3831_v43  ;;  %v3921_v19 = vshrl.u32 %v3859_v49, 16  ;;  %v3988_v12 = vunpack.c.l.bf16 %v944_v57  ;;  %v4078_v2 = vld [vmem:[%s4960_s13 + $0x18] sm:$0xf] (%p4939_p5) }
 0x8a9   : > { %v3995_v36 = vadd.f32 %v3979_v1, %v3963_v38  ;;  %v3968_v10 = vmul.f32 %v6241_v14, %v3951_v7  ;;  %v3910_v18 = vpack.i.b16 %v6327_v21, %v6335_v33  ;;  %v3920_v6 = vshrl.u32 %v3831_v43, 16  ;;  %v4072_v43 = vld [vmem:[%s4960_s13 + $0xc] sm:$0xf] (%p4939_p5)  ;;  %4079 = vst [vmem:[%s4049_s27 + $0x30] sm:$0xf] (%p4939_p5), %v4078_v2 }
 0x8aa   : > { %v3934_v34 = vunpack.c.l.bf16 %v3898_v23  ;;  %v3939_v16 = vunpack.c.l.bf16 %v3918_v5  ;;  %v3913_v46 = vshrl.u32 %v6327_v21, 16  ;;  %v3986_v7 = vunpack.c.l.bf16 %v942_v28  ;;  %v4070_v23 = vld [vmem:[%s4960_s13 + $0x8] sm:$0xf] (%p4939_p5)  ;;  %4073 = vst [vmem:[%s4049_s27 + $0x18] sm:$0xf] (%p4939_p5), %v4072_v43 }
 0x8ab   : > { %v4011_v24 = vpack.c.bf16 %v3995_v36, %v3995_v36  ;;  %v4000_v37 = vadd.f32 %v3984_v3, %v3968_v10  ;;  %v3922_v53 = vpack.i.b16 %v3921_v19, %v3920_v6  ;;  %v3937_v60 = vunpack.c.l.bf16 %v3910_v18  ;;  %4071 = vst [vmem:[%s4049_s27 + $0x10] sm:$0xf] (%p4939_p5), %v4070_v23 }
 0x8ac   : > { %v3510_v45 = vpop.f32.mrf.mxu1  ;;  %v3574_v11 = vpop.f32.mrf.mxu0  ;;  %v3912_v63 = vshrl.u32 %v6335_v33, 16 }
 0x8ad   : > { %4028 = vst.msk [vmem:[%s4960_s13 + $0x14] sm:$0xf] %vm4022_vm15, %v4011_v24  ;;  %v4016_v44 = vpack.c.bf16 %v4000_v37, %v4000_v37  ;;  %v3949_v13 = vadd.f32 %v3933_v27, %v3574_v11  ;;  %v3940_v10 = vunpack.c.l.bf16 %v3922_v53  ;;  %v3989_v37 = vunpack.c.l.bf16 %v945_v58  ;;  %v943_v11 = vld [vmem:[%s6221_s10 + $0x68] sm:$0xf] }
 0x8ae   : > { %v3620_v4 = vpop.f32.mrf.mxu2  ;;  %v3640_v15 = vpop.f32.mrf.mxu3  ;;  %v3914_v27 = vpack.i.b16 %v3913_v46, %v3912_v63  ;;  %v3987_v31 = vunpack.c.l.bf16 %v943_v11  ;;  %v4080_v5 = vld [vmem:[%s4960_s13 + $0x1c] sm:$0xf] (%p4939_p5) }
 0x8af   : > { %4033 = vst.msk [vmem:[%s4960_s13 + $0x28] sm:$0xf] %vm4022_vm15, %v4016_v44  ;;  %v3966_v48 = vmul.f32 %v6241_v14, %v3949_v13  ;;  %v3952_v22 = vadd.f32 %v3936_v59, %v3640_v15 }
 0x8b0   : > { %v3938_v55 = vunpack.c.l.bf16 %v3914_v27  ;;  %4081 = vst [vmem:[%s4049_s27 + $0x38] sm:$0xf] (%p4939_p5), %v4080_v5 }
 0x8b1   : > { %v3998_v61 = vadd.f32 %v3982_v40, %v3966_v48  ;;  %v3969_v50 = vmul.f32 %v6241_v14, %v3952_v22 }
 0x8b3   : > { %v4014_v41 = vpack.c.bf16 %v3998_v61, %v3998_v61  ;;  %v4001_v35 = vadd.f32 %v3985_v52, %v3969_v50  ;;  %v4068_v52 = vld [vmem:[%s4960_s13 + $0x4] sm:$0xf] (%p4939_p5)  ;;  %v4074_v61 = vld [vmem:[%s4960_s13 + $0x10] sm:$0xf] (%p4939_p5) }
 0x8b4   : > { %v3576_v0 = vpop.f32.mrf.mxu0  ;;  %v3596_v8 = vpop.f32.mrf.mxu1  ;;  %4069 = vst [vmem:[%s4049_s27 + $0x8] sm:$0xf] (%p4939_p5), %v4068_v52  ;;  %v4076_v50 = vld [vmem:[%s4960_s13 + $0x14] sm:$0xf] (%p4939_p5) }
 0x8b5   : > { %4031 = vst.msk [vmem:[%s4960_s13 + $0x20] sm:$0xf] %vm4022_vm15, %v4014_v41  ;;  %v4017_v20 = vpack.c.bf16 %v4001_v35, %v4001_v35  ;;  %v3950_v42 = vadd.f32 %v3934_v34, %v3596_v8 }
 0x8b6   : > { %v3642_v25 = vpop.f32.mrf.mxu3  ;;  %v3706_v9 = vpop.f32.mrf.mxu2  ;;  %4075 = vst [vmem:[%s4049_s27 + $0x20] sm:$0xf] (%p4939_p5), %v4074_v61  ;;  %v4086_v34 = vld [vmem:[%s4960_s13 + $0x28] sm:$0xf] (%p4939_p5) }
 0x8b7   : > { %4034 = vst.msk [vmem:[%s4960_s13 + $0x2c] sm:$0xf] %vm4022_vm15, %v4017_v20  ;;  %v3967_v39 = vmul.f32 %v6241_v14, %v3950_v42  ;;  %v3955_v17 = vadd.f32 %v3939_v16, %v3706_v9 }
 0x8b8   : > { %4077 = vst [vmem:[%s4049_s27 + $0x28] sm:$0xf] (%p4939_p5), %v4076_v50 }
 0x8b9   : > { %v3999_v1 = vadd.f32 %v3983_v54, %v3967_v39  ;;  %v3972_v62 = vmul.f32 %v6241_v14, %v3955_v17  ;;  %4087 = vst [vmem:[%s4049_s27 + $0x50] sm:$0xf] (%p4939_p5), %v4086_v34 }
 0x8bb   : > { %v4015_v29 = vpack.c.bf16 %v3999_v1, %v3999_v1  ;;  %v4004_v26 = vadd.f32 %v3988_v12, %v3972_v62 }
 0x8bc   : > { %v3598_v3 = vpop.f32.mrf.mxu1  ;;  %v3662_v38 = vpop.f32.mrf.mxu0  ;;  %v4082_v41 = vld [vmem:[%s4960_s13 + $0x20] sm:$0xf] (%p4939_p5) }
 0x8bd   : > { %4032 = vst.msk [vmem:[%s4960_s13 + $0x24] sm:$0xf] %vm4022_vm15, %v4015_v29  ;;  %v4020_v32 = vpack.c.bf16 %v4004_v26, %v4004_v26  ;;  %v3953_v36 = vadd.f32 %v3937_v60, %v3662_v38 }
 0x8be   : > { %v3708_v47 = vpop.f32.mrf.mxu2  ;;  %v3728_v56 = vpop.f32.mrf.mxu3  ;;  %4083 = vst [vmem:[%s4049_s27 + $0x40] sm:$0xf] (%p4939_p5), %v4082_v41  ;;  %v4088_v57 = vld [vmem:[%s4960_s13 + $0x2c] sm:$0xf] (%p4939_p5) }
 0x8bf   : > { %4037 = vst.msk [vmem:[%s4960_s13 + $0x38] sm:$0xf] %vm4022_vm15, %v4020_v32  ;;  %v3970_v24 = vmul.f32 %v6241_v14, %v3953_v36  ;;  %v3956_v21 = vadd.f32 %v3940_v10, %v3728_v56 }
 0x8c0   : > { %4089 = vst [vmem:[%s4049_s27 + $0x58] sm:$0xf] (%p4939_p5), %v4088_v57 }
 0x8c1   : > { %v4002_v51 = vadd.f32 %v3986_v7, %v3970_v24  ;;  %v3973_v45 = vmul.f32 %v6241_v14, %v3956_v21 }
 0x8c3   : > { %v4018_v40 = vpack.c.bf16 %v4002_v51, %v4002_v51  ;;  %v4005_v30 = vadd.f32 %v3989_v37, %v3973_v45 }
 0x8c4   : > { %v3664_v33 = vpop.f32.mrf.mxu0  ;;  %v3684_v44 = vpop.f32.mrf.mxu1  ;;  %v4084_v35 = vld [vmem:[%s4960_s13 + $0x24] sm:$0xf] (%p4939_p5) }
 0x8c5   : > { %4035 = vst.msk [vmem:[%s4960_s13 + $0x30] sm:$0xf] %vm4022_vm15, %v4018_v40  ;;  %v4021_v13 = vpack.c.bf16 %v4005_v30, %v4005_v30  ;;  %v3954_v59 = vadd.f32 %v3938_v55, %v3684_v44 }
 0x8c6   : > { %v3730_v4 = vpop.f32.mrf.mxu3  ;;  %4085 = vst [vmem:[%s4049_s27 + $0x48] sm:$0xf] (%p4939_p5), %v4084_v35  ;;  %v4094_v54 = vld [vmem:[%s4960_s13 + $0x38] sm:$0xf] (%p4939_p5) }
 0x8c7   : > { %4038 = vst.msk [vmem:[%s4960_s13 + $0x3c] sm:$0xf] %vm4022_vm15, %v4021_v13  ;;  %v3971_v15 = vmul.f32 %v6241_v14, %v3954_v59  ;;  %v4066_v14 = vld [vmem:[%s4960_s13] sm:$0xf] (%p4939_p5) }
 0x8c8   : > { %4067 = vst [vmem:[%s4049_s27] sm:$0xf] (%p4939_p5), %v4066_v14 }
 0x8c9   : > { %v4003_v49 = vadd.f32 %v3987_v31, %v3971_v15  ;;  %4045 = sbr.rel (!%p4939_p5) target bundleno = 2262 (0x8d6), region = 44  ;;  %4095 = vst [vmem:[%s4049_s27 + $0x70] sm:$0xf] (%p4939_p5), %v4094_v54 }
 0x8cb   : > { %v4019_v48 = vpack.c.bf16 %v4003_v49, %v4003_v49 }
 0x8cc   : > { %v3686_v22 = vpop.f32.mrf.mxu1  ;;  %v4090_v0 = vld [vmem:[%s4960_s13 + $0x30] sm:$0xf] (%p4939_p5) }
 0x8cd   : > { %4036 = vst.msk [vmem:[%s4960_s13 + $0x34] sm:$0xf] %vm4022_vm15, %v4019_v48 }
 0x8ce   : > { %4091 = vst [vmem:[%s4049_s27 + $0x60] sm:$0xf] %v4090_v0  ;;  %v4096_v20 = vld [vmem:[%s4960_s13 + $0x3c] sm:$0xf] }
 0x8cf   : > { %4097 = vst [vmem:[%s4049_s27 + $0x78] sm:$0xf] %v4096_v20 }
 0x8d4   : > { %v4092_v8 = vld [vmem:[%s4960_s13 + $0x34] sm:$0xf] }
 0x8d5   : > { %4093 = vst [vmem:[%s4049_s27 + $0x68] sm:$0xf] %v4092_v8 }
 0x8d6 PF: > { %s15_s23 = sadd.s32 1, %s4861_s23   ;;  %s6460_s17 = smov %s4841_s18 }
 0x8d7   : > { %p12_p11 = scmp.ge.s32.totalorder %s15_s23, 6   ;;  %s6461_s18 = smov %s4950_s5 }
 0x8d8   : > { %s6462_s19 = smov %s4853_s21  ;;  %s6463_s20 = smov %s4857_s22 }
 0x8d9   : > { %s6464_s21 = smov %s6467_s3  ;;  %s6465_s22 = smov %s6471_s24 }
 0x8da   :  { %14 = sbr.rel (!%p12_p11) target bundleno = 6 (0x6), region = 115 }

</bundles_post_ra>
